<compile_context>
chip_gen: v7x
topology: tpu7x:2x2x1
jax: 0.10.0
libtpu: 0.0.40
codegen_flags: <defaults>
</compile_context>

<pallas_src>
import functools

import jax
import jax.numpy as jnp
from jax import lax
from jax.experimental import pallas as pl
from jax.experimental.pallas import tpu as pltpu

C = 128        # transformer channels
C_IN = 64      # input channels to conv1
NUM_SA = 4     # number of SA_Layer blocks


def _pt_last_kernel(x_ref, w1_ref, bn1s_ref, bn1b_ref,
                    w2_ref, bn2s_ref, bn2b_ref,
                    wfold_ref, wv_ref, bv_ref, wt_ref, bt_ref,
                    bns_ref, bnb_ref, out_ref, *, use_bf16_matmuls):
    # Channel-major compute: h is (C, N); points live on the lane axis.
    x = x_ref[0]                                                          # (64, N)

    # conv1 (1x1, no bias) -> bn1 -> relu
    h = jnp.dot(w1_ref[...], x, preferred_element_type=jnp.float32)
    h = jnp.maximum(h * bn1s_ref[...] + bn1b_ref[...], 0.0)              # (64, N)

    # conv2 (1x1, no bias) -> bn2 -> relu
    h = jnp.dot(w2_ref[...], h, preferred_element_type=jnp.float32)
    h = jnp.maximum(h * bn2s_ref[...] + bn2b_ref[...], 0.0)              # (C, N)

    cast = (lambda a: a.astype(jnp.bfloat16)) if use_bf16_matmuls else (lambda a: a)

    # 4 stacked SA layers, unrolled (weights indexed by l)
    for l in range(NUM_SA):
        # folded q/k:  energy[i, j] = h_i^T (wqk wqk^T) h_j  -- K = 128 contraction
        a = jnp.dot(wfold_ref[l], h, preferred_element_type=jnp.float32)   # (C, N)
        energy = lax.dot_general(cast(h), cast(a), (((0,), (0,)), ((), ())),
                                 preferred_element_type=jnp.float32)       # (N, N)

        # softmax over last dim, then column renorm (torch: sum(dim=1))
        e = jnp.exp(energy - jnp.max(energy, axis=-1, keepdims=True))
        att = e / jnp.sum(e, axis=-1, keepdims=True)
        att = att / (1e-9 + jnp.sum(att, axis=0, keepdims=True))

        # v_conv (with bias);  x_r = x_v @ attention  (plain matmul, no transpose)
        v = jnp.dot(wv_ref[l], h, preferred_element_type=jnp.float32) + bv_ref[l]
        xr = jnp.dot(cast(v), cast(att), preferred_element_type=jnp.float32)  # (C, N)

        # trans_conv(x - x_r) -> after_norm (affine) -> relu ; residual add
        t = jnp.dot(wt_ref[l], h - xr, preferred_element_type=jnp.float32) + bt_ref[l]
        t = jnp.maximum(t * bns_ref[l] + bnb_ref[l], 0.0)
        h = h + t

        out_ref[0, l * C:(l + 1) * C, :] = h


def point_transformer_last(x_bcn, params, use_bf16_matmuls=True):
    """x_bcn: (B, 64, N) float32, PyTorch NCW layout. Returns (B, 4*C, N) NCW."""
    B, cin, N = x_bcn.shape
    assert cin == C_IN
    (w1, bn1s, bn1b, w2, bn2s, bn2b, wqk, wv, bv, wt, bt, bns, bnb) = params

    # ---- one-time parameter prep (tiny, outside the hot path) ----
    # conv weights as (Cout, Cin) so the kernel computes W @ h directly.
    w1_k = jnp.transpose(w1)                        # (64, 64)
    w2_k = jnp.transpose(w2)                        # (C, 64)
    wv_k = jnp.transpose(wv, (0, 2, 1))             # (L, C, C)
    wt_k = jnp.transpose(wt, (0, 2, 1))             # (L, C, C)
    # fold the shared q/k projection into a symmetric (C, C) matrix per layer.
    wfold = jnp.einsum('lcd,led->lce', wqk, wqk)    # (L, C, C)
    # per-channel vectors as (C, 1) columns for channel-major broadcasting.
    col = lambda p: jnp.transpose(p)                # (1, C)   -> (C, 1)
    col3 = lambda p: jnp.transpose(p, (0, 2, 1))    # (L, 1, C)-> (L, C, 1)
    bn1s_k, bn1b_k = col(bn1s), col(bn1b)
    bn2s_k, bn2b_k = col(bn2s), col(bn2b)
    bv_k, bt_k, bns_k, bnb_k = col3(bv), col3(bt), col3(bns), col3(bnb)

    flops = B * (2 * N * C_IN * C_IN + 2 * N * C_IN * C
                 + NUM_SA * (6 * N * C * C + 4 * N * N * C))
    transcendentals = B * NUM_SA * N * N
    inputs = (x_bcn, w1_k, bn1s_k, bn1b_k, w2_k, bn2s_k, bn2b_k,
              wfold, wv_k, bv_k, wt_k, bt_k, bns_k, bnb_k)
    bytes_accessed = int(sum(int(t.size) * t.dtype.itemsize for t in inputs)
                         + B * NUM_SA * C * N * 4)

    kernel = functools.partial(_pt_last_kernel,
                               use_bf16_matmuls=bool(use_bf16_matmuls))

    return pl.pallas_call(
        kernel,
        out_shape=jax.ShapeDtypeStruct((B, NUM_SA * C, N), jnp.float32),
        grid_spec=pltpu.PrefetchScalarGridSpec(
            num_scalar_prefetch=0,
            grid=(B,),
            in_specs=[
                pl.BlockSpec((1, C_IN, N), lambda b: (b, 0, 0)),          # x (NCW)
                pl.BlockSpec((C_IN, C_IN), lambda b: (0, 0)),             # w1
                pl.BlockSpec((C_IN, 1), lambda b: (0, 0)),                # bn1 scale
                pl.BlockSpec((C_IN, 1), lambda b: (0, 0)),                # bn1 shift
                pl.BlockSpec((C, C_IN), lambda b: (0, 0)),                # w2
                pl.BlockSpec((C, 1), lambda b: (0, 0)),                   # bn2 scale
                pl.BlockSpec((C, 1), lambda b: (0, 0)),                   # bn2 shift
                pl.BlockSpec((NUM_SA, C, C), lambda b: (0, 0, 0)),        # folded q/k
                pl.BlockSpec((NUM_SA, C, C), lambda b: (0, 0, 0)),        # wv
                pl.BlockSpec((NUM_SA, C, 1), lambda b: (0, 0, 0)),        # bv
                pl.BlockSpec((NUM_SA, C, C), lambda b: (0, 0, 0)),        # wt
                pl.BlockSpec((NUM_SA, C, 1), lambda b: (0, 0, 0)),        # bt
                pl.BlockSpec((NUM_SA, C, 1), lambda b: (0, 0, 0)),        # after_norm scale
                pl.BlockSpec((NUM_SA, C, 1), lambda b: (0, 0, 0)),        # after_norm shift
            ],
            out_specs=pl.BlockSpec((1, NUM_SA * C, N), lambda b: (b, 0, 0)),
        ),
        compiler_params=pltpu.CompilerParams(
            dimension_semantics=("parallel",),
            # Full-N attention intermediates exceed the 16/32 MiB scoped default
            # at production N (1024-2048); lift the limit (v5e/v6e).
            vmem_limit_bytes=96 * 1024 * 1024),
        cost_estimate=pl.CostEstimate(
            flops=int(flops),
            transcendentals=int(transcendentals),
            bytes_accessed=bytes_accessed),
    )(x_bcn.astype(jnp.float32), w1_k, bn1s_k, bn1b_k, w2_k, bn2s_k, bn2b_k,
      wfold, wv_k, bv_k, wt_k, bt_k, bns_k, bnb_k)


# ---------------- deterministic parameter construction ----------------

def _make_bn(key, c):
    k1, k2, k3, k4 = jax.random.split(key, 4)
    gamma = 0.5 + jax.random.uniform(k1, (1, c))
    beta = 0.1 * jax.random.normal(k2, (1, c))
    mean = 0.1 * jax.random.normal(k3, (1, c))
    var = 0.5 + jax.random.uniform(k4, (1, c))
    eps = 1e-5
    scale = gamma / jnp.sqrt(var + eps)
    shift = beta - mean * scale
    return scale.astype(jnp.float32), shift.astype(jnp.float32)


def init_params(key):
    keys = jax.random.split(key, 5)

    def conv_w(k, cin, cout):   # stored transposed: (cin, cout)
        return (jax.random.normal(k, (cin, cout)) / jnp.sqrt(cin)).astype(jnp.float32)

    w1 = conv_w(keys[0], C_IN, C_IN)
    bn1s, bn1b = _make_bn(keys[1], C_IN)
    w2 = conv_w(keys[2], C_IN, C)
    bn2s, bn2b = _make_bn(keys[3], C)

    sa_keys = jax.random.split(keys[4], NUM_SA)
    wqk, wv, bv, wt, bt, bns, bnb = [], [], [], [], [], [], []
    for l in range(NUM_SA):
        sk = jax.random.split(sa_keys[l], 6)
        wqk.append(conv_w(sk[0], C, C // 4))          # q_conv.weight == k_conv.weight
        wv.append(conv_w(sk[1], C, C))
        bv.append((0.05 * jax.random.normal(sk[2], (1, C))).astype(jnp.float32))
        wt.append(conv_w(sk[3], C, C))
        bt.append((0.05 * jax.random.normal(sk[4], (1, C))).astype(jnp.float32))
        s, b = _make_bn(sk[5], C)
        bns.append(s)
        bnb.append(b)

    st = lambda xs: jnp.stack(xs, axis=0)
    return (w1, bn1s, bn1b, w2, bn2s, bn2b,
            st(wqk), st(wv), st(bv), st(wt), st(bt), st(bns), st(bnb))


# ---------------- pure-JAX reference (PyTorch (B,C,N) semantics) ----------------

def reference(x_bcn, params):
    w1, bn1s, bn1b, w2, bn2s, bn2b, wqk, wv, bv, wt, bt, bns, bnb = params

    def conv(x, w_t):            # (B, Cin, N) x (Cin, Cout) -> (B, Cout, N)
        return jnp.einsum('bcn,cd->bdn', x, w_t)

    def bn(x, s, b):             # per-channel affine
        return x * s[0][None, :, None] + b[0][None, :, None]

    h = jax.nn.relu(bn(conv(x_bcn, w1), bn1s, bn1b))
    h = jax.nn.relu(bn(conv(h, w2), bn2s, bn2b))
    outs = []
    for l in range(NUM_SA):
        xq = jnp.transpose(conv(h, wqk[l]), (0, 2, 1))
        xk = conv(h, wqk[l])
        xv = conv(h, wv[l]) + bv[l][0][None, :, None]
        energy = jnp.einsum('bnd,bdm->bnm', xq, xk)
        att = jax.nn.softmax(energy, axis=-1)
        att = att / (1e-9 + jnp.sum(att, axis=1, keepdims=True))
        xr = jnp.einsum('bcn,bnm->bcm', xv, att)
        t = conv(h - xr, wt[l]) + bt[l][0][None, :, None]
        t = jax.nn.relu(bn(t, bns[l], bnb[l]))
        h = h + t
        outs.append(h)
    return jnp.concatenate(outs, axis=1)


if __name__ == "__main__":
    key = jax.random.PRNGKey(0)
    kx, kp = jax.random.split(key)
    B, N = 2, 32
    x = jax.random.normal(kx, (B, C_IN, N), dtype=jnp.float32)   # (B, 64, N), NCW
    params = init_params(kp)

    ref = reference(x, params)

    # Exact-precision path: strict semantic check against the PyTorch-equivalent reference.
    out_f32 = jax.block_until_ready(
        point_transformer_last(x, params, use_bf16_matmuls=False))
    assert out_f32.shape == (B, NUM_SA * C, N)
    if not jnp.allclose(out_f32, ref, atol=1e-3, rtol=1e-3):
        raise AssertionError("Pallas kernel (f32 matmuls) mismatch vs reference")

    # Performance path: bf16 MXU operands for the two O(N^2) matmuls (f32 accumulate).
    out_bf16 = jax.block_until_ready(
        point_transformer_last(x, params, use_bf16_matmuls=True))
    assert out_bf16.shape == (B, NUM_SA * C, N)
    rel = jnp.sqrt(jnp.sum((out_bf16 - ref) ** 2) / jnp.sum(ref ** 2))
    if not bool(jnp.isfinite(rel)) or float(rel) > 0.25:
        raise AssertionError("Pallas kernel (bf16 matmuls) deviates too much from reference")

    print("KERNEL_OK")
</pallas_src>

<mosaic_0001>
module attributes {stable_mosaic.version = 11 : i64} {
  func.func @_pt_last_kernel(%arg0: i32, %arg1: memref<1x64x32xf32, #tpu.memory_space<vmem>>, %arg2: memref<64x64xf32, #tpu.memory_space<vmem>>, %arg3: memref<64x1xf32, #tpu.memory_space<vmem>>, %arg4: memref<64x1xf32, #tpu.memory_space<vmem>>, %arg5: memref<128x64xf32, #tpu.memory_space<vmem>>, %arg6: memref<128x1xf32, #tpu.memory_space<vmem>>, %arg7: memref<128x1xf32, #tpu.memory_space<vmem>>, %arg8: memref<4x128x128xf32, #tpu.memory_space<vmem>>, %arg9: memref<4x128x128xf32, #tpu.memory_space<vmem>>, %arg10: memref<4x128x1xf32, #tpu.memory_space<vmem>>, %arg11: memref<4x128x128xf32, #tpu.memory_space<vmem>>, %arg12: memref<4x128x1xf32, #tpu.memory_space<vmem>>, %arg13: memref<4x128x1xf32, #tpu.memory_space<vmem>>, %arg14: memref<4x128x1xf32, #tpu.memory_space<vmem>>, %arg15: memref<1x512x32xf32, #tpu.memory_space<vmem>>) attributes {dimension_semantics = [#tpu.dimension_semantics<parallel>], iteration_bounds = array<i64: 2>, scalar_prefetch = 0 : i64, scratch_operands = 0 : i64, tpu.core_type = #tpu.core_type<tc>, window_params = [{transform_indices = @transform_0, window_bounds = array<i64: 1, 64, 32>}, {pipeline_mode = #tpu.pipeline_mode<synchronous>, transform_indices = @transform_1, window_bounds = array<i64: 64, 64>}, {pipeline_mode = #tpu.pipeline_mode<synchronous>, transform_indices = @transform_2, window_bounds = array<i64: 64, 1>}, {pipeline_mode = #tpu.pipeline_mode<synchronous>, transform_indices = @transform_3, window_bounds = array<i64: 64, 1>}, {pipeline_mode = #tpu.pipeline_mode<synchronous>, transform_indices = @transform_4, window_bounds = array<i64: 128, 64>}, {pipeline_mode = #tpu.pipeline_mode<synchronous>, transform_indices = @transform_5, window_bounds = array<i64: 128, 1>}, {pipeline_mode = #tpu.pipeline_mode<synchronous>, transform_indices = @transform_6, window_bounds = array<i64: 128, 1>}, {pipeline_mode = #tpu.pipeline_mode<synchronous>, transform_indices = @transform_7, window_bounds = array<i64: 4, 128, 128>}, {pipeline_mode = #tpu.pipeline_mode<synchronous>, transform_indices = @transform_8, window_bounds = array<i64: 4, 128, 128>}, {pipeline_mode = #tpu.pipeline_mode<synchronous>, transform_indices = @transform_9, window_bounds = array<i64: 4, 128, 1>}, {pipeline_mode = #tpu.pipeline_mode<synchronous>, transform_indices = @transform_10, window_bounds = array<i64: 4, 128, 128>}, {pipeline_mode = #tpu.pipeline_mode<synchronous>, transform_indices = @transform_11, window_bounds = array<i64: 4, 128, 1>}, {pipeline_mode = #tpu.pipeline_mode<synchronous>, transform_indices = @transform_12, window_bounds = array<i64: 4, 128, 1>}, {pipeline_mode = #tpu.pipeline_mode<synchronous>, transform_indices = @transform_13, window_bounds = array<i64: 4, 128, 1>}, {transform_indices = @transform_14, window_bounds = array<i64: 1, 512, 32>}]} {
    %c0 = arith.constant 0 : index
    %c0_0 = arith.constant 0 : index
    %c0_1 = arith.constant 0 : index
    %0 = vector.load %arg1[%c0, %c0_0, %c0_1] : memref<1x64x32xf32, #tpu.memory_space<vmem>>, vector<1x64x32xf32>
    %1 = vector.shape_cast %0 : vector<1x64x32xf32> to vector<64x32xf32>
    %c0_2 = arith.constant 0 : index
    %c0_3 = arith.constant 0 : index
    %2 = vector.load %arg2[%c0_2, %c0_3] : memref<64x64xf32, #tpu.memory_space<vmem>>, vector<64x64xf32>
    %cst = arith.constant dense<0.000000e+00> : vector<64x32xf32>
    %3 = tpu.matmul %2, %1, %cst {dimension_numbers = #tpu.dot_dimension_numbers<[1], [0], [0], [1], [0, 0, 1, 1], [], []>} : vector<64x64xf32>, vector<64x32xf32>, vector<64x32xf32> -> vector<64x32xf32>
    %c0_4 = arith.constant 0 : index
    %c0_5 = arith.constant 0 : index
    %4 = vector.load %arg3[%c0_4, %c0_5] : memref<64x1xf32, #tpu.memory_space<vmem>>, vector<64x1xf32>
    %5 = vector.broadcast %4 : vector<64x1xf32> to vector<64x32xf32>
    %6 = arith.mulf %3, %5 : vector<64x32xf32>
    %c0_6 = arith.constant 0 : index
    %c0_7 = arith.constant 0 : index
    %7 = vector.load %arg4[%c0_6, %c0_7] : memref<64x1xf32, #tpu.memory_space<vmem>>, vector<64x1xf32>
    %8 = vector.broadcast %7 : vector<64x1xf32> to vector<64x32xf32>
    %9 = arith.addf %6, %8 : vector<64x32xf32>
    %cst_8 = arith.constant 0.000000e+00 : f32
    %10 = vector.broadcast %cst_8 : f32 to vector<64x32xf32>
    %11 = arith.maximumf %9, %10 : vector<64x32xf32>
    %c0_9 = arith.constant 0 : index
    %c0_10 = arith.constant 0 : index
    %12 = vector.load %arg5[%c0_9, %c0_10] : memref<128x64xf32, #tpu.memory_space<vmem>>, vector<128x64xf32>
    %cst_11 = arith.constant dense<0.000000e+00> : vector<128x32xf32>
    %13 = tpu.matmul %12, %11, %cst_11 {dimension_numbers = #tpu.dot_dimension_numbers<[1], [0], [0], [1], [0, 0, 1, 1], [], []>} : vector<128x64xf32>, vector<64x32xf32>, vector<128x32xf32> -> vector<128x32xf32>
    %c0_12 = arith.constant 0 : index
    %c0_13 = arith.constant 0 : index
    %14 = vector.load %arg6[%c0_12, %c0_13] : memref<128x1xf32, #tpu.memory_space<vmem>>, vector<128x1xf32>
    %15 = vector.broadcast %14 : vector<128x1xf32> to vector<128x32xf32>
    %16 = arith.mulf %13, %15 : vector<128x32xf32>
    %c0_14 = arith.constant 0 : index
    %c0_15 = arith.constant 0 : index
    %17 = vector.load %arg7[%c0_14, %c0_15] : memref<128x1xf32, #tpu.memory_space<vmem>>, vector<128x1xf32>
    %18 = vector.broadcast %17 : vector<128x1xf32> to vector<128x32xf32>
    %19 = arith.addf %16, %18 : vector<128x32xf32>
    %cst_16 = arith.constant 0.000000e+00 : f32
    %20 = vector.broadcast %cst_16 : f32 to vector<128x32xf32>
    %21 = arith.maximumf %19, %20 : vector<128x32xf32>
    %c0_17 = arith.constant 0 : index
    %c0_18 = arith.constant 0 : index
    %c0_19 = arith.constant 0 : index
    %22 = vector.load %arg8[%c0_17, %c0_18, %c0_19] : memref<4x128x128xf32, #tpu.memory_space<vmem>>, vector<1x128x128xf32>
    %23 = vector.shape_cast %22 : vector<1x128x128xf32> to vector<128x128xf32>
    %cst_20 = arith.constant dense<0.000000e+00> : vector<128x32xf32>
    %24 = tpu.matmul %23, %21, %cst_20 {dimension_numbers = #tpu.dot_dimension_numbers<[1], [0], [0], [1], [0, 0, 1, 1], [], []>} : vector<128x128xf32>, vector<128x32xf32>, vector<128x32xf32> -> vector<128x32xf32>
    %cst_21 = arith.constant dense<0.000000e+00> : vector<32x32xf32>
    %25 = tpu.matmul %21, %24, %cst_21 {dimension_numbers = #tpu.dot_dimension_numbers<[0], [0], [1], [1], [0, 1, 1, 1], [], []>} : vector<128x32xf32>, vector<128x32xf32>, vector<32x32xf32> -> vector<32x32xf32>
    %cst_22 = arith.constant dense<0xFF800000> : vector<32xf32>
    %26 = vector.multi_reduction <maximumf>, %25, %cst_22 [1] : vector<32x32xf32> to vector<32xf32>
    %27 = vector.shape_cast %26 : vector<32xf32> to vector<32x1xf32>
    %28 = vector.broadcast %27 : vector<32x1xf32> to vector<32x32xf32>
    %29 = arith.subf %25, %28 : vector<32x32xf32>
    %30 = math.exp %29 : vector<32x32xf32>
    %cst_23 = arith.constant dense<0.000000e+00> : vector<32xf32>
    %31 = vector.multi_reduction <add>, %30, %cst_23 [1] : vector<32x32xf32> to vector<32xf32>
    %32 = vector.shape_cast %31 : vector<32xf32> to vector<32x1xf32>
    %33 = vector.broadcast %32 : vector<32x1xf32> to vector<32x32xf32>
    %34 = arith.divf %30, %33 : vector<32x32xf32>
    %cst_24 = arith.constant dense<0.000000e+00> : vector<32xf32>
    %35 = vector.multi_reduction <add>, %34, %cst_24 [0] : vector<32x32xf32> to vector<32xf32>
    %36 = vector.shape_cast %35 : vector<32xf32> to vector<1x32xf32>
    %cst_25 = arith.constant 9.99999971E-10 : f32
    %37 = vector.broadcast %cst_25 : f32 to vector<1x32xf32>
    %38 = arith.addf %37, %36 : vector<1x32xf32>
    %39 = vector.broadcast %38 : vector<1x32xf32> to vector<32x32xf32>
    %40 = arith.divf %34, %39 : vector<32x32xf32>
    %c0_26 = arith.constant 0 : index
    %c0_27 = arith.constant 0 : index
    %c0_28 = arith.constant 0 : index
    %41 = vector.load %arg9[%c0_26, %c0_27, %c0_28] : memref<4x128x128xf32, #tpu.memory_space<vmem>>, vector<1x128x128xf32>
    %42 = vector.shape_cast %41 : vector<1x128x128xf32> to vector<128x128xf32>
    %cst_29 = arith.constant dense<0.000000e+00> : vector<128x32xf32>
    %43 = tpu.matmul %42, %21, %cst_29 {dimension_numbers = #tpu.dot_dimension_numbers<[1], [0], [0], [1], [0, 0, 1, 1], [], []>} : vector<128x128xf32>, vector<128x32xf32>, vector<128x32xf32> -> vector<128x32xf32>
    %c0_30 = arith.constant 0 : index
    %c0_31 = arith.constant 0 : index
    %c0_32 = arith.constant 0 : index
    %44 = vector.load %arg10[%c0_30, %c0_31, %c0_32] : memref<4x128x1xf32, #tpu.memory_space<vmem>>, vector<1x128x1xf32>
    %45 = vector.shape_cast %44 : vector<1x128x1xf32> to vector<128x1xf32>
    %46 = vector.broadcast %45 : vector<128x1xf32> to vector<128x32xf32>
    %47 = arith.addf %43, %46 : vector<128x32xf32>
    %cst_33 = arith.constant dense<0.000000e+00> : vector<128x32xf32>
    %48 = tpu.matmul %47, %40, %cst_33 {dimension_numbers = #tpu.dot_dimension_numbers<[1], [0], [0], [1], [0, 0, 1, 1], [], []>} : vector<128x32xf32>, vector<32x32xf32>, vector<128x32xf32> -> vector<128x32xf32>
    %c0_34 = arith.constant 0 : index
    %c0_35 = arith.constant 0 : index
    %c0_36 = arith.constant 0 : index
    %49 = vector.load %arg11[%c0_34, %c0_35, %c0_36] : memref<4x128x128xf32, #tpu.memory_space<vmem>>, vector<1x128x128xf32>
    %50 = vector.shape_cast %49 : vector<1x128x128xf32> to vector<128x128xf32>
    %51 = arith.subf %21, %48 : vector<128x32xf32>
    %cst_37 = arith.constant dense<0.000000e+00> : vector<128x32xf32>
    %52 = tpu.matmul %50, %51, %cst_37 {dimension_numbers = #tpu.dot_dimension_numbers<[1], [0], [0], [1], [0, 0, 1, 1], [], []>} : vector<128x128xf32>, vector<128x32xf32>, vector<128x32xf32> -> vector<128x32xf32>
    %c0_38 = arith.constant 0 : index
    %c0_39 = arith.constant 0 : index
    %c0_40 = arith.constant 0 : index
    %53 = vector.load %arg12[%c0_38, %c0_39, %c0_40] : memref<4x128x1xf32, #tpu.memory_space<vmem>>, vector<1x128x1xf32>
    %54 = vector.shape_cast %53 : vector<1x128x1xf32> to vector<128x1xf32>
    %55 = vector.broadcast %54 : vector<128x1xf32> to vector<128x32xf32>
    %56 = arith.addf %52, %55 : vector<128x32xf32>
    %c0_41 = arith.constant 0 : index
    %c0_42 = arith.constant 0 : index
    %c0_43 = arith.constant 0 : index
    %57 = vector.load %arg13[%c0_41, %c0_42, %c0_43] : memref<4x128x1xf32, #tpu.memory_space<vmem>>, vector<1x128x1xf32>
    %58 = vector.shape_cast %57 : vector<1x128x1xf32> to vector<128x1xf32>
    %59 = vector.broadcast %58 : vector<128x1xf32> to vector<128x32xf32>
    %60 = arith.mulf %56, %59 : vector<128x32xf32>
    %c0_44 = arith.constant 0 : index
    %c0_45 = arith.constant 0 : index
    %c0_46 = arith.constant 0 : index
    %61 = vector.load %arg14[%c0_44, %c0_45, %c0_46] : memref<4x128x1xf32, #tpu.memory_space<vmem>>, vector<1x128x1xf32>
    %62 = vector.shape_cast %61 : vector<1x128x1xf32> to vector<128x1xf32>
    %63 = vector.broadcast %62 : vector<128x1xf32> to vector<128x32xf32>
    %64 = arith.addf %60, %63 : vector<128x32xf32>
    %cst_47 = arith.constant 0.000000e+00 : f32
    %65 = vector.broadcast %cst_47 : f32 to vector<128x32xf32>
    %66 = arith.maximumf %64, %65 : vector<128x32xf32>
    %67 = arith.addf %21, %66 : vector<128x32xf32>
    %c0_48 = arith.constant 0 : index
    %c0_49 = arith.constant 0 : index
    %c0_50 = arith.constant 0 : index
    %68 = vector.load %arg15[%c0_48, %c0_49, %c0_50] : memref<1x512x32xf32, #tpu.memory_space<vmem>>, vector<1x128x32xf32>
    %69 = vector.shape_cast %68 : vector<1x128x32xf32> to vector<128x32xf32>
    %70 = vector.shape_cast %67 : vector<128x32xf32> to vector<1x128x32xf32>
    tpu.vector_store %arg15[%c0_48, %c0_49, %c0_50], %70 {strides = array<i32>} : memref<1x512x32xf32, #tpu.memory_space<vmem>>, vector<1x128x32xf32>,
    %c1 = arith.constant 1 : index
    %c0_51 = arith.constant 0 : index
    %c0_52 = arith.constant 0 : index
    %71 = vector.load %arg8[%c1, %c0_51, %c0_52] : memref<4x128x128xf32, #tpu.memory_space<vmem>>, vector<1x128x128xf32>
    %72 = vector.shape_cast %71 : vector<1x128x128xf32> to vector<128x128xf32>
    %cst_53 = arith.constant dense<0.000000e+00> : vector<128x32xf32>
    %73 = tpu.matmul %72, %67, %cst_53 {dimension_numbers = #tpu.dot_dimension_numbers<[1], [0], [0], [1], [0, 0, 1, 1], [], []>} : vector<128x128xf32>, vector<128x32xf32>, vector<128x32xf32> -> vector<128x32xf32>
    %cst_54 = arith.constant dense<0.000000e+00> : vector<32x32xf32>
    %74 = tpu.matmul %67, %73, %cst_54 {dimension_numbers = #tpu.dot_dimension_numbers<[0], [0], [1], [1], [0, 1, 1, 1], [], []>} : vector<128x32xf32>, vector<128x32xf32>, vector<32x32xf32> -> vector<32x32xf32>
    %cst_55 = arith.constant dense<0xFF800000> : vector<32xf32>
    %75 = vector.multi_reduction <maximumf>, %74, %cst_55 [1] : vector<32x32xf32> to vector<32xf32>
    %76 = vector.shape_cast %75 : vector<32xf32> to vector<32x1xf32>
    %77 = vector.broadcast %76 : vector<32x1xf32> to vector<32x32xf32>
    %78 = arith.subf %74, %77 : vector<32x32xf32>
    %79 = math.exp %78 : vector<32x32xf32>
    %cst_56 = arith.constant dense<0.000000e+00> : vector<32xf32>
    %80 = vector.multi_reduction <add>, %79, %cst_56 [1] : vector<32x32xf32> to vector<32xf32>
    %81 = vector.shape_cast %80 : vector<32xf32> to vector<32x1xf32>
    %82 = vector.broadcast %81 : vector<32x1xf32> to vector<32x32xf32>
    %83 = arith.divf %79, %82 : vector<32x32xf32>
    %cst_57 = arith.constant dense<0.000000e+00> : vector<32xf32>
    %84 = vector.multi_reduction <add>, %83, %cst_57 [0] : vector<32x32xf32> to vector<32xf32>
    %85 = vector.shape_cast %84 : vector<32xf32> to vector<1x32xf32>
    %cst_58 = arith.constant 9.99999971E-10 : f32
    %86 = vector.broadcast %cst_58 : f32 to vector<1x32xf32>
    %87 = arith.addf %86, %85 : vector<1x32xf32>
    %88 = vector.broadcast %87 : vector<1x32xf32> to vector<32x32xf32>
    %89 = arith.divf %83, %88 : vector<32x32xf32>
    %c1_59 = arith.constant 1 : index
    %c0_60 = arith.constant 0 : index
    %c0_61 = arith.constant 0 : index
    %90 = vector.load %arg9[%c1_59, %c0_60, %c0_61] : memref<4x128x128xf32, #tpu.memory_space<vmem>>, vector<1x128x128xf32>
    %91 = vector.shape_cast %90 : vector<1x128x128xf32> to vector<128x128xf32>
    %cst_62 = arith.constant dense<0.000000e+00> : vector<128x32xf32>
    %92 = tpu.matmul %91, %67, %cst_62 {dimension_numbers = #tpu.dot_dimension_numbers<[1], [0], [0], [1], [0, 0, 1, 1], [], []>} : vector<128x128xf32>, vector<128x32xf32>, vector<128x32xf32> -> vector<128x32xf32>
    %c1_63 = arith.constant 1 : index
    %c0_64 = arith.constant 0 : index
    %c0_65 = arith.constant 0 : index
    %93 = vector.load %arg10[%c1_63, %c0_64, %c0_65] : memref<4x128x1xf32, #tpu.memory_space<vmem>>, vector<1x128x1xf32>
    %94 = vector.shape_cast %93 : vector<1x128x1xf32> to vector<128x1xf32>
    %95 = vector.broadcast %94 : vector<128x1xf32> to vector<128x32xf32>
    %96 = arith.addf %92, %95 : vector<128x32xf32>
    %cst_66 = arith.constant dense<0.000000e+00> : vector<128x32xf32>
    %97 = tpu.matmul %96, %89, %cst_66 {dimension_numbers = #tpu.dot_dimension_numbers<[1], [0], [0], [1], [0, 0, 1, 1], [], []>} : vector<128x32xf32>, vector<32x32xf32>, vector<128x32xf32> -> vector<128x32xf32>
    %c1_67 = arith.constant 1 : index
    %c0_68 = arith.constant 0 : index
    %c0_69 = arith.constant 0 : index
    %98 = vector.load %arg11[%c1_67, %c0_68, %c0_69] : memref<4x128x128xf32, #tpu.memory_space<vmem>>, vector<1x128x128xf32>
    %99 = vector.shape_cast %98 : vector<1x128x128xf32> to vector<128x128xf32>
    %100 = arith.subf %67, %97 : vector<128x32xf32>
    %cst_70 = arith.constant dense<0.000000e+00> : vector<128x32xf32>
    %101 = tpu.matmul %99, %100, %cst_70 {dimension_numbers = #tpu.dot_dimension_numbers<[1], [0], [0], [1], [0, 0, 1, 1], [], []>} : vector<128x128xf32>, vector<128x32xf32>, vector<128x32xf32> -> vector<128x32xf32>
    %c1_71 = arith.constant 1 : index
    %c0_72 = arith.constant 0 : index
    %c0_73 = arith.constant 0 : index
    %102 = vector.load %arg12[%c1_71, %c0_72, %c0_73] : memref<4x128x1xf32, #tpu.memory_space<vmem>>, vector<1x128x1xf32>
    %103 = vector.shape_cast %102 : vector<1x128x1xf32> to vector<128x1xf32>
    %104 = vector.broadcast %103 : vector<128x1xf32> to vector<128x32xf32>
    %105 = arith.addf %101, %104 : vector<128x32xf32>
    %c1_74 = arith.constant 1 : index
    %c0_75 = arith.constant 0 : index
    %c0_76 = arith.constant 0 : index
    %106 = vector.load %arg13[%c1_74, %c0_75, %c0_76] : memref<4x128x1xf32, #tpu.memory_space<vmem>>, vector<1x128x1xf32>
    %107 = vector.shape_cast %106 : vector<1x128x1xf32> to vector<128x1xf32>
    %108 = vector.broadcast %107 : vector<128x1xf32> to vector<128x32xf32>
    %109 = arith.mulf %105, %108 : vector<128x32xf32>
    %c1_77 = arith.constant 1 : index
    %c0_78 = arith.constant 0 : index
    %c0_79 = arith.constant 0 : index
    %110 = vector.load %arg14[%c1_77, %c0_78, %c0_79] : memref<4x128x1xf32, #tpu.memory_space<vmem>>, vector<1x128x1xf32>
    %111 = vector.shape_cast %110 : vector<1x128x1xf32> to vector<128x1xf32>
    %112 = vector.broadcast %111 : vector<128x1xf32> to vector<128x32xf32>
    %113 = arith.addf %109, %112 : vector<128x32xf32>
    %cst_80 = arith.constant 0.000000e+00 : f32
    %114 = vector.broadcast %cst_80 : f32 to vector<128x32xf32>
    %115 = arith.maximumf %113, %114 : vector<128x32xf32>
    %116 = arith.addf %67, %115 : vector<128x32xf32>
    %c0_81 = arith.constant 0 : index
    %c128 = arith.constant 128 : index
    %c0_82 = arith.constant 0 : index
    %117 = vector.load %arg15[%c0_81, %c128, %c0_82] : memref<1x512x32xf32, #tpu.memory_space<vmem>>, vector<1x128x32xf32>
    %118 = vector.shape_cast %117 : vector<1x128x32xf32> to vector<128x32xf32>
    %119 = vector.shape_cast %116 : vector<128x32xf32> to vector<1x128x32xf32>
    tpu.vector_store %arg15[%c0_81, %c128, %c0_82], %119 {strides = array<i32>} : memref<1x512x32xf32, #tpu.memory_space<vmem>>, vector<1x128x32xf32>,
    %c2 = arith.constant 2 : index
    %c0_83 = arith.constant 0 : index
    %c0_84 = arith.constant 0 : index
    %120 = vector.load %arg8[%c2, %c0_83, %c0_84] : memref<4x128x128xf32, #tpu.memory_space<vmem>>, vector<1x128x128xf32>
    %121 = vector.shape_cast %120 : vector<1x128x128xf32> to vector<128x128xf32>
    %cst_85 = arith.constant dense<0.000000e+00> : vector<128x32xf32>
    %122 = tpu.matmul %121, %116, %cst_85 {dimension_numbers = #tpu.dot_dimension_numbers<[1], [0], [0], [1], [0, 0, 1, 1], [], []>} : vector<128x128xf32>, vector<128x32xf32>, vector<128x32xf32> -> vector<128x32xf32>
    %cst_86 = arith.constant dense<0.000000e+00> : vector<32x32xf32>
    %123 = tpu.matmul %116, %122, %cst_86 {dimension_numbers = #tpu.dot_dimension_numbers<[0], [0], [1], [1], [0, 1, 1, 1], [], []>} : vector<128x32xf32>, vector<128x32xf32>, vector<32x32xf32> -> vector<32x32xf32>
    %cst_87 = arith.constant dense<0xFF800000> : vector<32xf32>
    %124 = vector.multi_reduction <maximumf>, %123, %cst_87 [1] : vector<32x32xf32> to vector<32xf32>
    %125 = vector.shape_cast %124 : vector<32xf32> to vector<32x1xf32>
    %126 = vector.broadcast %125 : vector<32x1xf32> to vector<32x32xf32>
    %127 = arith.subf %123, %126 : vector<32x32xf32>
    %128 = math.exp %127 : vector<32x32xf32>
    %cst_88 = arith.constant dense<0.000000e+00> : vector<32xf32>
    %129 = vector.multi_reduction <add>, %128, %cst_88 [1] : vector<32x32xf32> to vector<32xf32>
    %130 = vector.shape_cast %129 : vector<32xf32> to vector<32x1xf32>
    %131 = vector.broadcast %130 : vector<32x1xf32> to vector<32x32xf32>
    %132 = arith.divf %128, %131 : vector<32x32xf32>
    %cst_89 = arith.constant dense<0.000000e+00> : vector<32xf32>
    %133 = vector.multi_reduction <add>, %132, %cst_89 [0] : vector<32x32xf32> to vector<32xf32>
    %134 = vector.shape_cast %133 : vector<32xf32> to vector<1x32xf32>
    %cst_90 = arith.constant 9.99999971E-10 : f32
    %135 = vector.broadcast %cst_90 : f32 to vector<1x32xf32>
    %136 = arith.addf %135, %134 : vector<1x32xf32>
    %137 = vector.broadcast %136 : vector<1x32xf32> to vector<32x32xf32>
    %138 = arith.divf %132, %137 : vector<32x32xf32>
    %c2_91 = arith.constant 2 : index
    %c0_92 = arith.constant 0 : index
    %c0_93 = arith.constant 0 : index
    %139 = vector.load %arg9[%c2_91, %c0_92, %c0_93] : memref<4x128x128xf32, #tpu.memory_space<vmem>>, vector<1x128x128xf32>
    %140 = vector.shape_cast %139 : vector<1x128x128xf32> to vector<128x128xf32>
    %cst_94 = arith.constant dense<0.000000e+00> : vector<128x32xf32>
    %141 = tpu.matmul %140, %116, %cst_94 {dimension_numbers = #tpu.dot_dimension_numbers<[1], [0], [0], [1], [0, 0, 1, 1], [], []>} : vector<128x128xf32>, vector<128x32xf32>, vector<128x32xf32> -> vector<128x32xf32>
    %c2_95 = arith.constant 2 : index
    %c0_96 = arith.constant 0 : index
    %c0_97 = arith.constant 0 : index
    %142 = vector.load %arg10[%c2_95, %c0_96, %c0_97] : memref<4x128x1xf32, #tpu.memory_space<vmem>>, vector<1x128x1xf32>
    %143 = vector.shape_cast %142 : vector<1x128x1xf32> to vector<128x1xf32>
    %144 = vector.broadcast %143 : vector<128x1xf32> to vector<128x32xf32>
    %145 = arith.addf %141, %144 : vector<128x32xf32>
    %cst_98 = arith.constant dense<0.000000e+00> : vector<128x32xf32>
    %146 = tpu.matmul %145, %138, %cst_98 {dimension_numbers = #tpu.dot_dimension_numbers<[1], [0], [0], [1], [0, 0, 1, 1], [], []>} : vector<128x32xf32>, vector<32x32xf32>, vector<128x32xf32> -> vector<128x32xf32>
    %c2_99 = arith.constant 2 : index
    %c0_100 = arith.constant 0 : index
    %c0_101 = arith.constant 0 : index
    %147 = vector.load %arg11[%c2_99, %c0_100, %c0_101] : memref<4x128x128xf32, #tpu.memory_space<vmem>>, vector<1x128x128xf32>
    %148 = vector.shape_cast %147 : vector<1x128x128xf32> to vector<128x128xf32>
    %149 = arith.subf %116, %146 : vector<128x32xf32>
    %cst_102 = arith.constant dense<0.000000e+00> : vector<128x32xf32>
    %150 = tpu.matmul %148, %149, %cst_102 {dimension_numbers = #tpu.dot_dimension_numbers<[1], [0], [0], [1], [0, 0, 1, 1], [], []>} : vector<128x128xf32>, vector<128x32xf32>, vector<128x32xf32> -> vector<128x32xf32>
    %c2_103 = arith.constant 2 : index
    %c0_104 = arith.constant 0 : index
    %c0_105 = arith.constant 0 : index
    %151 = vector.load %arg12[%c2_103, %c0_104, %c0_105] : memref<4x128x1xf32, #tpu.memory_space<vmem>>, vector<1x128x1xf32>
    %152 = vector.shape_cast %151 : vector<1x128x1xf32> to vector<128x1xf32>
    %153 = vector.broadcast %152 : vector<128x1xf32> to vector<128x32xf32>
    %154 = arith.addf %150, %153 : vector<128x32xf32>
    %c2_106 = arith.constant 2 : index
    %c0_107 = arith.constant 0 : index
    %c0_108 = arith.constant 0 : index
    %155 = vector.load %arg13[%c2_106, %c0_107, %c0_108] : memref<4x128x1xf32, #tpu.memory_space<vmem>>, vector<1x128x1xf32>
    %156 = vector.shape_cast %155 : vector<1x128x1xf32> to vector<128x1xf32>
    %157 = vector.broadcast %156 : vector<128x1xf32> to vector<128x32xf32>
    %158 = arith.mulf %154, %157 : vector<128x32xf32>
    %c2_109 = arith.constant 2 : index
    %c0_110 = arith.constant 0 : index
    %c0_111 = arith.constant 0 : index
    %159 = vector.load %arg14[%c2_109, %c0_110, %c0_111] : memref<4x128x1xf32, #tpu.memory_space<vmem>>, vector<1x128x1xf32>
    %160 = vector.shape_cast %159 : vector<1x128x1xf32> to vector<128x1xf32>
    %161 = vector.broadcast %160 : vector<128x1xf32> to vector<128x32xf32>
    %162 = arith.addf %158, %161 : vector<128x32xf32>
    %cst_112 = arith.constant 0.000000e+00 : f32
    %163 = vector.broadcast %cst_112 : f32 to vector<128x32xf32>
    %164 = arith.maximumf %162, %163 : vector<128x32xf32>
    %165 = arith.addf %116, %164 : vector<128x32xf32>
    %c0_113 = arith.constant 0 : index
    %c256 = arith.constant 256 : index
    %c0_114 = arith.constant 0 : index
    %166 = vector.load %arg15[%c0_113, %c256, %c0_114] : memref<1x512x32xf32, #tpu.memory_space<vmem>>, vector<1x128x32xf32>
    %167 = vector.shape_cast %166 : vector<1x128x32xf32> to vector<128x32xf32>
    %168 = vector.shape_cast %165 : vector<128x32xf32> to vector<1x128x32xf32>
    tpu.vector_store %arg15[%c0_113, %c256, %c0_114], %168 {strides = array<i32>} : memref<1x512x32xf32, #tpu.memory_space<vmem>>, vector<1x128x32xf32>,
    %c3 = arith.constant 3 : index
    %c0_115 = arith.constant 0 : index
    %c0_116 = arith.constant 0 : index
    %169 = vector.load %arg8[%c3, %c0_115, %c0_116] : memref<4x128x128xf32, #tpu.memory_space<vmem>>, vector<1x128x128xf32>
    %170 = vector.shape_cast %169 : vector<1x128x128xf32> to vector<128x128xf32>
    %cst_117 = arith.constant dense<0.000000e+00> : vector<128x32xf32>
    %171 = tpu.matmul %170, %165, %cst_117 {dimension_numbers = #tpu.dot_dimension_numbers<[1], [0], [0], [1], [0, 0, 1, 1], [], []>} : vector<128x128xf32>, vector<128x32xf32>, vector<128x32xf32> -> vector<128x32xf32>
    %cst_118 = arith.constant dense<0.000000e+00> : vector<32x32xf32>
    %172 = tpu.matmul %165, %171, %cst_118 {dimension_numbers = #tpu.dot_dimension_numbers<[0], [0], [1], [1], [0, 1, 1, 1], [], []>} : vector<128x32xf32>, vector<128x32xf32>, vector<32x32xf32> -> vector<32x32xf32>
    %cst_119 = arith.constant dense<0xFF800000> : vector<32xf32>
    %173 = vector.multi_reduction <maximumf>, %172, %cst_119 [1] : vector<32x32xf32> to vector<32xf32>
    %174 = vector.shape_cast %173 : vector<32xf32> to vector<32x1xf32>
    %175 = vector.broadcast %174 : vector<32x1xf32> to vector<32x32xf32>
    %176 = arith.subf %172, %175 : vector<32x32xf32>
    %177 = math.exp %176 : vector<32x32xf32>
    %cst_120 = arith.constant dense<0.000000e+00> : vector<32xf32>
    %178 = vector.multi_reduction <add>, %177, %cst_120 [1] : vector<32x32xf32> to vector<32xf32>
    %179 = vector.shape_cast %178 : vector<32xf32> to vector<32x1xf32>
    %180 = vector.broadcast %179 : vector<32x1xf32> to vector<32x32xf32>
    %181 = arith.divf %177, %180 : vector<32x32xf32>
    %cst_121 = arith.constant dense<0.000000e+00> : vector<32xf32>
    %182 = vector.multi_reduction <add>, %181, %cst_121 [0] : vector<32x32xf32> to vector<32xf32>
    %183 = vector.shape_cast %182 : vector<32xf32> to vector<1x32xf32>
    %cst_122 = arith.constant 9.99999971E-10 : f32
    %184 = vector.broadcast %cst_122 : f32 to vector<1x32xf32>
    %185 = arith.addf %184, %183 : vector<1x32xf32>
    %186 = vector.broadcast %185 : vector<1x32xf32> to vector<32x32xf32>
    %187 = arith.divf %181, %186 : vector<32x32xf32>
    %c3_123 = arith.constant 3 : index
    %c0_124 = arith.constant 0 : index
    %c0_125 = arith.constant 0 : index
    %188 = vector.load %arg9[%c3_123, %c0_124, %c0_125] : memref<4x128x128xf32, #tpu.memory_space<vmem>>, vector<1x128x128xf32>
    %189 = vector.shape_cast %188 : vector<1x128x128xf32> to vector<128x128xf32>
    %cst_126 = arith.constant dense<0.000000e+00> : vector<128x32xf32>
    %190 = tpu.matmul %189, %165, %cst_126 {dimension_numbers = #tpu.dot_dimension_numbers<[1], [0], [0], [1], [0, 0, 1, 1], [], []>} : vector<128x128xf32>, vector<128x32xf32>, vector<128x32xf32> -> vector<128x32xf32>
    %c3_127 = arith.constant 3 : index
    %c0_128 = arith.constant 0 : index
    %c0_129 = arith.constant 0 : index
    %191 = vector.load %arg10[%c3_127, %c0_128, %c0_129] : memref<4x128x1xf32, #tpu.memory_space<vmem>>, vector<1x128x1xf32>
    %192 = vector.shape_cast %191 : vector<1x128x1xf32> to vector<128x1xf32>
    %193 = vector.broadcast %192 : vector<128x1xf32> to vector<128x32xf32>
    %194 = arith.addf %190, %193 : vector<128x32xf32>
    %cst_130 = arith.constant dense<0.000000e+00> : vector<128x32xf32>
    %195 = tpu.matmul %194, %187, %cst_130 {dimension_numbers = #tpu.dot_dimension_numbers<[1], [0], [0], [1], [0, 0, 1, 1], [], []>} : vector<128x32xf32>, vector<32x32xf32>, vector<128x32xf32> -> vector<128x32xf32>
    %c3_131 = arith.constant 3 : index
    %c0_132 = arith.constant 0 : index
    %c0_133 = arith.constant 0 : index
    %196 = vector.load %arg11[%c3_131, %c0_132, %c0_133] : memref<4x128x128xf32, #tpu.memory_space<vmem>>, vector<1x128x128xf32>
    %197 = vector.shape_cast %196 : vector<1x128x128xf32> to vector<128x128xf32>
    %198 = arith.subf %165, %195 : vector<128x32xf32>
    %cst_134 = arith.constant dense<0.000000e+00> : vector<128x32xf32>
    %199 = tpu.matmul %197, %198, %cst_134 {dimension_numbers = #tpu.dot_dimension_numbers<[1], [0], [0], [1], [0, 0, 1, 1], [], []>} : vector<128x128xf32>, vector<128x32xf32>, vector<128x32xf32> -> vector<128x32xf32>
    %c3_135 = arith.constant 3 : index
    %c0_136 = arith.constant 0 : index
    %c0_137 = arith.constant 0 : index
    %200 = vector.load %arg12[%c3_135, %c0_136, %c0_137] : memref<4x128x1xf32, #tpu.memory_space<vmem>>, vector<1x128x1xf32>
    %201 = vector.shape_cast %200 : vector<1x128x1xf32> to vector<128x1xf32>
    %202 = vector.broadcast %201 : vector<128x1xf32> to vector<128x32xf32>
    %203 = arith.addf %199, %202 : vector<128x32xf32>
    %c3_138 = arith.constant 3 : index
    %c0_139 = arith.constant 0 : index
    %c0_140 = arith.constant 0 : index
    %204 = vector.load %arg13[%c3_138, %c0_139, %c0_140] : memref<4x128x1xf32, #tpu.memory_space<vmem>>, vector<1x128x1xf32>
    %205 = vector.shape_cast %204 : vector<1x128x1xf32> to vector<128x1xf32>
    %206 = vector.broadcast %205 : vector<128x1xf32> to vector<128x32xf32>
    %207 = arith.mulf %203, %206 : vector<128x32xf32>
    %c3_141 = arith.constant 3 : index
    %c0_142 = arith.constant 0 : index
    %c0_143 = arith.constant 0 : index
    %208 = vector.load %arg14[%c3_141, %c0_142, %c0_143] : memref<4x128x1xf32, #tpu.memory_space<vmem>>, vector<1x128x1xf32>
    %209 = vector.shape_cast %208 : vector<1x128x1xf32> to vector<128x1xf32>
    %210 = vector.broadcast %209 : vector<128x1xf32> to vector<128x32xf32>
    %211 = arith.addf %207, %210 : vector<128x32xf32>
    %cst_144 = arith.constant 0.000000e+00 : f32
    %212 = vector.broadcast %cst_144 : f32 to vector<128x32xf32>
    %213 = arith.maximumf %211, %212 : vector<128x32xf32>
    %214 = arith.addf %165, %213 : vector<128x32xf32>
    %c0_145 = arith.constant 0 : index
    %c384 = arith.constant 384 : index
    %c0_146 = arith.constant 0 : index
    %215 = vector.load %arg15[%c0_145, %c384, %c0_146] : memref<1x512x32xf32, #tpu.memory_space<vmem>>, vector<1x128x32xf32>
    %216 = vector.shape_cast %215 : vector<1x128x32xf32> to vector<128x32xf32>
    %217 = vector.shape_cast %214 : vector<128x32xf32> to vector<1x128x32xf32>
    tpu.vector_store %arg15[%c0_145, %c384, %c0_146], %217 {strides = array<i32>} : memref<1x512x32xf32, #tpu.memory_space<vmem>>, vector<1x128x32xf32>,
    return
  }
  func.func @transform_0(%arg0: i32) -> (i32, i32, i32) {
    %c0_i32 = arith.constant 0 : i32
    %c0_i32_0 = arith.constant 0 : i32
    %c0_i32_1 = arith.constant 0 : i32
    return %arg0, %c0_i32, %c0_i32_0 : i32, i32, i32
  }
  func.func @transform_1(%arg0: i32) -> (i32, i32) {
    %c0_i32 = arith.constant 0 : i32
    %c0_i32_0 = arith.constant 0 : i32
    %c0_i32_1 = arith.constant 0 : i32
    return %c0_i32, %c0_i32_0 : i32, i32
  }
  func.func @transform_2(%arg0: i32) -> (i32, i32) {
    %c0_i32 = arith.constant 0 : i32
    %c0_i32_0 = arith.constant 0 : i32
    %c0_i32_1 = arith.constant 0 : i32
    return %c0_i32, %c0_i32_0 : i32, i32
  }
  func.func @transform_3(%arg0: i32) -> (i32, i32) {
    %c0_i32 = arith.constant 0 : i32
    %c0_i32_0 = arith.constant 0 : i32
    %c0_i32_1 = arith.constant 0 : i32
    return %c0_i32, %c0_i32_0 : i32, i32
  }
  func.func @transform_4(%arg0: i32) -> (i32, i32) {
    %c0_i32 = arith.constant 0 : i32
    %c0_i32_0 = arith.constant 0 : i32
    %c0_i32_1 = arith.constant 0 : i32
    return %c0_i32, %c0_i32_0 : i32, i32
  }
  func.func @transform_5(%arg0: i32) -> (i32, i32) {
    %c0_i32 = arith.constant 0 : i32
    %c0_i32_0 = arith.constant 0 : i32
    %c0_i32_1 = arith.constant 0 : i32
    return %c0_i32, %c0_i32_0 : i32, i32
  }
  func.func @transform_6(%arg0: i32) -> (i32, i32) {
    %c0_i32 = arith.constant 0 : i32
    %c0_i32_0 = arith.constant 0 : i32
    %c0_i32_1 = arith.constant 0 : i32
    return %c0_i32, %c0_i32_0 : i32, i32
  }
  func.func @transform_7(%arg0: i32) -> (i32, i32, i32) {
    %c0_i32 = arith.constant 0 : i32
    %c0_i32_0 = arith.constant 0 : i32
    %c0_i32_1 = arith.constant 0 : i32
    %c0_i32_2 = arith.constant 0 : i32
    return %c0_i32, %c0_i32_0, %c0_i32_1 : i32, i32, i32
  }
  func.func @transform_8(%arg0: i32) -> (i32, i32, i32) {
    %c0_i32 = arith.constant 0 : i32
    %c0_i32_0 = arith.constant 0 : i32
    %c0_i32_1 = arith.constant 0 : i32
    %c0_i32_2 = arith.constant 0 : i32
    return %c0_i32, %c0_i32_0, %c0_i32_1 : i32, i32, i32
  }
  func.func @transform_9(%arg0: i32) -> (i32, i32, i32) {
    %c0_i32 = arith.constant 0 : i32
    %c0_i32_0 = arith.constant 0 : i32
    %c0_i32_1 = arith.constant 0 : i32
    %c0_i32_2 = arith.constant 0 : i32
    return %c0_i32, %c0_i32_0, %c0_i32_1 : i32, i32, i32
  }
  func.func @transform_10(%arg0: i32) -> (i32, i32, i32) {
    %c0_i32 = arith.constant 0 : i32
    %c0_i32_0 = arith.constant 0 : i32
    %c0_i32_1 = arith.constant 0 : i32
    %c0_i32_2 = arith.constant 0 : i32
    return %c0_i32, %c0_i32_0, %c0_i32_1 : i32, i32, i32
  }
  func.func @transform_11(%arg0: i32) -> (i32, i32, i32) {
    %c0_i32 = arith.constant 0 : i32
    %c0_i32_0 = arith.constant 0 : i32
    %c0_i32_1 = arith.constant 0 : i32
    %c0_i32_2 = arith.constant 0 : i32
    return %c0_i32, %c0_i32_0, %c0_i32_1 : i32, i32, i32
  }
  func.func @transform_12(%arg0: i32) -> (i32, i32, i32) {
    %c0_i32 = arith.constant 0 : i32
    %c0_i32_0 = arith.constant 0 : i32
    %c0_i32_1 = arith.constant 0 : i32
    %c0_i32_2 = arith.constant 0 : i32
    return %c0_i32, %c0_i32_0, %c0_i32_1 : i32, i32, i32
  }
  func.func @transform_13(%arg0: i32) -> (i32, i32, i32) {
    %c0_i32 = arith.constant 0 : i32
    %c0_i32_0 = arith.constant 0 : i32
    %c0_i32_1 = arith.constant 0 : i32
    %c0_i32_2 = arith.constant 0 : i32
    return %c0_i32, %c0_i32_0, %c0_i32_1 : i32, i32, i32
  }
  func.func @transform_14(%arg0: i32) -> (i32, i32, i32) {
    %c0_i32 = arith.constant 0 : i32
    %c0_i32_0 = arith.constant 0 : i32
    %c0_i32_1 = arith.constant 0 : i32
    return %arg0, %c0_i32, %c0_i32_0 : i32, i32, i32
  }
}

</mosaic_0001>

<bundles_post_ra>
// kernel: tpu_custom_call.1
= control target key start
LH: loop header
LB: loop body
LE: loop exit
PB: predicated region body
PF: predicated region fallthrough
CT: control target
= control target key end

     0   :  { %s11989_s0 = inlined_call_operand.hbm [shape: f32[2,64,32], index: 0, kind: input, shape index: {}]   ;;  %s11990_s1 = inlined_call_operand.hbm [shape: f32[64,64], index: 1, kind: input, shape index: {}]   ;;  %s11991_s2 = inlined_call_operand.hbm [shape: f32[64,1], index: 2, kind: input, shape index: {}]   ;;  %s11992_s3 = inlined_call_operand.hbm [shape: f32[64,1], index: 3, kind: input, shape index: {}]   ;;  %s11993_s4 = inlined_call_operand.hbm [shape: f32[128,64], index: 4, kind: input, shape index: {}]   ;;  %s11994_s5 = inlined_call_operand.hbm [shape: f32[128,1], index: 5, kind: input, shape index: {}]   ;;  %s11995_s6 = inlined_call_operand.hbm [shape: f32[128,1], index: 6, kind: input, shape index: {}]   ;;  %s11996_s7 = inlined_call_operand.hbm [shape: f32[4,128,128], index: 7, kind: input, shape index: {}]   ;;  %s11997_s8 = inlined_call_operand.hbm [shape: f32[4,128,128], index: 8, kind: input, shape index: {}]   ;;  %s11998_s9 = inlined_call_operand.hbm [shape: f32[4,128,1], index: 9, kind: input, shape index: {}]   ;;  %s11999_s10 = inlined_call_operand.hbm [shape: f32[4,128,128], index: 10, kind: input, shape index: {}]   ;;  %s12000_s11 = inlined_call_operand.hbm [shape: f32[4,128,1], index: 11, kind: input, shape index: {}]   ;;  %s12001_s12 = inlined_call_operand.hbm [shape: f32[4,128,1], index: 12, kind: input, shape index: {}]   ;;  %s12002_s13 = inlined_call_operand.hbm [shape: f32[4,128,1], index: 13, kind: input, shape index: {}]   ;;  %s12003_s14 = inlined_call_operand.hbm [shape: f32[2,512,32], index: 14, kind: output, shape index: {}]  }
   0x1   :  { %12038 = sst [smem:[#allocation46_spill]] %s11989_s0 }
   0x2   :  { %12039 = sst [smem:[#allocation47_spill]] %s11990_s1 }
   0x3   :  { %12040 = sst [smem:[#allocation48_spill]] %s11991_s2 }
   0x4   :  { %12041 = sst [smem:[#allocation49_spill]] %s12003_s14 }
   0x5   :  { %19 = vsyncpa [#allocation3], 0 }
   0x6   :  { %21 = vsyncpa [#allocation3 + $0x1], 0 }
   0x7   :  { %22 = vsyncpa [#allocation6], 0 }
   0x8   :  { %23 = vsyncpa [#allocation9], 0 }
   0x9   :  { %24 = vsyncpa [#allocation12], 0 }
   0xa   :  { %25 = vsyncpa [#allocation15], 0 }
   0xb   :  { %26 = vsyncpa [#allocation18], 0 }
   0xc   :  { %27 = vsyncpa [#allocation21], 0 }
   0xd   :  { %28 = vsyncpa [#allocation24], 0 }
   0xe   :  { %29 = vsyncpa [#allocation4], 0 }
   0xf   :  { %31 = vsyncpa [#allocation4 + $0x1], 0  ;;  %s10118_s29 = smov 0   ;;  %s10120_s30 = smov 0  }
  0x10   :  { %s10122_s15 = smov 0   ;;  %s10124_s16 = smov 0  }
  0x11 LB: > { %12042 = sst [smem:[#allocation35_spill]] %s10009_s29  ;;  %s10023_s17 = smov [#allocation5]   ;;  %s10021_s16 = sphi %s10124_s16, %s12142_s16   ;;  %s10017_s15 = sphi %s10122_s15, %s12141_s15   ;;  %s10013_s30 = sphi %s10120_s30, %s12140_s30   ;;  %s10009_s29 = sphi %s10118_s29, %s12139_s29  }
  0x12   : > { %12043 = sst [smem:[#allocation36_spill]] %s10013_s30  ;;  %s379_s18 = sshll.u32 %s10023_s17, 4  ;;  %s10144_s18 = int_to_ptr.vmem [resolvable:$true] %s379_s18 }
  0x13   : > { %s10139_s19 = sadd.s32 4294967295, %s10021_s16   ;;  %p6968_p0 = scmp.ge.s32.totalorder %s10021_s16, 1 }
  0x14   : > { %12044 = sst [smem:[#allocation37_spill]] %s10139_s19  ;;  %p12011_p1 = scmp.eq.s32.totalorder %s10139_s19, 0 }
  0x15   : > { %p367_p2 = scmp.lt.s32.totalorder %s10021_s16, 3  ;;  %s10024_s21 = smov [#allocation8]  }
  0x16   : > { %s405_s22 = sshll.u32 %s10024_s21, 4  ;;  %s10025_s24 = smov [#allocation11]   ;;  %s10159_s22 = int_to_ptr.vmem [resolvable:$true] %s405_s22 }
  0x17   : > { %p10146_p3 = pnand %p6968_p0, %p367_p2  ;;  %s431_s25 = sshll.u32 %s10025_s24, 4  ;;  %s10161_s25 = int_to_ptr.vmem [resolvable:$true] %s431_s25 }
  0x18   : > { %s12048_s1 = sld [smem:[#allocation47_spill]] }
  0x19   : > { %s12045_s20 = scalar_select %p10146_p3, 1, 0 }
  0x1a   : > { %p9333_p5 = pneg %p10146_p3 }
  0x1b   : > { %12046 = sst [smem:[#allocation38_spill]] %s12045_s20 }
  0x1c   : > { %p10155_p6 = pnand %p9333_p5, %p12011_p1 }
  0x1e   : > { %s9533_s28 = scalar_lea.hbm %s12048_s1, 1024  ;;  %p10171_p8 = pneg %p10155_p6 }
  0x1f   : > { %p9534_p7 = scmp.ne.s32.totalorder %s12048_s1, %s9533_s28  ;;  %p9540_p11 = scmp.lt.u32.totalorder %s9533_s28, %s12048_s1 }
  0x21   : > { %p9536_p9 = pnand %p10171_p8, %p9534_p7 }
  0x23   : > { %p9537_p10 = pneg %p9536_p9 }
  0x25   : > { %p9542_p12 = pnand %p9540_p11, %p9537_p10 }
  0x27   : > { %9545 = shalt.err (!%p9542_p12)
}
  0x28   : > { %s9546_s14 = scalar_lea.vmem %s10144_s18, 1024  ;;  %p9554_p5 = scmp.lt.s32.totalorder %s10144_s18, %s10144_s18 }
  0x29   : > { %p9547_p13 = scmp.ne.s32.totalorder %s10144_s18, %s9546_s14  ;;  %p9555_p4 = scmp.lt.s32.totalorder %s9546_s14, %s9546_s14 }
  0x2b   : > { %p9549_p0 = pnand %p9547_p13, %p10171_p8  ;;  %p9556_p7 = por %p9555_p4, %p9554_p5 }
  0x2d   : > { %p9550_p2 = pneg %p9549_p0 }
  0x2f   : > { %p9557_p9 = pnand %p9556_p7, %p9550_p2 }
  0x31   : > { %9560 = shalt.err (!%p9557_p9)
}
  0x32   : > { %s12013_s26 = smov 128   ;;  %s12014_s20 = smov 8  }
  0x33   : > { %9336 = dma.hbm_to_vmem [thread:$0]  (!%p10155_p6), %s12048_s1, 1024, %s10144_s18, [#allocation6], %s12013_s26, %s12013_s26, %s12014_s20  }
  0x34   : > { %s9561_s14 = scalar_lea.hbm %s11992_s3, 1024 }
  0x35   : > { %p9562_p4 = scmp.ne.s32.totalorder %s11992_s3, %s9561_s14  ;;  %p9568_p12 = scmp.lt.u32.totalorder %s9561_s14, %s11992_s3 }
  0x37   : > { %p9564_p10 = pnand %p9562_p4, %p10171_p8 }
  0x39   : > { %p9565_p11 = pneg %p9564_p10 }
  0x3b   : > { %p9570_p13 = pnand %p9568_p12, %p9565_p11 }
  0x3d   : > { %9573 = shalt.err (!%p9570_p13)
}
  0x3e   : > { %s9574_s18 = scalar_lea.vmem %s10159_s22, 1024  ;;  %p9582_p7 = scmp.lt.s32.totalorder %s10159_s22, %s10159_s22 }
  0x3f   : > { %p9575_p0 = scmp.ne.s32.totalorder %s10159_s22, %s9574_s18  ;;  %p9583_p9 = scmp.lt.s32.totalorder %s9574_s18, %s9574_s18 }
  0x41   : > { %p9577_p2 = pnand %p9575_p0, %p10171_p8  ;;  %p9584_p4 = por %p9583_p9, %p9582_p7 }
  0x43   : > { %p9578_p5 = pneg %p9577_p2 }
  0x45   : > { %p9585_p10 = pnand %p9584_p4, %p9578_p5 }
  0x47   : > { %9588 = shalt.err (!%p9585_p10)
}
  0x48   : > { %9342 = dma.hbm_to_vmem [thread:$0]  (!%p10155_p6), %s11992_s3, 1024, %s10159_s22, [#allocation9], %s12013_s26, %s12013_s26, %s12014_s20  }
  0x49   : > { %s9589_s27 = scalar_lea.hbm %s11994_s5, 2048 }
  0x4a   : > { %p9590_p11 = scmp.ne.s32.totalorder %s11994_s5, %s9589_s27  ;;  %p9596_p0 = scmp.lt.u32.totalorder %s9589_s27, %s11994_s5 }
  0x4c   : > { %p9592_p12 = pnand %p9590_p11, %p10171_p8 }
  0x4e   : > { %p9593_p13 = pneg %p9592_p12 }
  0x50   : > { %p9598_p2 = pnand %p9596_p0, %p9593_p13 }
  0x52   : > { %9601 = shalt.err (!%p9598_p2)
}
  0x53   : > { %s9602_s22 = scalar_lea.vmem %s10161_s25, 2048  ;;  %p9610_p4 = scmp.lt.s32.totalorder %s10161_s25, %s10161_s25 }
  0x54   : > { %p9603_p5 = scmp.ne.s32.totalorder %s10161_s25, %s9602_s22  ;;  %p9611_p10 = scmp.lt.s32.totalorder %s9602_s22, %s9602_s22 }
  0x56   : > { %p9605_p7 = pnand %p9603_p5, %p10171_p8  ;;  %p9612_p11 = por %p9611_p10, %p9610_p4 }
  0x58   : > { %p9606_p9 = pneg %p9605_p7 }
  0x5a   : > { %p9613_p12 = pnand %p9612_p11, %p9606_p9 }
  0x5c   : > { %9616 = shalt.err (!%p9613_p12)
}
  0x5d   : > { %9348 = dma.hbm_to_vmem [thread:$0]  (!%p10155_p6), %s11994_s5, 2048, %s10161_s25, [#allocation12], %s12013_s26, %s12013_s26, %s12014_s20  }
  0x5e   : > { %s10028_s29 = smov [#allocation14]   ;;  %s10029_s19 = smov [#allocation17]  }
  0x5f   : > { %s457_s30 = sshll.u32 %s10028_s29, 4  ;;  %s483_s27 = sshll.u32 %s10029_s19, 4  ;;  %s458_s30 = int_to_ptr.vmem [resolvable:$true] %s457_s30  ;;  %s484_s27 = int_to_ptr.vmem [resolvable:$true] %s483_s27 }
  0x60   : > { %s9617_s24 = scalar_lea.hbm %s11996_s7, 8192 }
  0x61   : > { %p9618_p13 = scmp.ne.s32.totalorder %s11996_s7, %s9617_s24  ;;  %p9624_p5 = scmp.lt.u32.totalorder %s9617_s24, %s11996_s7 }
  0x63   : > { %p9620_p0 = pnand %p9618_p13, %p10171_p8 }
  0x65   : > { %p9621_p2 = pneg %p9620_p0 }
  0x67   : > { %p9626_p7 = pnand %p9624_p5, %p9621_p2 }
  0x69   : > { %9629 = shalt.err (!%p9626_p7)
}
  0x6a   : > { %s9630_s25 = scalar_lea.vmem %s458_s30, 8192  ;;  %p9638_p11 = scmp.lt.s32.totalorder %s458_s30, %s458_s30 }
  0x6b   : > { %p9631_p9 = scmp.ne.s32.totalorder %s458_s30, %s9630_s25  ;;  %p9639_p12 = scmp.lt.s32.totalorder %s9630_s25, %s9630_s25 }
  0x6d   : > { %p9633_p4 = pnand %p9631_p9, %p10171_p8  ;;  %p9640_p1 = por %p9639_p12, %p9638_p11 }
  0x6f   : > { %p9634_p10 = pneg %p9633_p4 }
  0x71   : > { %p9641_p3 = pnand %p9640_p1, %p9634_p10 }
  0x73   : > { %9644 = shalt.err (!%p9641_p3)
}
  0x74   : > { %9354 = dma.hbm_to_vmem [thread:$0]  (!%p10155_p6), %s11996_s7, 8192, %s458_s30, [#allocation15], %s12013_s26, %s12013_s26, %s12014_s20  }
  0x75   : > { %s9645_s28 = scalar_lea.hbm %s11998_s9, 8192 }
  0x76   : > { %p9646_p1 = scmp.ne.s32.totalorder %s11998_s9, %s9645_s28  ;;  %p9652_p0 = scmp.lt.u32.totalorder %s9645_s28, %s11998_s9 }
  0x78   : > { %p9648_p3 = pnand %p9646_p1, %p10171_p8 }
  0x7a   : > { %p9649_p13 = pneg %p9648_p3 }
  0x7c   : > { %p9654_p2 = pnand %p9652_p0, %p9649_p13 }
  0x7e   : > { %9657 = shalt.err (!%p9654_p2)
}
  0x7f   : > { %s9658_s18 = scalar_lea.vmem %s484_s27, 8192  ;;  %p9666_p4 = scmp.lt.s32.totalorder %s484_s27, %s484_s27 }
  0x80   : > { %p9659_p5 = scmp.ne.s32.totalorder %s484_s27, %s9658_s18  ;;  %p9667_p10 = scmp.lt.s32.totalorder %s9658_s18, %s9658_s18 }
  0x82   : > { %p9661_p7 = pnand %p9659_p5, %p10171_p8  ;;  %p9668_p11 = por %p9667_p10, %p9666_p4 }
  0x84   : > { %p9662_p9 = pneg %p9661_p7 }
  0x86   : > { %p9669_p12 = pnand %p9668_p11, %p9662_p9 }
  0x88   : > { %9672 = shalt.err (!%p9669_p12)
}
  0x89   : > { %9360 = dma.hbm_to_vmem [thread:$0]  (!%p10155_p6), %s11998_s9, 8192, %s484_s27, [#allocation18], %s12013_s26, %s12013_s26, %s12014_s20  }
  0x8a   : > { %s10030_s1 = smov [#allocation20]   ;;  %s10031_s29 = smov [#allocation7]  }
  0x8b   : > { %s509_s0 = sshll.u32 %s10030_s1, 4  ;;  %s392_s19 = sshll.u32 %s10031_s29, 4  ;;  %s510_s0 = int_to_ptr.vmem [resolvable:$true] %s509_s0  ;;  %s393_s19 = int_to_ptr.vmem [resolvable:$true] %s392_s19 }
  0x8c   : > { %s9673_s24 = scalar_lea.hbm %s12000_s11, 8192 }
  0x8d   : > { %p9674_p1 = scmp.ne.s32.totalorder %s12000_s11, %s9673_s24  ;;  %p9680_p0 = scmp.lt.u32.totalorder %s9673_s24, %s12000_s11 }
  0x8f   : > { %p9676_p3 = pnand %p9674_p1, %p10171_p8 }
  0x91   : > { %p9677_p13 = pneg %p9676_p3 }
  0x93   : > { %p9682_p2 = pnand %p9680_p0, %p9677_p13 }
  0x95   : > { %9685 = shalt.err (!%p9682_p2)
}
  0x96   : > { %s9686_s27 = scalar_lea.vmem %s510_s0, 8192  ;;  %p9694_p4 = scmp.lt.s32.totalorder %s510_s0, %s510_s0 }
  0x97   : > { %p9687_p5 = scmp.ne.s32.totalorder %s510_s0, %s9686_s27  ;;  %p9695_p10 = scmp.lt.s32.totalorder %s9686_s27, %s9686_s27 }
  0x99   : > { %p9689_p7 = pnand %p9687_p5, %p10171_p8  ;;  %p9696_p11 = por %p9695_p10, %p9694_p4 }
  0x9b   : > { %p9690_p9 = pneg %p9689_p7 }
  0x9d   : > { %p9697_p12 = pnand %p9696_p11, %p9690_p9 }
  0x9f   : > { %9700 = shalt.err (!%p9697_p12)
}
  0xa0   : > { %9366 = dma.hbm_to_vmem [thread:$0]  (!%p10155_p6), %s12000_s11, 8192, %s510_s0, [#allocation21], %s12013_s26, %s12013_s26, %s12014_s20  }
  0xa1   : > { %s12050_s2 = sld [smem:[#allocation48_spill]] }
  0xa7   : > { %s9701_s17 = scalar_lea.hbm %s12050_s2, 1024 }
  0xa8   : > { %p9702_p1 = scmp.ne.s32.totalorder %s12050_s2, %s9701_s17  ;;  %p9708_p0 = scmp.lt.u32.totalorder %s9701_s17, %s12050_s2 }
  0xaa   : > { %p9704_p3 = pnand %p9702_p1, %p10171_p8 }
  0xac   : > { %p9705_p13 = pneg %p9704_p3 }
  0xae   : > { %p9710_p2 = pnand %p9708_p0, %p9705_p13 }
  0xb0   : > { %9713 = shalt.err (!%p9710_p2)
}
  0xb1   : > { %s9714_s30 = scalar_lea.vmem %s393_s19, 1024  ;;  %p9722_p4 = scmp.lt.s32.totalorder %s393_s19, %s393_s19 }
  0xb2   : > { %p9715_p5 = scmp.ne.s32.totalorder %s393_s19, %s9714_s30  ;;  %p9723_p10 = scmp.lt.s32.totalorder %s9714_s30, %s9714_s30 }
  0xb4   : > { %p9717_p7 = pnand %p9715_p5, %p10171_p8  ;;  %p9724_p11 = por %p9723_p10, %p9722_p4 }
  0xb6   : > { %p9718_p9 = pneg %p9717_p7 }
  0xb8   : > { %p9725_p12 = pnand %p9724_p11, %p9718_p9 }
  0xba   : > { %9728 = shalt.err (!%p9725_p12)
}
  0xbb   : > { %9339 = dma.hbm_to_vmem [thread:$0]  (!%p10155_p6), %s12050_s2, 1024, %s393_s19, [#allocation6], %s12013_s26, %s12013_s26, %s12014_s20  }
  0xbc   : > { %s10032_s25 = smov [#allocation10]   ;;  %s10033_s29 = smov [#allocation13]  }
  0xbd   : > { %s418_s1 = sshll.u32 %s10032_s25, 4  ;;  %s444_s28 = sshll.u32 %s10033_s29, 4  ;;  %s419_s1 = int_to_ptr.vmem [resolvable:$true] %s418_s1  ;;  %s445_s28 = int_to_ptr.vmem [resolvable:$true] %s444_s28 }
  0xbe   : > { %s9729_s14 = scalar_lea.hbm %s11993_s4, 2048 }
  0xbf   : > { %p9730_p1 = scmp.ne.s32.totalorder %s11993_s4, %s9729_s14  ;;  %p9736_p0 = scmp.lt.u32.totalorder %s9729_s14, %s11993_s4 }
  0xc1   : > { %p9732_p3 = pnand %p9730_p1, %p10171_p8 }
  0xc3   : > { %p9733_p13 = pneg %p9732_p3 }
  0xc5   : > { %p9738_p2 = pnand %p9736_p0, %p9733_p13 }
  0xc7   : > { %9741 = shalt.err (!%p9738_p2)
}
  0xc8   : > { %s9742_s19 = scalar_lea.vmem %s419_s1, 2048  ;;  %p9750_p4 = scmp.lt.s32.totalorder %s419_s1, %s419_s1 }
  0xc9   : > { %p9743_p5 = scmp.ne.s32.totalorder %s419_s1, %s9742_s19  ;;  %p9751_p10 = scmp.lt.s32.totalorder %s9742_s19, %s9742_s19 }
  0xcb   : > { %p9745_p7 = pnand %p9743_p5, %p10171_p8  ;;  %p9752_p11 = por %p9751_p10, %p9750_p4 }
  0xcd   : > { %p9746_p9 = pneg %p9745_p7 }
  0xcf   : > { %p9753_p12 = pnand %p9752_p11, %p9746_p9 }
  0xd1   : > { %9756 = shalt.err (!%p9753_p12)
}
  0xd2   : > { %9345 = dma.hbm_to_vmem [thread:$0]  (!%p10155_p6), %s11993_s4, 2048, %s419_s1, [#allocation9], %s12013_s26, %s12013_s26, %s12014_s20  }
  0xd3   : > { %s9757_s24 = scalar_lea.hbm %s11995_s6, 2048 }
  0xd4   : > { %p9758_p1 = scmp.ne.s32.totalorder %s11995_s6, %s9757_s24  ;;  %p9764_p0 = scmp.lt.u32.totalorder %s9757_s24, %s11995_s6 }
  0xd6   : > { %p9760_p3 = pnand %p9758_p1, %p10171_p8 }
  0xd8   : > { %p9761_p13 = pneg %p9760_p3 }
  0xda   : > { %p9766_p2 = pnand %p9764_p0, %p9761_p13 }
  0xdc   : > { %9769 = shalt.err (!%p9766_p2)
}
  0xdd   : > { %s9770_s0 = scalar_lea.vmem %s445_s28, 2048  ;;  %p9778_p4 = scmp.lt.s32.totalorder %s445_s28, %s445_s28 }
  0xde   : > { %p9771_p5 = scmp.ne.s32.totalorder %s445_s28, %s9770_s0  ;;  %p9779_p10 = scmp.lt.s32.totalorder %s9770_s0, %s9770_s0 }
  0xe0   : > { %p9773_p7 = pnand %p9771_p5, %p10171_p8  ;;  %p9780_p11 = por %p9779_p10, %p9778_p4 }
  0xe2   : > { %p9774_p9 = pneg %p9773_p7 }
  0xe4   : > { %p9781_p12 = pnand %p9780_p11, %p9774_p9 }
  0xe6   : > { %9784 = shalt.err (!%p9781_p12)
}
  0xe7   : > { %9351 = dma.hbm_to_vmem [thread:$0]  (!%p10155_p6), %s11995_s6, 2048, %s445_s28, [#allocation12], %s12013_s26, %s12013_s26, %s12014_s20  }
  0xe8   : > { %s10034_s27 = smov [#allocation16]   ;;  %s10035_s29 = smov [#allocation19]  }
  0xe9   : > { %s470_s25 = sshll.u32 %s10034_s27, 4  ;;  %s496_s17 = sshll.u32 %s10035_s29, 4  ;;  %s471_s25 = int_to_ptr.vmem [resolvable:$true] %s470_s25  ;;  %s497_s17 = int_to_ptr.vmem [resolvable:$true] %s496_s17 }
  0xea   : > { %s9785_s22 = scalar_lea.hbm %s11997_s8, 8192 }
  0xeb   : > { %p9786_p1 = scmp.ne.s32.totalorder %s11997_s8, %s9785_s22  ;;  %p9792_p0 = scmp.lt.u32.totalorder %s9785_s22, %s11997_s8 }
  0xed   : > { %p9788_p3 = pnand %p9786_p1, %p10171_p8 }
  0xef   : > { %p9789_p13 = pneg %p9788_p3 }
  0xf1   : > { %p9794_p2 = pnand %p9792_p0, %p9789_p13 }
  0xf3   : > { %9797 = shalt.err (!%p9794_p2)
}
  0xf4   : > { %s9798_s28 = scalar_lea.vmem %s471_s25, 8192  ;;  %p9806_p4 = scmp.lt.s32.totalorder %s471_s25, %s471_s25 }
  0xf5   : > { %p9799_p5 = scmp.ne.s32.totalorder %s471_s25, %s9798_s28  ;;  %p9807_p10 = scmp.lt.s32.totalorder %s9798_s28, %s9798_s28 }
  0xf7   : > { %p9801_p7 = pnand %p9799_p5, %p10171_p8  ;;  %p9808_p11 = por %p9807_p10, %p9806_p4 }
  0xf9   : > { %p9802_p9 = pneg %p9801_p7 }
  0xfb   : > { %p9809_p12 = pnand %p9808_p11, %p9802_p9 }
  0xfd   : > { %9812 = shalt.err (!%p9809_p12)
}
  0xfe   : > { %9357 = dma.hbm_to_vmem [thread:$0]  (!%p10155_p6), %s11997_s8, 8192, %s471_s25, [#allocation15], %s12013_s26, %s12013_s26, %s12014_s20  }
  0xff   : > { %s9813_s14 = scalar_lea.hbm %s11999_s10, 8192 }
 0x100   : > { %p9814_p1 = scmp.ne.s32.totalorder %s11999_s10, %s9813_s14  ;;  %p9820_p0 = scmp.lt.u32.totalorder %s9813_s14, %s11999_s10 }
 0x102   : > { %p9816_p3 = pnand %p9814_p1, %p10171_p8 }
 0x104   : > { %p9817_p13 = pneg %p9816_p3 }
 0x106   : > { %p9822_p2 = pnand %p9820_p0, %p9817_p13 }
 0x108   : > { %9825 = shalt.err (!%p9822_p2)
}
 0x109   : > { %s9826_s1 = scalar_lea.vmem %s497_s17, 8192  ;;  %p9834_p4 = scmp.lt.s32.totalorder %s497_s17, %s497_s17 }
 0x10a   : > { %p9827_p5 = scmp.ne.s32.totalorder %s497_s17, %s9826_s1  ;;  %p9835_p10 = scmp.lt.s32.totalorder %s9826_s1, %s9826_s1 }
 0x10c   : > { %p9829_p7 = pnand %p9827_p5, %p10171_p8  ;;  %p9836_p11 = por %p9835_p10, %p9834_p4 }
 0x10e   : > { %p9830_p9 = pneg %p9829_p7 }
 0x110   : > { %p9837_p12 = pnand %p9836_p11, %p9830_p9 }
 0x112   : > { %9840 = shalt.err (!%p9837_p12)
}
 0x113   : > { %9363 = dma.hbm_to_vmem [thread:$0]  (!%p10155_p6), %s11999_s10, 8192, %s497_s17, [#allocation18], %s12013_s26, %s12013_s26, %s12014_s20  }
 0x114   : > { %s10036_s19 = smov [#allocation22]   ;;  %s10037_s29 = smov [#allocation23]  }
 0x115   : > { %s522_s27 = sshll.u32 %s10036_s19, 4  ;;  %s535_s24 = sshll.u32 %s10037_s29, 4  ;;  %s523_s27 = int_to_ptr.vmem [resolvable:$true] %s522_s27  ;;  %s536_s24 = int_to_ptr.vmem [resolvable:$true] %s535_s24 }
 0x116   : > { %s9841_s18 = scalar_lea.hbm %s12001_s12, 8192 }
 0x117   : > { %p9842_p1 = scmp.ne.s32.totalorder %s12001_s12, %s9841_s18  ;;  %p9848_p0 = scmp.lt.u32.totalorder %s9841_s18, %s12001_s12 }
 0x119   : > { %p9844_p3 = pnand %p9842_p1, %p10171_p8 }
 0x11b   : > { %p9845_p13 = pneg %p9844_p3 }
 0x11d   : > { %p9850_p2 = pnand %p9848_p0, %p9845_p13 }
 0x11f   : > { %9853 = shalt.err (!%p9850_p2)
}
 0x120   : > { %s9854_s17 = scalar_lea.vmem %s523_s27, 8192  ;;  %p9862_p4 = scmp.lt.s32.totalorder %s523_s27, %s523_s27 }
 0x121   : > { %p9855_p5 = scmp.ne.s32.totalorder %s523_s27, %s9854_s17  ;;  %p9863_p10 = scmp.lt.s32.totalorder %s9854_s17, %s9854_s17 }
 0x123   : > { %p9857_p7 = pnand %p9855_p5, %p10171_p8  ;;  %p9864_p11 = por %p9863_p10, %p9862_p4 }
 0x125   : > { %p9858_p9 = pneg %p9857_p7 }
 0x127   : > { %p9865_p12 = pnand %p9864_p11, %p9858_p9 }
 0x129   : > { %9868 = shalt.err (!%p9865_p12)
}
 0x12a   : > { %9369 = dma.hbm_to_vmem [thread:$0]  (!%p10155_p6), %s12001_s12, 8192, %s523_s27, [#allocation21], %s12013_s26, %s12013_s26, %s12014_s20  }
 0x12b   : > { %s9869_s22 = scalar_lea.hbm %s12002_s13, 8192 }
 0x12c   : > { %p9870_p1 = scmp.ne.s32.totalorder %s12002_s13, %s9869_s22  ;;  %p9876_p0 = scmp.lt.u32.totalorder %s9869_s22, %s12002_s13 }
 0x12e   : > { %p9872_p3 = pnand %p9870_p1, %p10171_p8 }
 0x130   : > { %p9873_p13 = pneg %p9872_p3 }
 0x132   : > { %p9878_p2 = pnand %p9876_p0, %p9873_p13 }
 0x134   : > { %9881 = shalt.err (!%p9878_p2)
}
 0x135   : > { %s9882_s25 = scalar_lea.vmem %s536_s24, 8192  ;;  %p9890_p4 = scmp.lt.s32.totalorder %s536_s24, %s536_s24 }
 0x136   : > { %p9883_p5 = scmp.ne.s32.totalorder %s536_s24, %s9882_s25  ;;  %p9891_p10 = scmp.lt.s32.totalorder %s9882_s25, %s9882_s25 }
 0x138   : > { %p9885_p7 = pnand %p9883_p5, %p10171_p8  ;;  %p9892_p11 = por %p9891_p10, %p9890_p4 }
 0x13a   : > { %p9886_p9 = pneg %p9885_p7 }
 0x13c   : > { %p9893_p12 = pnand %p9892_p11, %p9886_p9 }
 0x13e   : > { %9896 = shalt.err (!%p9893_p12)
}
 0x13f   : > { %s12051_s21 = sld [smem:[#allocation36_spill]]  ;;  %s12052_s28 = sld [smem:[#allocation35_spill]] }
 0x140   : > { %s12053_s19 = sld [smem:[#allocation37_spill]]  ;;  %s6967_s23 = sadd.s32 4294967294, %s10021_s16  }
 0x141   : > { %9372 = dma.hbm_to_vmem [thread:$0]  (!%p10155_p6), %s12002_s13, 8192, %s536_s24, [#allocation24], %s12013_s26, %s12013_s26, %s12014_s20  }
 0x142   : > { %s10459_s29 = sadd.s32 1, %s10021_s16   ;;  %s44_s14 = sadd.s32 1, %s10017_s15 }
 0x143   : > { %s41_s22 = ssub.s32 %s10021_s16, %s10459_s29  ;;  %p52_p3 = scmp.eq.s32.totalorder %s10021_s16, 0 }
 0x144   : > { %p42_p1 = scmp.eq.s32.totalorder %s41_s22, 0  ;;  %p360_p9 = scmp.eq.s32.totalorder %s6967_s23, 1 }
 0x145   : > { %p51_p8 = scmp.ne.s32.totalorder %s10017_s15, %s12051_s21  ;;  %p57_p13 = scmp.ne.s32.totalorder %s12051_s21, %s12052_s28 }
 0x146   : > { %p354_p0 = scmp.eq.s32.totalorder %s12053_s19, 1  ;;  %p12054_p5 = scmp.eq.s32.totalorder %s12053_s19, 0 }
 0x147   : > { %s10471_s18 = scalar_select %p42_p1, %s10017_s15, %s44_s14  }
 0x148   : > { %p53_p2 = por %p52_p3, %p51_p8  ;;  %p10475_p7 = por %p12054_p5, %p57_p13 }
 0x149   : > { %p10479_p6 = por %p354_p0, %p51_p8  ;;  %p9394_p4 = scmp.lt.s32.totalorder %s10021_s16, 2 }
 0x14a   : > { %s549_s0 = sand.u32 1, %s10017_s15   ;;  %p10485_p10 = por %p360_p9, %p57_p13 }
 0x14b   : > { %s12056_s24 = scalar_select %p10479_p6, 1, 0 }
 0x14c   : > { %s12057_s1 = scalar_select %p10485_p10, 1, 0 }
 0x14d   : > { %s6983_s25 = sshll.u32 %s549_s0, 6  ;;  %s7095_s27 = sshll.u32 %s10021_s16, 10 }
 0x14e   : > { %s12058_s28 = sld [smem:[#allocation46_spill]]  ;;  %s553_s14 = scalar_lea.vmem [#allocation2], %s6983_s25 }
 0x14f   : > { %s560_s22 = sshll.u32 %s553_s14, 4  ;;  %p10495_p11 = pnand %p9394_p4, %p53_p2  ;;  %s10499_s22 = int_to_ptr.vmem [resolvable:$true] %s560_s22 }
 0x150   : > { %s10501_s26 = scalar_lea.sflag [#allocation3], %s549_s0 }
 0x151   : > { %p9899_p8 = pneg %p10495_p11 }
 0x154   : > { %s10493_s19 = scalar_lea.hbm %s12058_s28, %s7095_s27  ;;  %s9902_s17 = scalar_lea.hbm %s12058_s28, 2048 }
 0x155   : > { %s9897_s20 = scalar_lea.hbm %s10493_s19, 1024  ;;  %p9903_p13 = scmp.lt.u32.totalorder %s10493_s19, %s12058_s28 }
 0x156   : > { %p9898_p12 = scmp.ne.s32.totalorder %s10493_s19, %s9897_s20  ;;  %p9904_p0 = scmp.lt.u32.totalorder %s9902_s17, %s9897_s20 }
 0x157   : > { %p9906_p5 = scmp.lt.u32.totalorder %s9897_s20, %s10493_s19 }
 0x158   : > { %p9900_p1 = pnand %p9899_p8, %p9898_p12  ;;  %p9905_p2 = por %p9904_p0, %p9903_p13 }
 0x15a   : > { %p9901_p3 = pneg %p9900_p1  ;;  %p9907_p9 = por %p9906_p5, %p9905_p2 }
 0x15c   : > { %p9908_p4 = pnand %p9907_p9, %p9901_p3 }
 0x15e   : > { %9911 = shalt.err (!%p9908_p4)
}
 0x15f   : > { %s9912_s0 = scalar_lea.vmem %s10499_s22, 1024  ;;  %s10038_s25 = smov [#allocation2]  }
 0x160   : > { %p9913_p12 = scmp.ne.s32.totalorder %s10499_s22, %s9912_s0  ;;  %s9917_s27 = sshll.u32 %s10038_s25, 4  ;;  %s9918_s27 = int_to_ptr.vmem [resolvable:$false] %s9917_s27 }
 0x161   : > { %s9919_s21 = scalar_lea.vmem %s9918_s27, 2048  ;;  %p9920_p6 = scmp.lt.s32.totalorder %s10499_s22, %s9918_s27 }
 0x162   : > { %p9915_p1 = pnand %p9913_p12, %p9899_p8  ;;  %p9921_p13 = scmp.lt.s32.totalorder %s9919_s21, %s9912_s0 }
 0x164   : > { %p9916_p10 = pneg %p9915_p1  ;;  %p9922_p0 = por %p9921_p13, %p9920_p6 }
 0x166   : > { %p9923_p2 = pnand %p9922_p0, %p9916_p10 }
 0x168   : > { %9926 = shalt.err (!%p9923_p2)
}
 0x169   : > { %s12060_s20 = smov 8   ;;  %s12061_s17 = smov 128  }
 0x16a   : > { %9376 = dma.hbm_to_vmem [thread:$0]  (!%p10495_p11), %s10493_s19, 1024, %s10499_s22, %s10501_s26, %s12061_s17, %s12061_s17, %s12060_s20  }
 0x16b   : > { %s12062_s14 = sld [smem:[#allocation38_spill]] }
 0x171   : > { %p12063_p8 = scmp.ne.s32.totalorder %s12062_s14, 0 }
 0x173   : > { %572 = sbr.rel (%p12063_p8) target bundleno = 6272 (0x1880), region = 76 }
 0x17a   : > { %s12064_s25 = sld [smem:[#allocation36_spill]] }
 0x180   : > { %s10535_s2 = sand.u32 1, %s12064_s25  }
 0x181   : > { %s6987_s0 = sshll.u32 %s10535_s2, 6  ;;  %s575_s27 = scalar_lea.sflag [#allocation3], %s10535_s2 }
 0x182   : > { %s10539_s21 = scalar_lea.vmem [#allocation2], %s6987_s0 }
 0x183   : > { %9972 = dma.done.wait (%p10475_p7), %s575_s27, 1024  }
 0x184   : > { %9974 = vsyncadd (%p10475_p7), %s575_s27, 4294966272  ;;  %s12065_s23 = sld [smem:[#allocation37_spill]] }
 0x18a   : > { %p12066_p6 = scmp.eq.s32.totalorder %s12065_s23, 0 }
 0x18c   : > { %9976 = dma.done.wait (%p12066_p6), [#allocation6], 2048   ;;  %p12067_p10 = pmov %p12066_p6 }
 0x18d   : > { %p12068_p11 = pmov %p12066_p6 }
 0x18e   : > { %9978 = vsyncadd (%p12067_p10), [#allocation6], 4294965248 }
 0x18f   : > { %9980 = dma.done.wait (%p12068_p11), [#allocation9], 3072   ;;  %p12069_p3 = pmov %p12066_p6 }
 0x191   : > { %9982 = vsyncadd (%p12069_p3), [#allocation9], 4294964224  ;;  %p12070_p5 = pmov %p12069_p3 }
 0x192   : > { %p12071_p9 = pmov %p12069_p3 }
 0x193   : > { %9984 = dma.done.wait (%p12070_p5), [#allocation12], 4096  }
 0x194   : > { %9986 = vsyncadd (%p12071_p9), [#allocation12], 4294963200  ;;  %p12072_p7 = pmov %p12069_p3 }
 0x195   : > { %p12073_p4 = pmov %p12069_p3 }
 0x196   : > { %9988 = dma.done.wait (%p12072_p7), [#allocation15], 16384  }
 0x197   : > { %9990 = vsyncadd (%p12073_p4), [#allocation15], 4294950912  ;;  %p12074_p12 = pmov %p12069_p3 }
 0x198   : > { %p12075_p1 = pmov %p12069_p3 }
 0x199   : > { %9992 = dma.done.wait (%p12074_p12), [#allocation18], 16384  }
 0x19a   : > { %9994 = vsyncadd (%p12075_p1), [#allocation18], 4294950912  ;;  %p12076_p13 = pmov %p12075_p1 }
 0x19b   : > { %p12077_p0 = pmov %p12075_p1 }
 0x19c   : > { %9996 = dma.done.wait (%p12076_p13), [#allocation21], 16384  }
 0x19d   : > { %9998 = vsyncadd (%p12077_p0), [#allocation21], 4294950912  ;;  %p12078_p2 = pmov %p12077_p0 }
 0x19e   : > { %p12079_p8 = pmov %p12077_p0 }
 0x19f   : > { %10000 = dma.done.wait (%p12078_p2), [#allocation24], 8192  }
 0x1a0   : > { %10002 = vsyncadd (%p12079_p8), [#allocation24], 4294959104  ;;  %v10039_v0 = vmov 0   ;;  %v877_v1 = vld [vmem:[#allocation8] sm:$0xff]  ;;  %v676_v4 = vld [vmem:[%s10539_s21 + $0x8] sm:$0xff]  ;;  %vm691_vm0 = vcmask 523264  }
 0x1a1   : > { %9460 = vset.pattern.permute.xlu1 %v10039_v0  ;;  %9459 = vset.pattern.permute.xlu0 %v10039_v0  ;;  %v821_v2 = vld [vmem:[#allocation7] sm:$0xff]  ;;  %v878_v6 = vld [vmem:[#allocation8 + $0x8] sm:$0xff]  ;;  %v677_v7 = vld [vmem:[%s10539_s21 + $0x10] sm:$0xff]  ;;  %vm1668_vm1 = vcmask 261120   ;;  %s7001_s26 = sshll.u32 %s10535_s2, 9  ;;  %s7096_s19 = sshll.u32 %s12065_s23, 13 }
 0x1a2   : > { %v675_v3 = vld [vmem:[%s10539_s21] sm:$0xff]  ;;  %887 = vperm.xlu1 %9460, %v877_v1   ;;  %831 = vperm.xlu0 %9459, %v821_v2   ;;  %v678_v8 = vld [vmem:[%s10539_s21 + $0x18] sm:$0xff]  ;;  %v822_v9 = vld [vmem:[#allocation7 + $0x8] sm:$0xff]  ;;  %s10859_s30 = scalar_lea.vmem [#allocation25], %s7001_s26  ;;  %s12131_s14 = sld [smem:[#allocation49_spill]] }
 0x1a3   : > { %v8701_v5 = vpack.c.bf16 %v676_v4, %v675_v3  ;;  %v8705_v10 = vpack.c.bf16 %v678_v8, %v677_v7  ;;  %v679_v11 = vld [vmem:[%s10539_s21 + $0x20] sm:$0xff]  ;;  %v680_v12 = vld [vmem:[%s10539_s21 + $0x28] sm:$0xff]  ;;  %v824_v13 = vld [vmem:[#allocation7 + $0x18] sm:$0xff]  ;;  %s6770_s22 = sshll.u32 %s10859_s30, 4  ;;  %s6757_s0 = scalar_lea.sflag [#allocation4], %s10535_s2  ;;  %s11940_s22 = int_to_ptr.vmem [resolvable:$true] %s6770_s22 }
 0x1a4   : > { %v8709_v14 = vpack.c.bf16 %v680_v12, %v679_v11  ;;  %v683_v15 = vld [vmem:[#allocation5] sm:$0xff]  ;;  %v823_v16 = vld [vmem:[#allocation7 + $0x10] sm:$0xff]  ;;  %v682_v18 = vld [vmem:[%s10539_s21 + $0x38] sm:$0xff]  ;;  %s9927_s27 = scalar_lea.vmem %s11940_s22, 8192  ;;  %p12133_p10 = scmp.ne.s32.totalorder %s12056_s24, 0 }
 0x1a5   : > { %8702 = vmatprep.subr.bf16.mxu1 %v8701_v5  ;;  %v681_v17 = vld [vmem:[%s10539_s21 + $0x30] sm:$0xff]  ;;  %7697 = vmatprep.mubr.msk.f32.mxu1 %vm691_vm0, %v683_v15  ;;  %v880_v19 = vld [vmem:[#allocation8 + $0x18] sm:$0xff]  ;;  %v826_v22 = vld [vmem:[#allocation7 + $0x28] sm:$0xff]  ;;  %p9928_p6 = scmp.ne.s32.totalorder %s11940_s22, %s9927_s27  ;;  %s10040_s21 = smov [#allocation25]  }
 0x1a6   : > { %8704 = vmatpush3.bf16.msra.mxu1 %v8701_v5  ;;  %892 = vperm.xlu1 %9460, %v878_v6   ;;  %v8713_v20 = vpack.c.bf16 %v682_v18, %v681_v17  ;;  %v879_v21 = vld [vmem:[#allocation8 + $0x10] sm:$0xff]  ;;  %v825_v23 = vld [vmem:[#allocation7 + $0x20] sm:$0xff]  ;;  %v684_v24 = vld [vmem:[#allocation5 + $0x8] sm:$0xff]  ;;  %s9931_s23 = sshll.u32 %s10040_s21, 4  ;;  %s9932_s23 = int_to_ptr.vmem [resolvable:$false] %s9931_s23 }
 0x1a7   : > { %836 = vperm.xlu0 %9459, %v822_v9   ;;  %8706 = vmatprep.subr.bf16.mxu1 %v8705_v10  ;;  %v882_v25 = vld [vmem:[#allocation8 + $0x28] sm:$0xff]  ;;  %v685_v26 = vld [vmem:[#allocation5 + $0x10] sm:$0xff]  ;;  %v881_v27 = vld [vmem:[#allocation8 + $0x20] sm:$0xff]  ;;  %p9929_p11 = pnand %p9928_p6, %p12133_p10  ;;  %s9933_s26 = scalar_lea.vmem %s9932_s23, 16384 }
 0x1a8   : > { %v686_v28 = vld [vmem:[#allocation5 + $0x18] sm:$0xff]  ;;  %v687_v30 = vld [vmem:[#allocation5 + $0x20] sm:$0xff]  ;;  %v827_v31 = vld [vmem:[#allocation7 + $0x30] sm:$0xff]  ;;  %s11938_s25 = scalar_lea.hbm %s12131_s14, %s7096_s19  ;;  %p9934_p5 = scmp.lt.s32.totalorder %s11940_s22, %s9932_s23 }
 0x1a9   : > { %v828_v29 = vld [vmem:[#allocation7 + $0x38] sm:$0xff]  ;;  %v688_v32 = vld [vmem:[#allocation5 + $0x28] sm:$0xff]  ;;  %v689_v34 = vld [vmem:[#allocation5 + $0x30] sm:$0xff]  ;;  %p9930_p3 = pneg %p9929_p11  ;;  %p9935_p9 = scmp.lt.s32.totalorder %s9933_s26, %s9927_s27 }
 0x1aa   : > { %8708 = vmatpush3.bf16.msra.mxu1 %v8705_v10  ;;  %846 = vperm.xlu1 %9460, %v824_v13   ;;  %v884_v33 = vld [vmem:[#allocation8 + $0x38] sm:$0xff]  ;;  %v883_v35 = vld [vmem:[#allocation8 + $0x30] sm:$0xff]  ;;  %v1151_v37 = vld [vmem:[#allocation11 + $0x8] sm:$0xff] }
 0x1ab   : > { %841 = vperm.xlu0 %9459, %v823_v16   ;;  %8710 = vmatprep.subr.bf16.mxu1 %v8709_v14  ;;  %v690_v36 = vld [vmem:[#allocation5 + $0x38] sm:$0xff]  ;;  %v1150_v38 = vld [vmem:[#allocation11] sm:$0xff]  ;;  %v1263_v39 = vld [vmem:[#allocation13 + $0x8] sm:$0xff]  ;;  %p9936_p7 = por %p9935_p9, %p9934_p5 }
 0x1ac   : > { %v1262_v40 = vld [vmem:[#allocation13] sm:$0xff]  ;;  %v1153_v41 = vld [vmem:[#allocation11 + $0x18] sm:$0xff]  ;;  %v1152_v42 = vld [vmem:[#allocation11 + $0x10] sm:$0xff] }
 0x1ad   : > { %v1265_v43 = vld [vmem:[#allocation13 + $0x18] sm:$0xff]  ;;  %v1264_v44 = vld [vmem:[#allocation13 + $0x10] sm:$0xff]  ;;  %v1155_v45 = vld [vmem:[#allocation11 + $0x28] sm:$0xff]  ;;  %p9937_p4 = pnand %p9936_p7, %p9930_p3 }
 0x1ae   : > { %8712 = vmatpush3.bf16.msra.mxu1 %v8709_v14  ;;  %902 = vperm.xlu1 %9460, %v880_v19   ;;  %v1154_v46 = vld [vmem:[#allocation11 + $0x20] sm:$0xff]  ;;  %v1267_v47 = vld [vmem:[#allocation13 + $0x28] sm:$0xff]  ;;  %v1157_v49 = vld [vmem:[#allocation11 + $0x38] sm:$0xff] }
 0x1af   : > { %897 = vperm.xlu0 %9459, %v879_v21   ;;  %8714 = vmatprep.subr.bf16.mxu1 %v8713_v20  ;;  %v1266_v48 = vld [vmem:[#allocation13 + $0x20] sm:$0xff]  ;;  %v1156_v50 = vld [vmem:[#allocation11 + $0x30] sm:$0xff]  ;;  %v1269_v51 = vld [vmem:[#allocation13 + $0x38] sm:$0xff] }
 0x1b0   : > { %v1268_v52 = vld [vmem:[#allocation13 + $0x30] sm:$0xff]  ;;  %v1159_v53 = vld [vmem:[#allocation11 + $0x48] sm:$0xff]  ;;  %v1158_v54 = vld [vmem:[#allocation11 + $0x40] sm:$0xff] }
 0x1b1   : > { %v1271_v55 = vld [vmem:[#allocation13 + $0x48] sm:$0xff]  ;;  %v1270_v56 = vld [vmem:[#allocation13 + $0x40] sm:$0xff]  ;;  %v1161_v57 = vld [vmem:[#allocation11 + $0x58] sm:$0xff] }
 0x1b2   : > { %8716 = vmatpush3.bf16.msra.mxu1 %v8713_v20  ;;  %856 = vperm.xlu1 %9460, %v826_v22   ;;  %v1160_v58 = vld [vmem:[#allocation11 + $0x50] sm:$0xff]  ;;  %v1273_v59 = vld [vmem:[#allocation13 + $0x58] sm:$0xff]  ;;  %v1163_v61 = vld [vmem:[#allocation11 + $0x68] sm:$0xff] }
 0x1b3   : > { %851 = vperm.xlu0 %9459, %v825_v23   ;;  %v1272_v60 = vld [vmem:[#allocation13 + $0x50] sm:$0xff]  ;;  %v1162_v62 = vld [vmem:[#allocation11 + $0x60] sm:$0xff]  ;;  %v1275_v63 = vld [vmem:[#allocation13 + $0x68] sm:$0xff] }
 0x1b4   : > { %v1274_v0 = vld [vmem:[#allocation13 + $0x60] sm:$0xff]  ;;  %v1165_v1 = vld [vmem:[#allocation11 + $0x78] sm:$0xff]  ;;  %v1164_v2 = vld [vmem:[#allocation11 + $0x70] sm:$0xff] }
 0x1b5   : > { %7698 = vmatmul.mubr.msk.f32.vlgmr.msra.gmra.mrb[0].mxu1 %vm691_vm0, %v684_v24  ;;  %v1277_v3 = vld [vmem:[#allocation13 + $0x78] sm:$0xff]  ;;  %v1276_v4 = vld [vmem:[#allocation13 + $0x70] sm:$0xff]  ;;  %v941_v5 = vld [vmem:[#allocation10] sm:$0xff] }
 0x1b6   : > { %912 = vperm.xlu1 %9460, %v882_v25   ;;  %7700 = vmatprep.mubr.msk.f32.mxu1 %vm691_vm0, %v685_v26 }
 0x1b7   : > { %907 = vperm.xlu0 %9459, %v881_v27  }
 0x1b9   : > { %7701 = vmatmul.mubr.msk.f32.gmra.mrb[2].mxu1 %vm691_vm0, %v686_v28 }
 0x1ba   : > { %866 = vperm.xlu1 %9460, %v828_v29   ;;  %7703 = vmatprep.mubr.msk.f32.mxu1 %vm691_vm0, %v687_v30 }
 0x1bb   : > { %861 = vperm.xlu0 %9459, %v827_v31  }
 0x1bd   : > { %7704 = vmatmul.mubr.msk.f32.gmra.mrb[4].mxu1 %vm691_vm0, %v688_v32 }
 0x1be   : > { %922 = vperm.xlu1 %9460, %v884_v33   ;;  %7706 = vmatprep.mubr.msk.f32.mxu1 %vm691_vm0, %v689_v34 }
 0x1bf   : > { %917 = vperm.xlu0 %9459, %v883_v35  }
 0x1c1   : > { %7707 = vmatmul.mubr.msk.f32.gmra.mrb[6].mxu1 %vm691_vm0, %v690_v36 }
 0x1c2   : > { %1173 = vperm.xlu1 %9460, %v1151_v37   ;;  %7725 = vmatprep.mubr.msk.f32.mxu1 %vm691_vm0, %v941_v5  ;;  %v953_v5 = vld [vmem:[#allocation10 + $0x60] sm:$0xff] }
 0x1c3   : > { %1168 = vperm.xlu0 %9459, %v1150_v38  }
 0x1c6   : > { %1285 = vperm.xlu1 %9460, %v1263_v39  }
 0x1c7   : > { %1280 = vperm.xlu0 %9459, %v1262_v40  }
 0x1ca   : > { %1183 = vperm.xlu1 %9460, %v1153_v41  }
 0x1cb   : > { %1178 = vperm.xlu0 %9459, %v1152_v42  }
 0x1ce   : > { %1295 = vperm.xlu1 %9460, %v1265_v43  }
 0x1cf   : > { %1290 = vperm.xlu0 %9459, %v1264_v44  }
 0x1d2   : > { %1193 = vperm.xlu1 %9460, %v1155_v45  }
 0x1d3   : > { %1188 = vperm.xlu0 %9459, %v1154_v46  }
 0x1d6   : > { %1305 = vperm.xlu1 %9460, %v1267_v47  }
 0x1d7   : > { %1300 = vperm.xlu0 %9459, %v1266_v48  }
 0x1da   : > { %1203 = vperm.xlu1 %9460, %v1157_v49  }
 0x1db   : > { %1198 = vperm.xlu0 %9459, %v1156_v50  }
 0x1de   : > { %1315 = vperm.xlu1 %9460, %v1269_v51  }
 0x1df   : > { %1310 = vperm.xlu0 %9459, %v1268_v52  }
 0x1e2   : > { %1213 = vperm.xlu1 %9460, %v1159_v53  }
 0x1e3   : > { %1208 = vperm.xlu0 %9459, %v1158_v54  }
 0x1e6   : > { %1325 = vperm.xlu1 %9460, %v1271_v55  }
 0x1e7   : > { %1320 = vperm.xlu0 %9459, %v1270_v56  }
 0x1ea   : > { %1223 = vperm.xlu1 %9460, %v1161_v57  }
 0x1eb   : > { %1218 = vperm.xlu0 %9459, %v1160_v58   ;;  %v942_v58 = vld [vmem:[#allocation10 + $0x8] sm:$0xff] }
 0x1ee   : > { %1335 = vperm.xlu1 %9460, %v1273_v59   ;;  %v943_v59 = vld [vmem:[#allocation10 + $0x10] sm:$0xff] }
 0x1ef   : > { %1330 = vperm.xlu0 %9459, %v1272_v60   ;;  %v944_v60 = vld [vmem:[#allocation10 + $0x18] sm:$0xff] }
 0x1f2   : > { %1233 = vperm.xlu1 %9460, %v1163_v61   ;;  %v945_v61 = vld [vmem:[#allocation10 + $0x20] sm:$0xff] }
 0x1f3   : > { %1228 = vperm.xlu0 %9459, %v1162_v62   ;;  %v946_v62 = vld [vmem:[#allocation10 + $0x28] sm:$0xff] }
 0x1f6   : > { %1345 = vperm.xlu1 %9460, %v1275_v63   ;;  %v947_v63 = vld [vmem:[#allocation10 + $0x30] sm:$0xff] }
 0x1f7   : > { %1340 = vperm.xlu0 %9459, %v1274_v0   ;;  %v948_v0 = vld [vmem:[#allocation10 + $0x38] sm:$0xff] }
 0x1fa   : > { %1243 = vperm.xlu1 %9460, %v1165_v1   ;;  %v949_v1 = vld [vmem:[#allocation10 + $0x40] sm:$0xff] }
 0x1fb   : > { %1238 = vperm.xlu0 %9459, %v1164_v2   ;;  %v950_v2 = vld [vmem:[#allocation10 + $0x48] sm:$0xff] }
 0x1fe   : > { %1355 = vperm.xlu1 %9460, %v1277_v3   ;;  %v951_v3 = vld [vmem:[#allocation10 + $0x50] sm:$0xff] }
 0x1ff   : > { %1350 = vperm.xlu0 %9459, %v1276_v4   ;;  %v952_v4 = vld [vmem:[#allocation10 + $0x58] sm:$0xff] }
 0x221   : > { %v888_v6 = vpop.permute.xlu1 %887  ;;  %v832_v7 = vpop.permute.xlu0 %831 }
 0x225   : > { %v893_v8 = vpop.permute.xlu1 %892 }
 0x226   : > { %v837_v9 = vpop.permute.xlu0 %836 }
 0x229   : > { %v847_v10 = vpop.permute.xlu1 %846 }
 0x22a   : > { %v842_v11 = vpop.permute.xlu0 %841 }
 0x22d   : > { %v903_v12 = vpop.permute.xlu1 %902 }
 0x22e   : > { %v898_v13 = vpop.permute.xlu0 %897 }
 0x231   : > { %v857_v14 = vpop.permute.xlu1 %856 }
 0x232   : > { %v852_v15 = vpop.permute.xlu0 %851 }
 0x235   : > { %v913_v19 = vpop.permute.xlu1 %912 }
 0x236   : > { %v908_v21 = vpop.permute.xlu0 %907 }
 0x239   : > { %v867_v31 = vpop.permute.xlu1 %866 }
 0x23a   : > { %v862_v35 = vpop.permute.xlu0 %861 }
 0x23d   : > { %v923_v48 = vpop.permute.xlu1 %922 }
 0x23e   : > { %v918_v51 = vpop.permute.xlu0 %917 }
 0x288   : > { %v7699_v16 = vpop.f32.mrb[0].mxu1 }
 0x289   : > { %v870_v17 = vmul.f32 %v7699_v16, %v837_v9  ;;  %v782_v18 = vpop.f32.mrb[1].mxu1  ;;  %v1390_v9 = vld [vmem:[#allocation14] sm:$0xff] }
 0x28a   : > { %v869_v20 = vmul.f32 %v832_v7, %v782_v18  ;;  %v955_v7 = vld [vmem:[#allocation10 + $0x70] sm:$0xff]  ;;  %7781 = vmatprep.mubr.f32.mxu0 %v1390_v9 }
 0x28b   : > { %v926_v22 = vadd.f32 %v893_v8, %v870_v17  ;;  %v956_v8 = vld [vmem:[#allocation10 + $0x78] sm:$0xff] }
 0x28c   : > { %v925_v23 = vadd.f32 %v888_v6, %v869_v20  ;;  %v7702_v24 = vpop.f32.mrb[2].mxu1  ;;  %v954_v6 = vld [vmem:[#allocation10 + $0x68] sm:$0xff] }
 0x28d   : > { %v934_v25 = vmax.f32 %v926_v22, 0.0  ;;  %v872_v26 = vmul.f32 %v7702_v24, %v847_v10  ;;  %v792_v27 = vpop.f32.mrb[3].mxu1  ;;  %v1174_v10 = vpop.permute.xlu1 %1173 }
 0x28e   : > { %v933_v28 = vmax.f32 %v925_v23, 0.0  ;;  %v871_v29 = vmul.f32 %v842_v11, %v792_v27  ;;  %v1169_v11 = vpop.permute.xlu0 %1168 }
 0x28f   : > { %v928_v30 = vadd.f32 %v903_v12, %v872_v26 }
 0x290   : > { %v927_v32 = vadd.f32 %v898_v13, %v871_v29  ;;  %v7705_v33 = vpop.f32.mrb[4].mxu1  ;;  %v8717_v34 = vpack.c.bf16 %v934_v25, %v933_v28 }
 0x291   : > { %v936_v36 = vmax.f32 %v928_v30, 0.0  ;;  %v874_v37 = vmul.f32 %v7705_v33, %v857_v14  ;;  %v802_v38 = vpop.f32.mrb[5].mxu1  ;;  %v1286_v12 = vpop.permute.xlu1 %1285 }
 0x292   : > { %v935_v39 = vmax.f32 %v927_v32, 0.0  ;;  %v873_v40 = vmul.f32 %v852_v15, %v802_v38  ;;  %8718 = vmatprep.subr.bf16.mxu1 %v8717_v34  ;;  %v1281_v13 = vpop.permute.xlu0 %1280 }
 0x293   : > { %v930_v41 = vadd.f32 %v913_v19, %v874_v37  ;;  %8720 = vmatpush3.bf16.msra.mxu1 %v8717_v34 }
 0x294   : > { %v929_v42 = vadd.f32 %v908_v21, %v873_v40  ;;  %v7708_v43 = vpop.f32.mrb[6].mxu1  ;;  %v8721_v44 = vpack.c.bf16 %v936_v36, %v935_v39 }
 0x295   : > { %v938_v45 = vmax.f32 %v930_v41, 0.0  ;;  %v876_v46 = vmul.f32 %v7708_v43, %v867_v31  ;;  %v812_v47 = vpop.f32.mrb[7].mxu1  ;;  %v1184_v14 = vpop.permute.xlu1 %1183 }
 0x296   : > { %v937_v49 = vmax.f32 %v929_v42, 0.0  ;;  %v875_v50 = vmul.f32 %v862_v35, %v812_v47  ;;  %8722 = vmatprep.subr.bf16.mxu1 %v8721_v44  ;;  %v1179_v15 = vpop.permute.xlu0 %1178 }
 0x297   : > { %v932_v52 = vadd.f32 %v923_v48, %v876_v46  ;;  %8724 = vmatpush3.bf16.msra.mxu1 %v8721_v44 }
 0x298   : > { %v931_v53 = vadd.f32 %v918_v51, %v875_v50  ;;  %v8725_v54 = vpack.c.bf16 %v938_v45, %v937_v49 }
 0x299   : > { %v940_v55 = vmax.f32 %v932_v52, 0.0  ;;  %v1296_v16 = vpop.permute.xlu1 %1295 }
 0x29a   : > { %v939_v56 = vmax.f32 %v931_v53, 0.0  ;;  %8726 = vmatprep.subr.bf16.mxu1 %v8725_v54  ;;  %v1291_v17 = vpop.permute.xlu0 %1290 }
 0x29b   : > { %8728 = vmatpush3.bf16.msra.mxu1 %v8725_v54 }
 0x29c   : > { %v8729_v57 = vpack.c.bf16 %v940_v55, %v939_v56 }
 0x29d   : > { %v1194_v18 = vpop.permute.xlu1 %1193 }
 0x29e   : > { %8730 = vmatprep.subr.bf16.mxu1 %v8729_v57  ;;  %v1189_v19 = vpop.permute.xlu0 %1188 }
 0x29f   : > { %8732 = vmatpush3.bf16.msra.mxu1 %v8729_v57 }
 0x2a1   : > { %v1306_v20 = vpop.permute.xlu1 %1305 }
 0x2a2   : > { %7726 = vmatmul.mubr.msk.f32.vlgmr.msra.gmra.mrb[8].mxu1 %vm691_vm0, %v942_v58  ;;  %v1301_v21 = vpop.permute.xlu0 %1300 }
 0x2a3   : > { %7728 = vmatprep.mubr.msk.f32.mxu1 %vm691_vm0, %v943_v59 }
 0x2a5   : > { %v1204_v22 = vpop.permute.xlu1 %1203 }
 0x2a6   : > { %7729 = vmatmul.mubr.msk.f32.gmra.mrb[10].mxu1 %vm691_vm0, %v944_v60  ;;  %v1199_v23 = vpop.permute.xlu0 %1198 }
 0x2a7   : > { %7731 = vmatprep.mubr.msk.f32.mxu1 %vm691_vm0, %v945_v61 }
 0x2a9   : > { %v1316_v24 = vpop.permute.xlu1 %1315 }
 0x2aa   : > { %7732 = vmatmul.mubr.msk.f32.gmra.mrb[12].mxu1 %vm691_vm0, %v946_v62  ;;  %v1311_v25 = vpop.permute.xlu0 %1310 }
 0x2ab   : > { %7734 = vmatprep.mubr.msk.f32.mxu1 %vm691_vm0, %v947_v63 }
 0x2ad   : > { %v1214_v26 = vpop.permute.xlu1 %1213 }
 0x2ae   : > { %7735 = vmatmul.mubr.msk.f32.gmra.mrb[14].mxu1 %vm691_vm0, %v948_v0  ;;  %v1209_v27 = vpop.permute.xlu0 %1208 }
 0x2af   : > { %7737 = vmatprep.mubr.msk.f32.mxu1 %vm691_vm0, %v949_v1 }
 0x2b1   : > { %v1326_v28 = vpop.permute.xlu1 %1325 }
 0x2b2   : > { %7738 = vmatmul.mubr.msk.f32.gmra.mrb[16].mxu1 %vm691_vm0, %v950_v2  ;;  %v1321_v29 = vpop.permute.xlu0 %1320 }
 0x2b3   : > { %7740 = vmatprep.mubr.msk.f32.mxu1 %vm691_vm0, %v951_v3 }
 0x2b5   : > { %v1224_v30 = vpop.permute.xlu1 %1223 }
 0x2b6   : > { %7741 = vmatmul.mubr.msk.f32.gmra.mrb[18].mxu1 %vm691_vm0, %v952_v4  ;;  %v10605_v32 = vpop.permute.xlu0 %1218 }
 0x2b7   : > { %7743 = vmatprep.mubr.msk.f32.mxu1 %vm691_vm0, %v953_v5 }
 0x2b9   : > { %v1336_v42 = vpop.permute.xlu1 %1335 }
 0x2ba   : > { %7744 = vmatmul.mubr.msk.f32.gmra.mrb[20].mxu1 %vm691_vm0, %v954_v6  ;;  %v1331_v45 = vpop.permute.xlu0 %1330 }
 0x2bb   : > { %7746 = vmatprep.mubr.msk.f32.mxu1 %vm691_vm0, %v955_v7 }
 0x2bd   : > { %v1234_v56 = vpop.permute.xlu1 %1233 }
 0x2be   : > { %7747 = vmatmul.mubr.msk.f32.gmra.mrb[22].mxu1 %vm691_vm0, %v956_v8  ;;  %v1229_v60 = vpop.permute.xlu0 %1228 }
 0x2c1   : > { %v1346_v9 = vpop.permute.xlu1 %1345 }
 0x375   : > { %v7727_v31 = vpop.f32.mrb[8].mxu1 }
 0x376   : > { %v1247_v33 = vmul.f32 %v7727_v31, %v1174_v10  ;;  %v1071_v34 = vpop.f32.mrb[9].mxu1 }
 0x377   : > { %v1246_v35 = vmul.f32 %v1169_v11, %v1071_v34 }
 0x378   : > { %v1359_v36 = vadd.f32 %v1286_v12, %v1247_v33  ;;  %v1341_v12 = vpop.permute.xlu0 %1340 }
 0x379   : > { %v1358_v37 = vadd.f32 %v1281_v13, %v1246_v35  ;;  %v7730_v38 = vpop.f32.mrb[10].mxu1 }
 0x37a   : > { %v10607_v39 = vmax.f32 %v1359_v36, 0.0  ;;  %v1249_v40 = vmul.f32 %v7730_v38, %v1184_v14  ;;  %v1081_v41 = vpop.f32.mrb[11].mxu1 }
 0x37b   : > { %v10609_v43 = vmax.f32 %v1358_v37, 0.0  ;;  %v1248_v44 = vmul.f32 %v1179_v15, %v1081_v41 }
 0x37c   : > { %v1361_v46 = vadd.f32 %v1296_v16, %v1249_v40 }
 0x37d   : > { %v1360_v47 = vadd.f32 %v1291_v17, %v1248_v44  ;;  %1551 = vxpose.xlu0.b32.start [1/16] (narrow) %v10609_v43, 32  ;;  %v7733_v48 = vpop.f32.mrb[12].mxu1  ;;  %v10614_v49 = vpack.c.bf16 %v10607_v39, %v10609_v43 }
 0x37e   : > { %v10616_v50 = vmax.f32 %v1361_v46, 0.0  ;;  %v1251_v51 = vmul.f32 %v7733_v48, %v1194_v18  ;;  %v1091_v52 = vpop.f32.mrb[13].mxu1 }
 0x37f   : > { %v10618_v53 = vmax.f32 %v1360_v47, 0.0  ;;  %v1250_v54 = vmul.f32 %v1189_v19, %v1091_v52  ;;  %8734 = vmatprep.subr.bf16.mxu0 %v10614_v49 }
 0x380   : > { %v1363_v55 = vadd.f32 %v1306_v20, %v1251_v51  ;;  %8736 = vmatpush3.bf16.msra.mxu0 %v10614_v49 }
 0x381   : > { %v1362_v57 = vadd.f32 %v1301_v21, %v1250_v54  ;;  %1552 = vxpose.xlu0.b32.cont [2/16] (narrow) %v10607_v39, 32  ;;  %v7736_v58 = vpop.f32.mrb[14].mxu1  ;;  %v10625_v59 = vpack.c.bf16 %v10616_v50, %v10618_v53 }
 0x382   : > { %v10627_v61 = vmax.f32 %v1363_v55, 0.0  ;;  %v1253_v62 = vmul.f32 %v7736_v58, %v1204_v22  ;;  %v1101_v63 = vpop.f32.mrb[15].mxu1  ;;  %v1391_v55 = vld [vmem:[#allocation14 + $0x8] sm:$0xff]  ;;  %v1394_v58 = vld [vmem:[#allocation14 + $0x20] sm:$0xff] }
 0x383   : > { %v10629_v0 = vmax.f32 %v1362_v57, 0.0  ;;  %v1252_v1 = vmul.f32 %v1199_v23, %v1101_v63  ;;  %8738 = vmatprep.subr.bf16.mxu0 %v10625_v59  ;;  %v1244_v23 = vpop.permute.xlu1 %1243  ;;  %v1393_v57 = vld [vmem:[#allocation14 + $0x18] sm:$0xff]  ;;  %v1398_v63 = vld [vmem:[#allocation14 + $0x40] sm:$0xff] }
 0x384   : > { %v1365_v2 = vadd.f32 %v1316_v24, %v1253_v62  ;;  %8740 = vmatpush3.bf16.msra.mxu0 %v10625_v59  ;;  %v1396_v62 = vld [vmem:[#allocation14 + $0x30] sm:$0xff] }
 0x385   : > { %v1364_v3 = vadd.f32 %v1311_v25, %v1252_v1  ;;  %1553 = vxpose.xlu0.b32.cont [3/16] (narrow) %v10618_v53, 32  ;;  %v7739_v4 = vpop.f32.mrb[16].mxu1  ;;  %v10636_v5 = vpack.c.bf16 %v10627_v61, %v10629_v0  ;;  %v1400_v1 = vld [vmem:[#allocation14 + $0x50] sm:$0xff] }
 0x386   : > { %v10638_v6 = vmax.f32 %v1365_v2, 0.0  ;;  %v1255_v7 = vmul.f32 %v7739_v4, %v1214_v26  ;;  %v1111_v8 = vpop.f32.mrb[17].mxu1  ;;  %v1401_v2 = vld [vmem:[#allocation14 + $0x58] sm:$0xff]  ;;  %v1403_v4 = vld [vmem:[#allocation14 + $0x68] sm:$0xff] }
 0x387   : > { %v10640_v10 = vmax.f32 %v1364_v3, 0.0  ;;  %v1254_v11 = vmul.f32 %v1209_v27, %v1111_v8  ;;  %8742 = vmatprep.subr.bf16.mxu0 %v10636_v5  ;;  %v1239_v27 = vpop.permute.xlu0 %1238  ;;  %v1356_v41 = vpop.permute.xlu1 %1355  ;;  %v1402_v3 = vld [vmem:[#allocation14 + $0x60] sm:$0xff] }
 0x388   : > { %v1367_v13 = vadd.f32 %v1326_v28, %v1255_v7  ;;  %8744 = vmatpush3.bf16.msra.mxu0 %v10636_v5  ;;  %v1405_v7 = vld [vmem:[#allocation14 + $0x78] sm:$0xff]  ;;  %v1732_v8 = vld [vmem:[#allocation16] sm:$0xff] }
 0x389   : > { %v1366_v14 = vadd.f32 %v1321_v29, %v1254_v11  ;;  %1554 = vxpose.xlu0.b32.cont [4/16] (narrow) %v10616_v50, 32  ;;  %v7742_v15 = vpop.f32.mrb[18].mxu1  ;;  %v10647_v16 = vpack.c.bf16 %v10638_v6, %v10640_v10  ;;  %v1734_v11 = vld [vmem:[#allocation16 + $0x10] sm:$0xff] }
 0x38a   : > { %v10649_v17 = vmax.f32 %v1367_v13, 0.0  ;;  %v1257_v18 = vmul.f32 %v7742_v15, %v1224_v30  ;;  %v1121_v19 = vpop.f32.mrb[19].mxu1  ;;  %v1736_v13 = vld [vmem:[#allocation16 + $0x20] sm:$0xff]  ;;  %v1738_v15 = vld [vmem:[#allocation16 + $0x30] sm:$0xff] }
 0x38b   : > { %v10651_v20 = vmax.f32 %v1366_v14, 0.0  ;;  %v1256_v21 = vmul.f32 %v10605_v32, %v1121_v19  ;;  %8746 = vmatprep.subr.bf16.mxu0 %v10647_v16  ;;  %v1737_v14 = vld [vmem:[#allocation16 + $0x28] sm:$0xff] }
 0x38c   : > { %v1369_v22 = vadd.f32 %v1336_v42, %v1257_v18  ;;  %8748 = vmatpush3.bf16.msra.mxu0 %v10647_v16  ;;  %v1740_v18 = vld [vmem:[#allocation16 + $0x40] sm:$0xff]  ;;  %v1741_v19 = vld [vmem:[#allocation16 + $0x48] sm:$0xff] }
 0x38d   : > { %v1368_v24 = vadd.f32 %v1331_v45, %v1256_v21  ;;  %1555 = vxpose.xlu0.b32.cont [5/16] (narrow) %v10629_v0, 32  ;;  %v7745_v25 = vpop.f32.mrb[20].mxu1  ;;  %v10659_v26 = vpack.c.bf16 %v10649_v17, %v10651_v20  ;;  %v1351_v45 = vpop.permute.xlu0 %1350  ;;  %v1742_v21 = vld [vmem:[#allocation16 + $0x50] sm:$0xff] }
 0x38e   : > { %v10661_v28 = vmax.f32 %v1369_v22, 0.0  ;;  %v1259_v29 = vmul.f32 %v7745_v25, %v1234_v56  ;;  %v1131_v30 = vpop.f32.mrb[21].mxu1  ;;  %v1392_v56 = vld [vmem:[#allocation14 + $0x10] sm:$0xff]  ;;  %v1743_v22 = vld [vmem:[#allocation16 + $0x58] sm:$0xff] }
 0x38f   : > { %v10663_v31 = vmax.f32 %v1368_v24, 0.0  ;;  %v1258_v32 = vmul.f32 %v1229_v60, %v1131_v30  ;;  %8750 = vmatprep.subr.bf16.mxu0 %v10659_v26  ;;  %v1395_v60 = vld [vmem:[#allocation14 + $0x28] sm:$0xff]  ;;  %v1746_v25 = vld [vmem:[#allocation16 + $0x70] sm:$0xff] }
 0x390   : > { %12080 = vst [vmem:[#allocation39_spill] sm:$0xff] %v10661_v28  ;;  %v1371_v33 = vadd.f32 %v1346_v9, %v1259_v29  ;;  %8752 = vmatpush3.bf16.msra.mxu0 %v10659_v26  ;;  %v1733_v9 = vld [vmem:[#allocation16 + $0x8] sm:$0xff]  ;;  %v1763_v29 = vld [vmem:[#allocation17 + $0x78] sm:$0xff] }
 0x391   : > { %12081 = vst [vmem:[#allocation40_spill] sm:$0xff] %v10663_v31  ;;  %v1370_v34 = vadd.f32 %v1341_v12, %v1258_v32  ;;  %1556 = vxpose.xlu0.b32.cont [6/16] (narrow) %v10627_v61, 32  ;;  %v7748_v35 = vpop.f32.mrb[22].mxu1  ;;  %v8753_v36 = vpack.c.bf16 %v10661_v28, %v10663_v31  ;;  %v1735_v12 = vld [vmem:[#allocation16 + $0x18] sm:$0xff]  ;;  %v1745_v24 = vld [vmem:[#allocation16 + $0x68] sm:$0xff] }
 0x392   : > { %v10670_v37 = vmax.f32 %v1371_v33, 0.0  ;;  %v1261_v38 = vmul.f32 %v7748_v35, %v1244_v23  ;;  %v1141_v40 = vpop.f32.mrb[23].mxu1  ;;  %v1744_v23 = vld [vmem:[#allocation16 + $0x60] sm:$0xff]  ;;  %v2215_v30 = vld [vmem:[#allocation20 + $0x8] sm:$0xff]  ;;  %v2217_v33 = vld [vmem:[#allocation20 + $0x18] sm:$0xff] }
 0x393   : > { %v10672_v42 = vmax.f32 %v1370_v34, 0.0  ;;  %v1260_v44 = vmul.f32 %v1239_v27, %v1141_v40  ;;  %8754 = vmatprep.subr.bf16.mxu0 %v8753_v36  ;;  %v1752_v27 = vld [vmem:[#allocation17 + $0x20] sm:$0xff]  ;;  %v2456_v32 = vld [vmem:[#allocation22 + $0x8] sm:$0xff]  ;;  %v2458_v35 = vld [vmem:[#allocation22 + $0x18] sm:$0xff] }
 0x394   : > { %12082 = vst [vmem:[#allocation41_spill] sm:$0xff] %v10670_v37  ;;  %v1373_v46 = vadd.f32 %v1356_v41, %v1261_v38  ;;  %8756 = vmatpush3.bf16.msra.mxu0 %v8753_v36  ;;  %v2568_v34 = vld [vmem:[#allocation23 + $0x8] sm:$0xff]  ;;  %v2570_v40 = vld [vmem:[#allocation23 + $0x18] sm:$0xff] }
 0x395   : > { %12083 = vst [vmem:[#allocation42_spill] sm:$0xff] %v10672_v42  ;;  %v1372_v47 = vadd.f32 %v1351_v45, %v1260_v44  ;;  %1557 = vxpose.xlu0.b32.cont [7/16] (narrow) %v10640_v10, 32  ;;  %v8757_v48 = vpack.c.bf16 %v10670_v37, %v10672_v42  ;;  %v2460_v41 = vld [vmem:[#allocation22 + $0x28] sm:$0xff]  ;;  %v2221_v44 = vld [vmem:[#allocation20 + $0x38] sm:$0xff] }
 0x396   : > { %v10677_v51 = vmax.f32 %v1373_v46, 0.0  ;;  %v2572_v45 = vld [vmem:[#allocation23 + $0x28] sm:$0xff]  ;;  %v2462_v46 = vld [vmem:[#allocation22 + $0x38] sm:$0xff] }
 0x397   : > { %v10679_v52 = vmax.f32 %v1372_v47, 0.0  ;;  %8758 = vmatprep.subr.bf16.mxu0 %v8757_v48  ;;  %v2223_v47 = vld [vmem:[#allocation20 + $0x48] sm:$0xff] }
 0x398   : > { %12084 = vst [vmem:[#allocation43_spill] sm:$0xff] %v10677_v51  ;;  %8760 = vmatpush3.bf16.msra.mxu0 %v8757_v48 }
 0x399   : > { %12085 = vst [vmem:[#allocation44_spill] sm:$0xff] %v10679_v52  ;;  %1558 = vxpose.xlu0.b32.cont [8/16] (narrow) %v10638_v6, 32  ;;  %v8761_v54 = vpack.c.bf16 %v10677_v51, %v10679_v52 }
 0x39b   : > { %8762 = vmatprep.subr.bf16.mxu0 %v8761_v54 }
 0x39c   : > { %8764 = vmatpush3.bf16.msra.mxu0 %v8761_v54 }
 0x39d   : > { %1559 = vxpose.xlu0.b32.cont [9/16] (narrow) %v10651_v20, 32  ;;  %8798 = vmatprep.subr.bf16.mxu0 %v10614_v49 }
 0x39f   : > { %7782 = vmatmul.mubr.f32.vlgmr.msra.gmra.mrb[0].mxu0 %v1391_v55  ;;  %v2225_v55 = vld [vmem:[#allocation20 + $0x58] sm:$0xff] }
 0x3a0   : > { %8800 = vmatpush3.bf16.msra.mxu0 %v10614_v49  ;;  %7784 = vmatprep.mubr.f32.mxu0 %v1392_v56  ;;  %v1397_v49 = vld [vmem:[#allocation14 + $0x38] sm:$0xff]  ;;  %v2576_v56 = vld [vmem:[#allocation23 + $0x48] sm:$0xff] }
 0x3a1   : > { %1560 = vxpose.xlu0.b32.cont [10/16] (narrow) %v10649_v17, 32  ;;  %8802 = vmatprep.subr.bf16.mxu0 %v10625_v59 }
 0x3a3   : > { %7785 = vmatmul.mubr.f32.gmra.mrb[2].mxu0 %v1393_v57  ;;  %v2466_v57 = vld [vmem:[#allocation22 + $0x58] sm:$0xff] }
 0x3a4   : > { %8804 = vmatpush3.bf16.msra.mxu0 %v10625_v59  ;;  %7787 = vmatprep.mubr.f32.mxu0 %v1394_v58  ;;  %v1399_v59 = vld [vmem:[#allocation14 + $0x48] sm:$0xff] }
 0x3a5   : > { %1561 = vxpose.xlu0.b32.cont [11/16] (narrow) %v10663_v31, 32  ;;  %8806 = vmatprep.subr.bf16.mxu0 %v10636_v5  ;;  %v2227_v58 = vld [vmem:[#allocation20 + $0x68] sm:$0xff] }
 0x3a7   : > { %7788 = vmatmul.mubr.f32.gmra.mrb[4].mxu0 %v1395_v60  ;;  %v2578_v60 = vld [vmem:[#allocation23 + $0x58] sm:$0xff] }
 0x3a8   : > { %8808 = vmatpush3.bf16.msra.mxu0 %v10636_v5  ;;  %7790 = vmatprep.mubr.f32.mxu0 %v1396_v62  ;;  %v1404_v5 = vld [vmem:[#allocation14 + $0x70] sm:$0xff]  ;;  %v2468_v62 = vld [vmem:[#allocation22 + $0x68] sm:$0xff] }
 0x3a9   : > { %1562 = vxpose.xlu0.b32.cont [12/16] (narrow) %v10661_v28, 32  ;;  %8810 = vmatprep.subr.bf16.mxu0 %v10647_v16 }
 0x3ab   : > { %7791 = vmatmul.mubr.f32.gmra.mrb[6].mxu0 %v1397_v49  ;;  %v2229_v49 = vld [vmem:[#allocation20 + $0x78] sm:$0xff] }
 0x3ac   : > { %8812 = vmatpush3.bf16.msra.mxu0 %v10647_v16  ;;  %7793 = vmatprep.mubr.f32.mxu0 %v1398_v63  ;;  %v1739_v16 = vld [vmem:[#allocation16 + $0x38] sm:$0xff]  ;;  %v2580_v63 = vld [vmem:[#allocation23 + $0x68] sm:$0xff] }
 0x3ad   : > { %1563 = vxpose.xlu0.b32.cont [13/16] (narrow) %v10672_v42, 32  ;;  %8814 = vmatprep.subr.bf16.mxu0 %v10659_v26 }
 0x3af   : > { %7794 = vmatmul.mubr.f32.gmra.mrb[8].mxu0 %v1399_v59  ;;  %v2470_v59 = vld [vmem:[#allocation22 + $0x78] sm:$0xff] }
 0x3b0   : > { %8816 = vmatpush3.bf16.msra.mxu0 %v10659_v26  ;;  %7796 = vmatprep.mubr.f32.mxu0 %v1400_v1  ;;  %v1747_v26 = vld [vmem:[#allocation16 + $0x78] sm:$0xff] }
 0x3b1   : > { %1564 = vxpose.xlu0.b32.cont [14/16] (narrow) %v10670_v37, 32  ;;  %8818 = vmatprep.subr.bf16.mxu0 %v8753_v36  ;;  %v2582_v1 = vld [vmem:[#allocation23 + $0x78] sm:$0xff] }
 0x3b3   : > { %7797 = vmatmul.mubr.f32.gmra.mrb[10].mxu0 %v1401_v2 }
 0x3b4   : > { %8820 = vmatpush3.bf16.msra.mxu0 %v8753_v36  ;;  %7799 = vmatprep.mubr.f32.mxu0 %v1402_v3  ;;  %v2219_v36 = vld [vmem:[#allocation20 + $0x28] sm:$0xff] }
 0x3b5   : > { %1565 = vxpose.xlu0.b32.cont [15/16] (narrow) %v10679_v52, 32  ;;  %8822 = vmatprep.subr.bf16.mxu0 %v8757_v48 }
 0x3b7   : > { %7800 = vmatmul.mubr.f32.gmra.mrb[12].mxu0 %v1403_v4 }
 0x3b8   : > { %8824 = vmatpush3.bf16.msra.mxu0 %v8757_v48  ;;  %7802 = vmatprep.mubr.f32.mxu0 %v1404_v5  ;;  %v2574_v48 = vld [vmem:[#allocation23 + $0x38] sm:$0xff] }
 0x3b9   : > { %1566 = vxpose.xlu0.b32.end [16/16] (narrow) %v10677_v51, 32  ;;  %8826 = vmatprep.subr.bf16.mxu0 %v8761_v54 }
 0x3bb   : > { %7803 = vmatmul.mubr.f32.gmra.mrb[14].mxu0 %v1405_v7 }
 0x3bc   : > { %8828 = vmatpush3.bf16.msra.mxu0 %v8761_v54  ;;  %7875 = vmatprep.mubr.f32.mxu0 %v1732_v8  ;;  %v2464_v54 = vld [vmem:[#allocation22 + $0x48] sm:$0xff] }
 0x3bf   : > { %7876 = vmatmul.mubr.f32.vlgmr.msra.gmra.mrb[16].mxu0 %v1733_v9 }
 0x3c0   : > { %7878 = vmatprep.mubr.f32.mxu0 %v1734_v11 }
 0x3c3   : > { %7879 = vmatmul.mubr.f32.gmra.mrb[18].mxu0 %v1735_v12 }
 0x3c4   : > { %7881 = vmatprep.mubr.f32.mxu0 %v1736_v13 }
 0x3c7   : > { %7882 = vmatmul.mubr.f32.gmra.mrb[20].mxu0 %v1737_v14 }
 0x3c8   : > { %7884 = vmatprep.mubr.f32.mxu0 %v1738_v15 }
 0x3cb   : > { %7885 = vmatmul.mubr.f32.gmra.mrb[22].mxu0 %v1739_v16 }
 0x3cc   : > { %7887 = vmatprep.mubr.f32.mxu0 %v1740_v18 }
 0x3cf   : > { %7888 = vmatmul.mubr.f32.gmra.mrb[24].mxu0 %v1741_v19 }
 0x3d0   : > { %7890 = vmatprep.mubr.f32.mxu0 %v1742_v21 }
 0x3d3   : > { %7891 = vmatmul.mubr.f32.gmra.mrb[26].mxu0 %v1743_v22 }
 0x3d4   : > { %7893 = vmatprep.mubr.f32.mxu0 %v1744_v23 }
 0x3d7   : > { %7894 = vmatmul.mubr.f32.gmra.mrb[28].mxu0 %v1745_v24 }
 0x3d8   : > { %7896 = vmatprep.mubr.f32.mxu0 %v1746_v25 }
 0x3db   : > { %7897 = vmatmul.mubr.f32.gmra.mrb[30].mxu0 %v1747_v26 }
 0x3e2   : > { %1786 = vperm.xlu0 %9459, %v1752_v27  }
 0x3e6   : > { %1841 = vperm.xlu0 %9459, %v1763_v29  }
 0x3ea   : > { %2237 = vperm.xlu0 %9459, %v2215_v30  }
 0x3ee   : > { %2478 = vperm.xlu0 %9459, %v2456_v32  }
 0x3f2   : > { %2247 = vperm.xlu0 %9459, %v2217_v33  }
 0x3f6   : > { %2590 = vperm.xlu0 %9459, %v2568_v34  }
 0x3fa   : > { %2488 = vperm.xlu0 %9459, %v2458_v35  }
 0x3fd   : > { %v1567_v38 = vpop.trf.xlu0 }
 0x3fe   : > { %2257 = vperm.xlu0 %9459, %v2219_v36   ;;  %7837 = vmatprep.mubr.f32.mxu1 %v1567_v38 }
 0x401   : > { %v1568_v27 = vpop.trf.xlu0 }
 0x402   : > { %2600 = vperm.xlu0 %9459, %v2570_v40  }
 0x405   : > { %v1569_v34 = vpop.trf.xlu0 }
 0x406   : > { %2498 = vperm.xlu0 %9459, %v2460_v41  }
 0x409   : > { %v1570_v40 = vpop.trf.xlu0 }
 0x40a   : > { %2267 = vperm.xlu0 %9459, %v2221_v44  }
 0x40e   : > { %2610 = vperm.xlu0 %9459, %v2572_v45  }
 0x412   : > { %2508 = vperm.xlu0 %9459, %v2462_v46  }
 0x416   : > { %2277 = vperm.xlu0 %9459, %v2223_v47  }
 0x41a   : > { %2620 = vperm.xlu0 %9459, %v2574_v48  }
 0x41e   : > { %2518 = vperm.xlu0 %9459, %v2464_v54  }
 0x422   : > { %2287 = vperm.xlu0 %9459, %v2225_v55  }
 0x426   : > { %2630 = vperm.xlu0 %9459, %v2576_v56  }
 0x42a   : > { %2528 = vperm.xlu0 %9459, %v2466_v57  }
 0x42e   : > { %2297 = vperm.xlu0 %9459, %v2227_v58  }
 0x432   : > { %2640 = vperm.xlu0 %9459, %v2578_v60  }
 0x436   : > { %2538 = vperm.xlu0 %9459, %v2468_v62  }
 0x43a   : > { %2307 = vperm.xlu0 %9459, %v2229_v49  }
 0x43e   : > { %2650 = vperm.xlu0 %9459, %v2580_v63  }
 0x442   : > { %2548 = vperm.xlu0 %9459, %v2470_v59  }
 0x446   : > { %2660 = vperm.xlu0 %9459, %v2582_v1  }
 0x472   : > { %v7783_v2 = vpop.f32.mrb[0].mxu0 }
 0x473   : > { %v1472_v3 = vpop.f32.mrb[1].mxu0 }
 0x474   : > { %v8765_v4 = vpack.c.bf16 %v7783_v2, %v1472_v3 }
 0x476   : > { %v7786_v5 = vpop.f32.mrb[2].mxu0  ;;  %8766 = vmatprep.subr.bf16.mxu1 %v8765_v4 }
 0x477   : > { %v1482_v7 = vpop.f32.mrb[3].mxu0  ;;  %8768 = vmatpush3.bf16.msra.mxu1 %v8765_v4 }
 0x478   : > { %v8769_v8 = vpack.c.bf16 %v7786_v5, %v1482_v7 }
 0x47a   : > { %v7789_v9 = vpop.f32.mrb[4].mxu0  ;;  %8770 = vmatprep.subr.bf16.mxu1 %v8769_v8 }
 0x47b   : > { %v1492_v11 = vpop.f32.mrb[5].mxu0  ;;  %8772 = vmatpush3.bf16.msra.mxu1 %v8769_v8 }
 0x47c   : > { %v8773_v12 = vpack.c.bf16 %v7789_v9, %v1492_v11 }
 0x47e   : > { %v7792_v13 = vpop.f32.mrb[6].mxu0  ;;  %8774 = vmatprep.subr.bf16.mxu1 %v8773_v12 }
 0x47f   : > { %v1502_v14 = vpop.f32.mrb[7].mxu0  ;;  %8776 = vmatpush3.bf16.msra.mxu1 %v8773_v12 }
 0x480   : > { %v8777_v15 = vpack.c.bf16 %v7792_v13, %v1502_v14 }
 0x482   : > { %v7795_v16 = vpop.f32.mrb[8].mxu0  ;;  %8778 = vmatprep.subr.bf16.mxu1 %v8777_v15 }
 0x483   : > { %v1512_v18 = vpop.f32.mrb[9].mxu0  ;;  %8780 = vmatpush3.bf16.msra.mxu1 %v8777_v15 }
 0x484   : > { %v8781_v19 = vpack.c.bf16 %v7795_v16, %v1512_v18 }
 0x486   : > { %v7798_v21 = vpop.f32.mrb[10].mxu0  ;;  %8782 = vmatprep.subr.bf16.mxu1 %v8781_v19 }
 0x487   : > { %v1522_v22 = vpop.f32.mrb[11].mxu0  ;;  %8784 = vmatpush3.bf16.msra.mxu1 %v8781_v19 }
 0x488   : > { %v8785_v23 = vpack.c.bf16 %v7798_v21, %v1522_v22 }
 0x48a   : > { %v7801_v24 = vpop.f32.mrb[12].mxu0  ;;  %8786 = vmatprep.subr.bf16.mxu1 %v8785_v23 }
 0x48b   : > { %v1532_v25 = vpop.f32.mrb[13].mxu0  ;;  %8788 = vmatpush3.bf16.msra.mxu1 %v8785_v23 }
 0x48c   : > { %v8789_v26 = vpack.c.bf16 %v7801_v24, %v1532_v25 }
 0x48e   : > { %v7804_v29 = vpop.f32.mrb[14].mxu0  ;;  %8790 = vmatprep.subr.bf16.mxu1 %v8789_v26 }
 0x48f   : > { %v1542_v30 = vpop.f32.mrb[15].mxu0  ;;  %8792 = vmatpush3.bf16.msra.mxu1 %v8789_v26 }
 0x490   : > { %v8793_v32 = vpack.c.bf16 %v7804_v29, %v1542_v30  ;;  %v1748_v29 = vld [vmem:[#allocation17] sm:$0xff]  ;;  %v1749_v30 = vld [vmem:[#allocation17 + $0x8] sm:$0xff] }
 0x492   : > { %8794 = vmatprep.subr.bf16.mxu1 %v8793_v32  ;;  %v10702_v33 = vpop.f32.mrb[16].mxu0 }
 0x493   : > { %8796 = vmatpush3.bf16.msra.mxu1 %v8793_v32  ;;  %v10704_v35 = vpop.f32.mrb[17].mxu0  ;;  %v1750_v32 = vld [vmem:[#allocation17 + $0x10] sm:$0xff] }
 0x496   : > { %7838 = vmatmul.mubr.f32.vlgmr.msra.gmra.mrb[24].mxu1 %v1568_v27  ;;  %v10706_v36 = vpop.f32.mrb[18].mxu0 }
 0x497   : > { %7840 = vmatprep.mubr.f32.mxu1 %v1569_v34  ;;  %v10708_v38 = vpop.f32.mrb[19].mxu0  ;;  %v1751_v34 = vld [vmem:[#allocation17 + $0x18] sm:$0xff] }
 0x49a   : > { %v10710_v41 = vpop.f32.mrb[20].mxu0  ;;  %7841 = vmatmul.mubr.f32.gmra.mrb[26].mxu1 %v1570_v40  ;;  %v1753_v40 = vld [vmem:[#allocation17 + $0x28] sm:$0xff] }
 0x49b   : > { %v10712_v44 = vpop.f32.mrb[21].mxu0 }
 0x49e   : > { %v10714_v45 = vpop.f32.mrb[22].mxu0 }
 0x49f   : > { %v10716_v46 = vpop.f32.mrb[23].mxu0 }
 0x4a2   : > { %v10718_v47 = vpop.f32.mrb[24].mxu0 }
 0x4a3   : > { %v10720_v48 = vpop.f32.mrb[25].mxu0 }
 0x4a6   : > { %v10722_v54 = vpop.f32.mrb[26].mxu0 }
 0x4a7   : > { %v10724_v55 = vpop.f32.mrb[27].mxu0 }
 0x4aa   : > { %v10726_v56 = vpop.f32.mrb[28].mxu0 }
 0x4ab   : > { %v10728_v57 = vpop.f32.mrb[29].mxu0 }
 0x4ae   : > { %v10730_v58 = vpop.f32.mrb[30].mxu0 }
 0x569   : > { %v7839_v60 = vpop.f32.mrb[24].mxu1 }
 0x56a   : > { %v1649_v62 = vpop.f32.mrb[25].mxu1  ;;  %v1672_v49 = vsel %vm1668_vm1, %v7839_v60, -inf }
 0x56b   : > { %1673 = vmax.xlane.f32.xlu1 %v1672_v49  ;;  %v1669_v59 = vsel %vm1668_vm1, %v1649_v62, -inf  ;;  %v1756_v49 = vld [vmem:[#allocation17 + $0x40] sm:$0xff] }
 0x56d   : > { %v7842_v63 = vpop.f32.mrb[26].mxu1 }
 0x56e   : > { %v1659_v1 = vpop.f32.mrb[27].mxu1  ;;  %v1678_v3 = vsel %vm1668_vm1, %v7842_v63, -inf }
 0x56f   : > { %1670 = vmax.xlane.f32.xlu1 %v1669_v59  ;;  %v1675_v2 = vsel %vm1668_vm1, %v1659_v1, -inf  ;;  %v1758_v59 = vld [vmem:[#allocation17 + $0x50] sm:$0xff] }
 0x573   : > { %1676 = vmax.xlane.f32.xlu1 %v1675_v2  ;;  %v1760_v2 = vld [vmem:[#allocation17 + $0x60] sm:$0xff] }
 0x577   : > { %1679 = vmax.xlane.f32.xlu1 %v1678_v3  ;;  %v1761_v3 = vld [vmem:[#allocation17 + $0x68] sm:$0xff] }
 0x5f8   : > { %v1674_v4 = vpop.xlane.xlu1 %1673 }
 0x5f9   : > { %v1682_v5 = vsub.f32 %v7839_v60, %v1674_v4  ;;  %v1754_v60 = vld [vmem:[#allocation17 + $0x30] sm:$0xff] }
 0x5fa   : > { %v1762_v4 = vld [vmem:[#allocation17 + $0x70] sm:$0xff] }
 0x5fb   : > { %v1687_v7 = vmul.f32 1.442695, %v1682_v5  ;;  %v10752_v5 = vpop.f32.mrb[31].mxu0 }
 0x5fc   : > { %v1671_v8 = vpop.xlane.xlu1 %1670 }
 0x5fd   : > { %9461 = vpow2.f32 %v1687_v7  ;;  %v1681_v9 = vsub.f32 %v1649_v62, %v1671_v8  ;;  %v1755_v62 = vld [vmem:[#allocation17 + $0x38] sm:$0xff]  ;;  %v2214_v7 = vld [vmem:[#allocation20] sm:$0xff] }
 0x5fe   : > { %v2455_v8 = vld [vmem:[#allocation22] sm:$0xff] }
 0x5ff   : > { %v1685_v11 = vmul.f32 1.442695, %v1681_v9  ;;  %v2216_v9 = vld [vmem:[#allocation20 + $0x10] sm:$0xff] }
 0x600   : > { %v1677_v12 = vpop.xlane.xlu1 %1676 }
 0x601   : > { %9463 = vpow2.f32 %v1685_v11  ;;  %v1683_v13 = vsub.f32 %v1659_v1, %v1677_v12  ;;  %v1759_v1 = vld [vmem:[#allocation17 + $0x58] sm:$0xff]  ;;  %v2567_v11 = vld [vmem:[#allocation23] sm:$0xff]  ;;  %v2457_v12 = vld [vmem:[#allocation22 + $0x10] sm:$0xff] }
 0x603   : > { %v1689_v18 = vmul.f32 1.442695, %v1683_v13  ;;  %v2218_v13 = vld [vmem:[#allocation20 + $0x20] sm:$0xff] }
 0x604   : > { %v1680_v14 = vpop.xlane.xlu1 %1679 }
 0x605   : > { %v1684_v15 = vsub.f32 %v7842_v63, %v1680_v14  ;;  %v1757_v63 = vld [vmem:[#allocation17 + $0x48] sm:$0xff]  ;;  %v2569_v14 = vld [vmem:[#allocation23 + $0x10] sm:$0xff] }
 0x607   : > { %v10736_v16 = vpop.eup %9461  ;;  %v1691_v19 = vmul.f32 1.442695, %v1684_v15  ;;  %v2459_v15 = vld [vmem:[#allocation22 + $0x20] sm:$0xff] }
 0x608   : > { %v1696_v21 = vsel %vm1668_vm1, %v10736_v16, 0.0 }
 0x609   : > { %9465 = vpow2.f32 %v1691_v19  ;;  %1697 = vadd.xlane.f32.xlu1 %v1696_v21  ;;  %v2571_v19 = vld [vmem:[#allocation23 + $0x20] sm:$0xff]  ;;  %v2461_v21 = vld [vmem:[#allocation22 + $0x30] sm:$0xff] }
 0x60a   : > { %9467 = vpow2.f32 %v1689_v18  ;;  %v2220_v18 = vld [vmem:[#allocation20 + $0x30] sm:$0xff] }
 0x60b   : > { %v10740_v22 = vpop.eup %9463 }
 0x60c   : > { %v1693_v23 = vsel %vm1668_vm1, %v10740_v22, 0.0 }
 0x60d   : > { %1694 = vadd.xlane.f32.xlu1 %v1693_v23  ;;  %v2222_v23 = vld [vmem:[#allocation20 + $0x40] sm:$0xff] }
 0x613   : > { %v10744_v24 = vpop.eup %9465 }
 0x614   : > { %v1702_v25 = vsel %vm1668_vm1, %v10744_v24, 0.0  ;;  %v10748_v26 = vpop.eup %9467 }
 0x615   : > { %1703 = vadd.xlane.f32.xlu1 %v1702_v25  ;;  %v1699_v27 = vsel %vm1668_vm1, %v10748_v26, 0.0  ;;  %v2573_v25 = vld [vmem:[#allocation23 + $0x30] sm:$0xff] }
 0x619   : > { %1700 = vadd.xlane.f32.xlu1 %v1699_v27  ;;  %v2463_v27 = vld [vmem:[#allocation22 + $0x40] sm:$0xff] }
 0x62a   : > { %1766 = vperm.xlu1 %9460, %v1748_v29  }
 0x62e   : > { %1771 = vperm.xlu1 %9460, %v1749_v30   ;;  %v2224_v30 = vld [vmem:[#allocation20 + $0x50] sm:$0xff] }
 0x632   : > { %1776 = vperm.xlu1 %9460, %v1750_v32   ;;  %v2575_v32 = vld [vmem:[#allocation23 + $0x40] sm:$0xff] }
 0x636   : > { %1781 = vperm.xlu1 %9460, %v1751_v34  }
 0x63a   : > { %1791 = vperm.xlu1 %9460, %v1753_v40   ;;  %v2465_v40 = vld [vmem:[#allocation22 + $0x50] sm:$0xff] }
 0x63e   : > { %1796 = vperm.xlu1 %9460, %v1754_v60  }
 0x642   : > { %1801 = vperm.xlu1 %9460, %v1755_v62   ;;  %v2226_v62 = vld [vmem:[#allocation20 + $0x60] sm:$0xff] }
 0x646   : > { %1806 = vperm.xlu1 %9460, %v1756_v49  }
 0x64a   : > { %1811 = vperm.xlu1 %9460, %v1757_v63   ;;  %v2577_v63 = vld [vmem:[#allocation23 + $0x50] sm:$0xff] }
 0x64e   : > { %1816 = vperm.xlu1 %9460, %v1758_v59  }
 0x652   : > { %1821 = vperm.xlu1 %9460, %v1759_v1  }
 0x656   : > { %1826 = vperm.xlu1 %9460, %v1760_v2  }
 0x65a   : > { %1831 = vperm.xlu1 %9460, %v1761_v3  }
 0x65e   : > { %1836 = vperm.xlu1 %9460, %v1762_v4   ;;  %v2467_v4 = vld [vmem:[#allocation22 + $0x60] sm:$0xff] }
 0x662   : > { %2232 = vperm.xlu1 %9460, %v2214_v7  }
 0x666   : > { %2473 = vperm.xlu1 %9460, %v2455_v8  }
 0x66a   : > { %2242 = vperm.xlu1 %9460, %v2216_v9  }
 0x66e   : > { %2585 = vperm.xlu1 %9460, %v2567_v11  }
 0x672   : > { %2483 = vperm.xlu1 %9460, %v2457_v12   ;;  %v2228_v12 = vld [vmem:[#allocation20 + $0x70] sm:$0xff] }
 0x676   : > { %2252 = vperm.xlu1 %9460, %v2218_v13  }
 0x67a   : > { %2595 = vperm.xlu1 %9460, %v2569_v14  }
 0x67e   : > { %2493 = vperm.xlu1 %9460, %v2459_v15  }
 0x682   : > { %2262 = vperm.xlu1 %9460, %v2220_v18  }
 0x686   : > { %2605 = vperm.xlu1 %9460, %v2571_v19  }
 0x68a   : > { %2503 = vperm.xlu1 %9460, %v2461_v21  }
 0x68e   : > { %2272 = vperm.xlu1 %9460, %v2222_v23  }
 0x692   : > { %2615 = vperm.xlu1 %9460, %v2573_v25  }
 0x696   : > { %2513 = vperm.xlu1 %9460, %v2463_v27   ;;  %v1698_v29 = vpop.xlane.xlu1 %1697 }
 0x69a   : > { %2282 = vperm.xlu1 %9460, %v2224_v30   ;;  %v1695_v34 = vpop.xlane.xlu1 %1694 }
 0x69b   : > { %9469 = vrcp.f32 %v1695_v34 }
 0x69c   : > { %9471 = vrcp.f32 %v1698_v29  ;;  %v2469_v29 = vld [vmem:[#allocation22 + $0x70] sm:$0xff] }
 0x69e   : > { %2625 = vperm.xlu1 %9460, %v2575_v32  }
 0x6a2   : > { %2523 = vperm.xlu1 %9460, %v2465_v40   ;;  %v1704_v60 = vpop.xlane.xlu1 %1703 }
 0x6a3   : > { %9473 = vrcp.f32 %v1704_v60 }
 0x6a5   : > { %v9470_v59 = vpop.eup %9469 }
 0x6a6   : > { %2292 = vperm.xlu1 %9460, %v2226_v62   ;;  %v1701_v49 = vpop.xlane.xlu1 %1700  ;;  %v9472_v2 = vpop.eup %9471  ;;  %v1706_v7 = vmul.f32 %v9470_v59, %v10740_v22  ;;  %v2579_v22 = vld [vmem:[#allocation23 + $0x60] sm:$0xff] }
 0x6a7   : > { %9475 = vrcp.f32 %v1701_v49  ;;  %v1708_v9 = vmul.f32 %v9472_v2, %v10736_v16 }
 0x6a8   : > { %v1713_v13 = vsel %vm1668_vm1, %v1706_v7, 0.0 }
 0x6a9   : > { %v1714_v19 = vsel %vm1668_vm1, %v1708_v9, 0.0 }
 0x6aa   : > { %2635 = vperm.xlu1 %9460, %v2577_v63   ;;  %v1767_v1 = vpop.permute.xlu1 %1766  ;;  %v1715_v21 = vadd.f32 %v1714_v19, %v1713_v13 }
 0x6ab   : > { %v1911_v3 = vadd.f32 %v10704_v35, %v1767_v1 }
 0x6ad   : > { %7907 = vmatprep.mubr.msk.f32.mxu1 %vm1668_vm1, %v1911_v3  ;;  %v9474_v11 = vpop.eup %9473 }
 0x6ae   : > { %2533 = vperm.xlu1 %9460, %v2467_v4   ;;  %v1772_v8 = vpop.permute.xlu1 %1771  ;;  %v1712_v15 = vmul.f32 %v9474_v11, %v10744_v24  ;;  %v2581_v24 = vld [vmem:[#allocation23 + $0x70] sm:$0xff] }
 0x6b0   : > { %v1718_v16 = vsel %vm1668_vm1, %v1712_v15, 0.0 }
 0x6b1   : > { %v9476_v14 = vpop.eup %9475 }
 0x6b2   : > { %v1710_v18 = vmul.f32 %v9476_v14, %v10748_v26  ;;  %2302 = vperm.xlu1 %9460, %v2228_v12   ;;  %v1777_v35 = vpop.permute.xlu1 %1776 }
 0x6b4   : > { %v1716_v23 = vsel %vm1668_vm1, %v1710_v18, 0.0 }
 0x6b5   : > { %v1717_v25 = vadd.f32 %v1716_v23, %v1715_v21  ;;  %v1916_v23 = vadd.f32 %v10702_v33, %v1772_v8 }
 0x6b6   : > { %2645 = vperm.xlu1 %9460, %v2579_v22   ;;  %v1782_v27 = vpop.permute.xlu1 %1781 }
 0x6b7   : > { %v1719_v30 = vadd.f32 %v1718_v16, %v1717_v25  ;;  %v1921_v25 = vadd.f32 %v10708_v38, %v1777_v35 }
 0x6b9   : > { %v1720_v32 = vrot.slane %v1719_v30, 4 }
 0x6ba   : > { %2543 = vperm.xlu1 %9460, %v2469_v29   ;;  %v1792_v26 = vpop.permute.xlu1 %1791 }
 0x6bb   : > { %v1721_v34 = vadd.f32 %v1720_v32, %v1719_v30  ;;  %v1936_v16 = vadd.f32 %v10710_v41, %v1792_v26 }
 0x6bd   : > { %v1722_v40 = vrot.slane %v1721_v34, 2 }
 0x6be   : > { %2655 = vperm.xlu1 %9460, %v2581_v24   ;;  %v1797_v49 = vpop.permute.xlu1 %1796 }
 0x6bf   : > { %v1723_v60 = vadd.f32 %v1722_v40, %v1721_v34  ;;  %v1941_v33 = vadd.f32 %v10716_v46, %v1797_v49 }
 0x6c1   : > { %v1724_v62 = vrot.slane %v1723_v60, 1 }
 0x6c2   : > { %v1802_v1 = vpop.permute.xlu1 %1801 }
 0x6c3   : > { %v1725_v63 = vadd.f32 %v1724_v62, %v1723_v60  ;;  %v1946_v38 = vadd.f32 %v10714_v45, %v1802_v1 }
 0x6c5   : > { %v1726_v59 = vadd.f32 1e-09, %v1725_v63 }
 0x6c6   : > { %v1807_v2 = vpop.permute.xlu1 %1806 }
 0x6c7   : > { %9477 = vrcp.f32 %v1726_v59 }
 0x6ca   : > { %v1812_v14 = vpop.permute.xlu1 %1811 }
 0x6ce   : > { %v1817_v21 = vpop.permute.xlu1 %1816 }
 0x6cf   : > { %v1961_v41 = vadd.f32 %v10724_v55, %v1817_v21 }
 0x6d1   : > { %v9478_v3 = vpop.eup %9477 }
 0x6d2   : > { %v1728_v4 = vmul.f32 %v9478_v3, %v1706_v7  ;;  %v1729_v11 = vmul.f32 %v9478_v3, %v1708_v9  ;;  %v1730_v12 = vmul.f32 %v9478_v3, %v1710_v18  ;;  %v1731_v13 = vmul.f32 %v9478_v3, %v1712_v15  ;;  %v1787_v7 = vpop.permute.xlu0 %1786  ;;  %v1822_v15 = vpop.permute.xlu1 %1821 }
 0x6d3   : > { %v1926_v9 = vadd.f32 %v10706_v36, %v1782_v27  ;;  %v1931_v18 = vadd.f32 %v10712_v44, %v1787_v7  ;;  %v1951_v36 = vadd.f32 %v10720_v48, %v1807_v2  ;;  %v1956_v44 = vadd.f32 %v10718_v47, %v1812_v14 }
 0x6d4   : > { %v8829_v19 = vpack.c.bf16 %v1729_v11, %v1728_v4  ;;  %v8833_v22 = vpack.c.bf16 %v1731_v13, %v1730_v12  ;;  %v1966_v46 = vadd.f32 %v10722_v54, %v1822_v15  ;;  %v2182_v54 = vld [vmem:[#allocation19] sm:$0xff] }
 0x6d6   : > { %8830 = vmatprep.subr.bf16.mxu1 %v8829_v19  ;;  %v1827_v8 = vpop.permute.xlu1 %1826  ;;  %v1842_v55 = vpop.permute.xlu0 %1841 }
 0x6d7   : > { %8832 = vmatpush3.bf16.msra.mxu1 %v8829_v19  ;;  %v1971_v27 = vadd.f32 %v10728_v57, %v1827_v8  ;;  %v1986_v29 = vadd.f32 %v10730_v58, %v1842_v55  ;;  %v2188_v55 = vld [vmem:[#allocation19 + $0x30] sm:$0xff] }
 0x6d8   : > { %8834 = vmatprep.subr.bf16.mxu1 %v8833_v22 }
 0x6da   : > { %v1832_v35 = vpop.permute.xlu1 %1831 }
 0x6db   : > { %8836 = vmatpush3.bf16.msra.mxu1 %v8833_v22  ;;  %v1976_v48 = vadd.f32 %v10726_v56, %v1832_v35 }
 0x6de   : > { %7908 = vmatmul.mubr.msk.f32.vlgmr.msra.gmra.mrb[28].mxu1 %vm1668_vm1, %v1916_v23  ;;  %v1837_v45 = vpop.permute.xlu1 %1836 }
 0x6df   : > { %7910 = vmatprep.mubr.msk.f32.mxu1 %vm1668_vm1, %v1921_v25  ;;  %v1981_v47 = vadd.f32 %v10752_v5, %v1837_v45  ;;  %v2185_v45 = vld [vmem:[#allocation19 + $0x18] sm:$0xff] }
 0x6e2   : > { %7911 = vmatmul.mubr.msk.f32.gmra.mrb[30].mxu1 %vm1668_vm1, %v1926_v9 }
 0x6e3   : > { %7913 = vmatprep.mubr.msk.f32.mxu1 %vm1668_vm1, %v1931_v18 }
 0x6e6   : > { %7914 = vmatmul.mubr.msk.f32.gmra.mrb[32].mxu1 %vm1668_vm1, %v1936_v16 }
 0x6e7   : > { %7916 = vmatprep.mubr.msk.f32.mxu1 %vm1668_vm1, %v1941_v33 }
 0x6ea   : > { %7917 = vmatmul.mubr.msk.f32.gmra.mrb[34].mxu1 %vm1668_vm1, %v1946_v38 }
 0x6eb   : > { %7919 = vmatprep.mubr.msk.f32.mxu1 %vm1668_vm1, %v1951_v36 }
 0x6ee   : > { %7920 = vmatmul.mubr.msk.f32.gmra.mrb[36].mxu1 %vm1668_vm1, %v1956_v44 }
 0x6ef   : > { %7922 = vmatprep.mubr.msk.f32.mxu1 %vm1668_vm1, %v1961_v41 }
 0x6f2   : > { %7923 = vmatmul.mubr.msk.f32.gmra.mrb[38].mxu1 %vm1668_vm1, %v1966_v46  ;;  %v2183_v46 = vld [vmem:[#allocation19 + $0x8] sm:$0xff] }
 0x6f3   : > { %7925 = vmatprep.mubr.msk.f32.mxu1 %vm1668_vm1, %v1971_v27  ;;  %v2184_v27 = vld [vmem:[#allocation19 + $0x10] sm:$0xff] }
 0x6f6   : > { %7926 = vmatmul.mubr.msk.f32.gmra.mrb[40].mxu1 %vm1668_vm1, %v1976_v48  ;;  %v2186_v48 = vld [vmem:[#allocation19 + $0x20] sm:$0xff] }
 0x6f7   : > { %7928 = vmatprep.mubr.msk.f32.mxu1 %vm1668_vm1, %v1981_v47  ;;  %v2187_v47 = vld [vmem:[#allocation19 + $0x28] sm:$0xff] }
 0x6fa   : > { %7929 = vmatmul.mubr.msk.f32.gmra.mrb[42].mxu1 %vm1668_vm1, %v1986_v29  ;;  %v2189_v29 = vld [vmem:[#allocation19 + $0x38] sm:$0xff] }
 0x6fb   : > { %7963 = vmatprep.mubr.f32.mxu1 %v2182_v54  ;;  %v2190_v54 = vld [vmem:[#allocation19 + $0x40] sm:$0xff] }
 0x7b1   : > { %v7909_v57 = vpop.f32.mrb[28].mxu1 }
 0x7b2   : > { %v2199_v30 = vsub.f32 %v10607_v39, %v7909_v57  ;;  %v2103_v32 = vpop.f32.mrb[29].mxu1  ;;  %v2191_v57 = vld [vmem:[#allocation19 + $0x48] sm:$0xff] }
 0x7b3   : > { %v2198_v24 = vsub.f32 %v10609_v43, %v2103_v32  ;;  %v2193_v32 = vld [vmem:[#allocation19 + $0x58] sm:$0xff] }
 0x7b5   : > { %v8837_v56 = vpack.c.bf16 %v2199_v30, %v2198_v24  ;;  %v7912_v34 = vpop.f32.mrb[30].mxu1  ;;  %v2192_v30 = vld [vmem:[#allocation19 + $0x50] sm:$0xff]  ;;  %v2194_v24 = vld [vmem:[#allocation19 + $0x60] sm:$0xff] }
 0x7b6   : > { %v2201_v5 = vsub.f32 %v10616_v50, %v7912_v34  ;;  %v2113_v26 = vpop.f32.mrb[31].mxu1  ;;  %v2196_v34 = vld [vmem:[#allocation19 + $0x70] sm:$0xff] }
 0x7b7   : > { %v2200_v40 = vsub.f32 %v10618_v53, %v2113_v26  ;;  %8838 = vmatprep.subr.bf16.mxu1 %v8837_v56  ;;  %v2238_v26 = vpop.permute.xlu0 %2237 }
 0x7b8   : > { %8840 = vmatpush3.bf16.msra.mxu1 %v8837_v56  ;;  %v2195_v56 = vld [vmem:[#allocation19 + $0x68] sm:$0xff] }
 0x7b9   : > { %v8841_v58 = vpack.c.bf16 %v2201_v5, %v2200_v40  ;;  %v7915_v60 = vpop.f32.mrb[32].mxu1  ;;  %v2197_v5 = vld [vmem:[#allocation19 + $0x78] sm:$0xff]  ;;  %v2233_v40 = vpop.permute.xlu1 %2232 }
 0x7ba   : > { %v2203_v62 = vsub.f32 %v10627_v61, %v7915_v60  ;;  %v2123_v49 = vpop.f32.mrb[33].mxu1 }
 0x7bb   : > { %v2202_v63 = vsub.f32 %v10629_v0, %v2123_v49  ;;  %8842 = vmatprep.subr.bf16.mxu1 %v8841_v58 }
 0x7bc   : > { %8844 = vmatpush3.bf16.msra.mxu1 %v8841_v58  ;;  %v2479_v58 = vpop.permute.xlu0 %2478 }
 0x7bd   : > { %v8845_v59 = vpack.c.bf16 %v2203_v62, %v2202_v63  ;;  %v7918_v1 = vpop.f32.mrb[34].mxu1  ;;  %v2474_v60 = vpop.permute.xlu1 %2473 }
 0x7be   : > { %v2205_v2 = vsub.f32 %v10638_v6, %v7918_v1  ;;  %v2133_v3 = vpop.f32.mrb[35].mxu1  ;;  %v2728_v1 = vld [vmem:[#allocation14 + $0x80] sm:$0xff] }
 0x7bf   : > { %v2204_v4 = vsub.f32 %v10640_v10, %v2133_v3  ;;  %8846 = vmatprep.subr.bf16.mxu1 %v8845_v59  ;;  %8019 = vmatprep.mubr.f32.mxu0 %v2728_v1 }
 0x7c0   : > { %8848 = vmatpush3.bf16.msra.mxu1 %v8845_v59  ;;  %v2248_v62 = vpop.permute.xlu0 %2247 }
 0x7c1   : > { %v8849_v11 = vpack.c.bf16 %v2205_v2, %v2204_v4  ;;  %v7921_v12 = vpop.f32.mrb[36].mxu1  ;;  %v2243_v49 = vpop.permute.xlu1 %2242 }
 0x7c2   : > { %v2207_v13 = vsub.f32 %v10649_v17, %v7921_v12  ;;  %v2143_v14 = vpop.f32.mrb[37].mxu1 }
 0x7c3   : > { %v2206_v19 = vsub.f32 %v10651_v20, %v2143_v14  ;;  %8850 = vmatprep.subr.bf16.mxu1 %v8849_v11 }
 0x7c4   : > { %8852 = vmatpush3.bf16.msra.mxu1 %v8849_v11  ;;  %v2591_v63 = vpop.permute.xlu0 %2590 }
 0x7c5   : > { %v8853_v22 = vpack.c.bf16 %v2207_v13, %v2206_v19  ;;  %v7924_v21 = vpop.f32.mrb[38].mxu1  ;;  %v2586_v59 = vpop.permute.xlu1 %2585 }
 0x7c6   : > { %v2209_v23 = vsub.f32 %v10661_v28, %v7924_v21  ;;  %v2153_v25 = vpop.f32.mrb[39].mxu1 }
 0x7c7   : > { %v2208_v7 = vsub.f32 %v10663_v31, %v2153_v25  ;;  %8854 = vmatprep.subr.bf16.mxu1 %v8853_v22 }
 0x7c8   : > { %8856 = vmatpush3.bf16.msra.mxu1 %v8853_v22  ;;  %v2489_v2 = vpop.permute.xlu0 %2488 }
 0x7c9   : > { %v8857_v9 = vpack.c.bf16 %v2209_v23, %v2208_v7  ;;  %v7927_v15 = vpop.f32.mrb[40].mxu1  ;;  %v2484_v3 = vpop.permute.xlu1 %2483 }
 0x7ca   : > { %v2211_v18 = vsub.f32 %v10670_v37, %v7927_v15  ;;  %v2163_v16 = vpop.f32.mrb[41].mxu1 }
 0x7cb   : > { %v2210_v33 = vsub.f32 %v10672_v42, %v2163_v16  ;;  %8858 = vmatprep.subr.bf16.mxu1 %v8857_v9 }
 0x7cc   : > { %8860 = vmatpush3.bf16.msra.mxu1 %v8857_v9  ;;  %v2258_v4 = vpop.permute.xlu0 %2257 }
 0x7cd   : > { %v8861_v8 = vpack.c.bf16 %v2211_v18, %v2210_v33  ;;  %v7930_v38 = vpop.f32.mrb[42].mxu1  ;;  %v2253_v11 = vpop.permute.xlu1 %2252 }
 0x7ce   : > { %v2213_v36 = vsub.f32 %v10677_v51, %v7930_v38  ;;  %v2173_v44 = vpop.f32.mrb[43].mxu1 }
 0x7cf   : > { %v2212_v35 = vsub.f32 %v10679_v52, %v2173_v44  ;;  %8862 = vmatprep.subr.bf16.mxu1 %v8861_v8 }
 0x7d0   : > { %8864 = vmatpush3.bf16.msra.mxu1 %v8861_v8  ;;  %v2601_v12 = vpop.permute.xlu0 %2600 }
 0x7d1   : > { %v8865_v41 = vpack.c.bf16 %v2213_v36, %v2212_v35  ;;  %v2596_v13 = vpop.permute.xlu1 %2595 }
 0x7d3   : > { %8866 = vmatprep.subr.bf16.mxu1 %v8865_v41 }
 0x7d4   : > { %8868 = vmatpush3.bf16.msra.mxu1 %v8865_v41  ;;  %v2499_v14 = vpop.permute.xlu0 %2498 }
 0x7d5   : > { %v2494_v19 = vpop.permute.xlu1 %2493 }
 0x7d7   : > { %7964 = vmatmul.mubr.f32.vlgmr.msra.gmra.mrb[44].mxu1 %v2183_v46 }
 0x7d8   : > { %7966 = vmatprep.mubr.f32.mxu1 %v2184_v27  ;;  %v2268_v22 = vpop.permute.xlu0 %2267 }
 0x7d9   : > { %v10810_v21 = vpop.permute.xlu1 %2262 }
 0x7db   : > { %7967 = vmatmul.mubr.f32.gmra.mrb[46].mxu1 %v2185_v45 }
 0x7dc   : > { %7969 = vmatprep.mubr.f32.mxu1 %v2186_v48  ;;  %v2611_v23 = vpop.permute.xlu0 %2610 }
 0x7dd   : > { %v2606_v25 = vpop.permute.xlu1 %2605 }
 0x7df   : > { %7970 = vmatmul.mubr.f32.gmra.mrb[48].mxu1 %v2187_v47 }
 0x7e0   : > { %7972 = vmatprep.mubr.f32.mxu1 %v2188_v55  ;;  %v10812_v7 = vpop.permute.xlu0 %2508 }
 0x7e1   : > { %v10814_v9 = vpop.permute.xlu1 %2503 }
 0x7e3   : > { %7973 = vmatmul.mubr.f32.gmra.mrb[50].mxu1 %v2189_v29 }
 0x7e4   : > { %7975 = vmatprep.mubr.f32.mxu1 %v2190_v54  ;;  %v10816_v15 = vpop.permute.xlu0 %2277 }
 0x7e5   : > { %v10818_v18 = vpop.permute.xlu1 %2272 }
 0x7e7   : > { %7976 = vmatmul.mubr.f32.gmra.mrb[52].mxu1 %v2191_v57 }
 0x7e8   : > { %7978 = vmatprep.mubr.f32.mxu1 %v2192_v30  ;;  %v10820_v16 = vpop.permute.xlu0 %2620 }
 0x7e9   : > { %v10822_v33 = vpop.permute.xlu1 %2615 }
 0x7eb   : > { %7979 = vmatmul.mubr.f32.gmra.mrb[54].mxu1 %v2193_v32 }
 0x7ec   : > { %7981 = vmatprep.mubr.f32.mxu1 %v2194_v24  ;;  %v10824_v8 = vpop.permute.xlu0 %2518 }
 0x7ed   : > { %v10826_v38 = vpop.permute.xlu1 %2513 }
 0x7ef   : > { %7982 = vmatmul.mubr.f32.gmra.mrb[56].mxu1 %v2195_v56 }
 0x7f0   : > { %7984 = vmatprep.mubr.f32.mxu1 %v2196_v34  ;;  %v10828_v36 = vpop.permute.xlu0 %2287 }
 0x7f1   : > { %v10830_v44 = vpop.permute.xlu1 %2282 }
 0x7f3   : > { %7985 = vmatmul.mubr.f32.gmra.mrb[58].mxu1 %v2197_v5 }
 0x7f4   : > { %v10832_v35 = vpop.permute.xlu0 %2630 }
 0x7f5   : > { %v10834_v41 = vpop.permute.xlu1 %2625 }
 0x7f8   : > { %v10836_v46 = vpop.permute.xlu0 %2528 }
 0x7f9   : > { %v10838_v27 = vpop.permute.xlu1 %2523 }
 0x7fc   : > { %v10840_v45 = vpop.permute.xlu0 %2297 }
 0x7fd   : > { %v10842_v48 = vpop.permute.xlu1 %2292 }
 0x7fe   : > { %12086 = vst [vmem:[#allocation45_spill] sm:$0xff] %v10842_v48 }
 0x800   : > { %v10844_v54 = vpop.permute.xlu0 %2640 }
 0x801   : > { %v10846_v30 = vpop.permute.xlu1 %2635 }
 0x804   : > { %v10849_v31 = vpop.permute.xlu0 %2538 }
 0x805   : > { %v10851_v48 = vpop.permute.xlu1 %2533 }
 0x8aa   : > { %v7965_v47 = vpop.f32.mrb[44].mxu1 }
 0x8ab   : > { %v2382_v55 = vadd.f32 %v7965_v47, %v2238_v26  ;;  %v2376_v29 = vpop.f32.mrb[45].mxu1 }
 0x8ac   : > { %v2377_v57 = vadd.f32 %v2376_v29, %v2233_v40 }
 0x8ad   : > { %v2552_v32 = vmul.f32 %v2479_v58, %v2382_v55 }
 0x8ae   : > { %v2551_v24 = vmul.f32 %v2474_v60, %v2377_v57  ;;  %v7968_v56 = vpop.f32.mrb[46].mxu1 }
 0x8af   : > { %v2664_v34 = vadd.f32 %v2591_v63, %v2552_v32  ;;  %v2392_v5 = vadd.f32 %v7968_v56, %v2248_v62  ;;  %v2386_v1 = vpop.f32.mrb[47].mxu1 }
 0x8b0   : > { %v2663_v52 = vadd.f32 %v2586_v59, %v2551_v24  ;;  %v2387_v51 = vadd.f32 %v2386_v1, %v2243_v49 }
 0x8b1   : > { %v2680_v42 = vmax.f32 %v2664_v34, 0.0  ;;  %v2554_v37 = vmul.f32 %v2489_v2, %v2392_v5 }
 0x8b2   : > { %v2679_v26 = vmax.f32 %v2663_v52, 0.0  ;;  %v2553_v47 = vmul.f32 %v2484_v3, %v2387_v51  ;;  %v7971_v28 = vpop.f32.mrb[48].mxu1 }
 0x8b3   : > { %v10854_v40 = vadd.f32 %v2680_v42, %v10607_v39  ;;  %v2666_v58 = vadd.f32 %v2601_v12, %v2554_v37  ;;  %v2402_v60 = vadd.f32 %v7971_v28, %v2258_v4  ;;  %v2396_v55 = vpop.f32.mrb[49].mxu1  ;;  %v10875_v4 = vpop.permute.xlu0 %2307 }
 0x8b4   : > { %v10857_v62 = vadd.f32 %v2679_v26, %v10609_v43  ;;  %v2665_v63 = vadd.f32 %v2596_v13, %v2553_v47  ;;  %v2397_v49 = vadd.f32 %v2396_v55, %v2253_v11 }
 0x8b5   : > { %2712 = vst.msk [vmem:[%s10859_s30 + $0x8] sm:$0xff] %vm1668_vm1, %v10854_v40  ;;  %v2682_v51 = vmax.f32 %v2666_v58, 0.0  ;;  %v2556_v52 = vmul.f32 %v2499_v14, %v2402_v60  ;;  %v10882_v14 = vpop.permute.xlu1 %2302 }
 0x8b6   : > { %2711 = vst.msk [vmem:[%s10859_s30] sm:$0xff] %vm1668_vm1, %v10857_v62  ;;  %v2681_v39 = vmax.f32 %v2665_v63, 0.0  ;;  %v2555_v28 = vmul.f32 %v2494_v19, %v2397_v49  ;;  %v7974_v37 = vpop.f32.mrb[50].mxu1  ;;  %2889 = vxpose.xlu1.b32.start [1/16] (narrow) %v10857_v62, 32  ;;  %v10870_v43 = vpack.c.bf16 %v10854_v40, %v10857_v62 }
 0x8b7   : > { %v10873_v42 = vadd.f32 %v2682_v51, %v10616_v50  ;;  %v2668_v59 = vadd.f32 %v2611_v23, %v2556_v52  ;;  %v2412_v2 = vadd.f32 %v7974_v37, %v2268_v22  ;;  %v2406_v3 = vpop.f32.mrb[51].mxu1  ;;  %v12087_v52 = vld [vmem:[#allocation45_spill] sm:$0xff] }
 0x8b8   : > { %v10878_v11 = vadd.f32 %v2681_v39, %v10618_v53  ;;  %v2667_v12 = vadd.f32 %v2606_v25, %v2555_v28  ;;  %v2407_v13 = vadd.f32 %v2406_v3, %v10810_v21  ;;  %8870 = vmatprep.subr.bf16.mxu0 %v10870_v43 }
 0x8b9   : > { %2714 = vst.msk [vmem:[%s10859_s30 + $0x18] sm:$0xff] %vm1668_vm1, %v10873_v42  ;;  %v2684_v50 = vmax.f32 %v2668_v59, 0.0  ;;  %v2558_v19 = vmul.f32 %v10812_v7, %v2412_v2  ;;  %8872 = vmatpush3.bf16.msra.mxu0 %v10870_v43  ;;  %v2646_v34 = vpop.permute.xlu1 %2645  ;;  %v12088_v59 = vld [vmem:[#allocation39_spill] sm:$0xff] }
 0x8ba   : > { %2713 = vst.msk [vmem:[%s10859_s30 + $0x10] sm:$0xff] %vm1668_vm1, %v10878_v11  ;;  %v2683_v53 = vmax.f32 %v2667_v12, 0.0  ;;  %v2557_v22 = vmul.f32 %v10814_v9, %v2407_v13  ;;  %v7977_v21 = vpop.f32.mrb[52].mxu1  ;;  %2890 = vxpose.xlu1.b32.cont [2/16] (narrow) %v10854_v40, 32  ;;  %v10896_v23 = vpack.c.bf16 %v10873_v42, %v10878_v11  ;;  %v12090_v13 = vld [vmem:[#allocation40_spill] sm:$0xff] }
 0x8bb   : > { %v10899_v25 = vadd.f32 %v2684_v50, %v10627_v61  ;;  %v2670_v7 = vadd.f32 %v10820_v16, %v2558_v19  ;;  %v2422_v29 = vadd.f32 %v7977_v21, %v10816_v15  ;;  %v2416_v57 = vpop.f32.mrb[53].mxu1  ;;  %v2651_v16 = vpop.permute.xlu0 %2650 }
 0x8bc   : > { %v10904_v32 = vadd.f32 %v2683_v53, %v10629_v0  ;;  %v2669_v9 = vadd.f32 %v10822_v33, %v2557_v22  ;;  %v2417_v24 = vadd.f32 %v2416_v57, %v10818_v18  ;;  %8874 = vmatprep.subr.bf16.mxu0 %v10896_v23  ;;  %v12092_v57 = vld [vmem:[#allocation41_spill] sm:$0xff] }
 0x8bd   : > { %2716 = vst.msk [vmem:[%s10859_s30 + $0x28] sm:$0xff] %vm1668_vm1, %v10899_v25  ;;  %v2686_v56 = vmax.f32 %v2670_v7, 0.0  ;;  %v2560_v61 = vmul.f32 %v10824_v8, %v2422_v29  ;;  %8876 = vmatpush3.bf16.msra.mxu0 %v10896_v23  ;;  %v2544_v28 = vpop.permute.xlu1 %2543 }
 0x8be   : > { %2715 = vst.msk [vmem:[%s10859_s30 + $0x20] sm:$0xff] %vm1668_vm1, %v10904_v32  ;;  %v2685_v0 = vmax.f32 %v2669_v9, 0.0  ;;  %v2559_v15 = vmul.f32 %v10826_v38, %v2417_v24  ;;  %v7980_v33 = vpop.f32.mrb[54].mxu1  ;;  %2891 = vxpose.xlu1.b32.cont [3/16] (narrow) %v10878_v11, 32  ;;  %v10921_v18 = vpack.c.bf16 %v10899_v25, %v10904_v32 }
 0x8bf   : > { %v10924_v8 = vadd.f32 %v2686_v56, %v10638_v6  ;;  %v2672_v5 = vadd.f32 %v10832_v35, %v2560_v61  ;;  %v2432_v1 = vadd.f32 %v7980_v33, %v10828_v36  ;;  %v2426_v26 = vpop.f32.mrb[55].mxu1  ;;  %v2549_v49 = vpop.permute.xlu0 %2548  ;;  %v12094_v56 = vld [vmem:[#allocation42_spill] sm:$0xff] }
 0x8c0   : > { %v10929_v47 = vadd.f32 %v2685_v0, %v10640_v10  ;;  %v2671_v38 = vadd.f32 %v10834_v41, %v2559_v15  ;;  %v2427_v58 = vadd.f32 %v2426_v26, %v10830_v44  ;;  %8878 = vmatprep.subr.bf16.mxu0 %v10921_v18 }
 0x8c1   : > { %2718 = vst.msk [vmem:[%s10859_s30 + $0x38] sm:$0xff] %vm1668_vm1, %v10924_v8  ;;  %v2688_v60 = vmax.f32 %v2672_v5, 0.0  ;;  %v2562_v6 = vmul.f32 %v10836_v46, %v2432_v1  ;;  %8880 = vmatpush3.bf16.msra.mxu0 %v10921_v18  ;;  %v2656_v29 = vpop.permute.xlu1 %2655  ;;  %v12098_v1 = vld [vmem:[#allocation44_spill] sm:$0xff] }
 0x8c2   : > { %2717 = vst.msk [vmem:[%s10859_s30 + $0x30] sm:$0xff] %vm1668_vm1, %v10929_v47  ;;  %v2687_v10 = vmax.f32 %v2671_v38, 0.0  ;;  %v2561_v36 = vmul.f32 %v10838_v27, %v2427_v58  ;;  %v7983_v35 = vpop.f32.mrb[56].mxu1  ;;  %2892 = vxpose.xlu1.b32.cont [4/16] (narrow) %v10873_v42, 32  ;;  %v10946_v44 = vpack.c.bf16 %v10924_v8, %v10929_v47  ;;  %v2729_v58 = vld [vmem:[#allocation14 + $0x88] sm:$0xff] }
 0x8c3   : > { %v10949_v41 = vadd.f32 %v2688_v60, %v10649_v17  ;;  %v2674_v46 = vadd.f32 %v10844_v54, %v2562_v6  ;;  %v2442_v55 = vadd.f32 %v7983_v35, %v10840_v45  ;;  %v2436_v63 = vpop.f32.mrb[57].mxu1  ;;  %v2661_v21 = vpop.permute.xlu0 %2660  ;;  %v2730_v60 = vld [vmem:[#allocation14 + $0x90] sm:$0xff]  ;;  %v2731_v6 = vld [vmem:[#allocation14 + $0x98] sm:$0xff] }
 0x8c4   : > { %v10954_v51 = vadd.f32 %v2687_v10, %v10651_v20  ;;  %v2673_v27 = vadd.f32 %v10846_v30, %v2561_v36  ;;  %v2437_v39 = vadd.f32 %v2436_v63, %v12087_v52  ;;  %8882 = vmatprep.subr.bf16.mxu0 %v10946_v44  ;;  %v2732_v10 = vld [vmem:[#allocation14 + $0xa0] sm:$0xff]  ;;  %v2733_v36 = vld [vmem:[#allocation14 + $0xa8] sm:$0xff]  ;;  %v2734_v35 = vld [vmem:[#allocation14 + $0xb0] sm:$0xff] }
 0x8c5   : > { %2720 = vst.msk [vmem:[%s10859_s30 + $0x48] sm:$0xff] %vm1668_vm1, %v10949_v41  ;;  %v2690_v17 = vmax.f32 %v2674_v46, 0.0  ;;  %v2564_v54 = vmul.f32 %v10849_v31, %v2442_v55  ;;  %8884 = vmatpush3.bf16.msra.mxu0 %v10946_v44  ;;  %v2736_v46 = vld [vmem:[#allocation14 + $0xc0] sm:$0xff]  ;;  %v2738_v55 = vld [vmem:[#allocation14 + $0xd0] sm:$0xff] }
 0x8c6   : > { %2719 = vst.msk [vmem:[%s10859_s30 + $0x40] sm:$0xff] %vm1668_vm1, %v10954_v51  ;;  %v2689_v20 = vmax.f32 %v2673_v27, 0.0  ;;  %v2563_v45 = vmul.f32 %v10851_v48, %v2437_v39  ;;  %v7986_v30 = vpop.f32.mrb[58].mxu1  ;;  %2893 = vxpose.xlu1.b32.cont [5/16] (narrow) %v10904_v32, 32  ;;  %v10971_v37 = vpack.c.bf16 %v10949_v41, %v10954_v51  ;;  %v2740_v63 = vld [vmem:[#allocation14 + $0xe0] sm:$0xff]  ;;  %v2743_v27 = vld [vmem:[#allocation14 + $0xf8] sm:$0xff] }
 0x8c7   : > { %v10974_v2 = vadd.f32 %v2690_v17, %v12088_v59  ;;  %v2676_v31 = vadd.f32 %v2651_v16, %v2564_v54  ;;  %v2452_v3 = vadd.f32 %v7986_v30, %v10875_v4  ;;  %v2446_v12 = vpop.f32.mrb[59].mxu1  ;;  %v3070_v52 = vld [vmem:[#allocation16 + $0x80] sm:$0xff]  ;;  %v3071_v39 = vld [vmem:[#allocation16 + $0x88] sm:$0xff]  ;;  %v3073_v17 = vld [vmem:[#allocation16 + $0x98] sm:$0xff] }
 0x8c8   : > { %v10978_v50 = vadd.f32 %v2689_v20, %v12090_v13  ;;  %v2675_v19 = vadd.f32 %v2646_v34, %v2563_v45  ;;  %v2447_v48 = vadd.f32 %v2446_v12, %v10882_v14  ;;  %8886 = vmatprep.subr.bf16.mxu0 %v10971_v37  ;;  %v12096_v34 = vld [vmem:[#allocation43_spill] sm:$0xff]  ;;  %v3075_v20 = vld [vmem:[#allocation16 + $0xa8] sm:$0xff]  ;;  %v3076_v45 = vld [vmem:[#allocation16 + $0xb0] sm:$0xff] }
 0x8c9   : > { %12089 = vst [vmem:[#allocation45_spill] sm:$0xff] %v10974_v2  ;;  %2722 = vst.msk [vmem:[%s10859_s30 + $0x58] sm:$0xff] %vm1668_vm1, %v10974_v2  ;;  %v2692_v53 = vmax.f32 %v2676_v31, 0.0  ;;  %v2566_v22 = vmul.f32 %v2549_v49, %v2452_v3  ;;  %8888 = vmatpush3.bf16.msra.mxu0 %v10971_v37  ;;  %v2742_v49 = vld [vmem:[#allocation14 + $0xf0] sm:$0xff]  ;;  %v3074_v54 = vld [vmem:[#allocation16 + $0xa0] sm:$0xff] }
 0x8ca   : > { %12091 = vst [vmem:[#allocation39_spill] sm:$0xff] %v10978_v50  ;;  %2721 = vst.msk [vmem:[%s10859_s30 + $0x50] sm:$0xff] %vm1668_vm1, %v10978_v50  ;;  %v2691_v4 = vmax.f32 %v2675_v19, 0.0  ;;  %v2565_v7 = vmul.f32 %v2544_v28, %v2447_v48  ;;  %2894 = vxpose.xlu1.b32.cont [6/16] (narrow) %v10899_v25, 32  ;;  %v10992_v14 = vpack.c.bf16 %v10974_v2, %v10978_v50  ;;  %v3072_v28 = vld [vmem:[#allocation16 + $0x90] sm:$0xff]  ;;  %v3077_v30 = vld [vmem:[#allocation16 + $0xb8] sm:$0xff] }
 0x8cb   : > { %v10995_v9 = vadd.f32 %v2692_v53, %v12092_v57  ;;  %v2678_v24 = vadd.f32 %v2661_v21, %v2566_v22  ;;  %v3079_v59 = vld [vmem:[#allocation16 + $0xc8] sm:$0xff]  ;;  %v3080_v31 = vld [vmem:[#allocation16 + $0xd0] sm:$0xff]  ;;  %v3081_v3 = vld [vmem:[#allocation16 + $0xd8] sm:$0xff] }
 0x8cc   : > { %v10998_v61 = vadd.f32 %v2691_v4, %v12094_v56  ;;  %v2677_v16 = vadd.f32 %v2656_v29, %v2565_v7  ;;  %8890 = vmatprep.subr.bf16.mxu0 %v10992_v14  ;;  %v3082_v12 = vld [vmem:[#allocation16 + $0xe0] sm:$0xff]  ;;  %v3093_v13 = vld [vmem:[#allocation17 + $0xb0] sm:$0xff]  ;;  %v3083_v19 = vld [vmem:[#allocation16 + $0xe8] sm:$0xff] }
 0x8cd   : > { %12093 = vst [vmem:[#allocation40_spill] sm:$0xff] %v10995_v9  ;;  %2724 = vst.msk [vmem:[%s10859_s30 + $0x68] sm:$0xff] %vm1668_vm1, %v10995_v9  ;;  %v2694_v0 = vmax.f32 %v2678_v24, 0.0  ;;  %8892 = vmatpush3.bf16.msra.mxu0 %v10992_v14  ;;  %v3084_v48 = vld [vmem:[#allocation16 + $0xf0] sm:$0xff]  ;;  %v3102_v53 = vld [vmem:[#allocation17 + $0xf8] sm:$0xff] }
 0x8ce   : > { %12095 = vst [vmem:[#allocation41_spill] sm:$0xff] %v10998_v61  ;;  %2723 = vst.msk [vmem:[%s10859_s30 + $0x60] sm:$0xff] %vm1668_vm1, %v10998_v61  ;;  %v2693_v15 = vmax.f32 %v2677_v16, 0.0  ;;  %2895 = vxpose.xlu1.b32.cont [7/16] (narrow) %v10929_v47, 32  ;;  %v8893_v33 = vpack.c.bf16 %v10995_v9, %v10998_v61  ;;  %v3085_v22 = vld [vmem:[#allocation16 + $0xf8] sm:$0xff]  ;;  %v3556_v21 = vld [vmem:[#allocation20 + $0x88] sm:$0xff] }
 0x8cf   : > { %v11012_v5 = vadd.f32 %v2694_v0, %v12096_v34  ;;  %v3798_v4 = vld [vmem:[#allocation22 + $0x88] sm:$0xff]  ;;  %v3558_v7 = vld [vmem:[#allocation20 + $0x98] sm:$0xff] }
 0x8d0   : > { %v11015_v26 = vadd.f32 %v2693_v15, %v12098_v1  ;;  %8894 = vmatprep.subr.bf16.mxu0 %v8893_v33  ;;  %v3800_v29 = vld [vmem:[#allocation22 + $0x98] sm:$0xff]  ;;  %v3560_v57 = vld [vmem:[#allocation20 + $0xa8] sm:$0xff] }
 0x8d1   : > { %12097 = vst [vmem:[#allocation42_spill] sm:$0xff] %v11012_v5  ;;  %2726 = vst.msk [vmem:[%s10859_s30 + $0x78] sm:$0xff] %vm1668_vm1, %v11012_v5  ;;  %8896 = vmatpush3.bf16.msra.mxu0 %v8893_v33  ;;  %v3913_v24 = vld [vmem:[#allocation23 + $0x98] sm:$0xff]  ;;  %v3802_v56 = vld [vmem:[#allocation22 + $0xa8] sm:$0xff] }
 0x8d2   : > { %12099 = vst [vmem:[#allocation43_spill] sm:$0xff] %v11015_v26  ;;  %2725 = vst.msk [vmem:[%s10859_s30 + $0x70] sm:$0xff] %vm1668_vm1, %v11015_v26  ;;  %2896 = vxpose.xlu1.b32.cont [8/16] (narrow) %v10924_v8, 32  ;;  %v8897_v38 = vpack.c.bf16 %v11012_v5, %v11015_v26  ;;  %v3562_v16 = vld [vmem:[#allocation20 + $0xb8] sm:$0xff]  ;;  %v3915_v15 = vld [vmem:[#allocation23 + $0xa8] sm:$0xff] }
 0x8d3   : > { %v3564_v34 = vld [vmem:[#allocation20 + $0xc8] sm:$0xff]  ;;  %v3917_v1 = vld [vmem:[#allocation23 + $0xb8] sm:$0xff] }
 0x8d4   : > { %8898 = vmatprep.subr.bf16.mxu0 %v8897_v38 }
 0x8d5   : > { %8900 = vmatpush3.bf16.msra.mxu0 %v8897_v38 }
 0x8d6   : > { %2897 = vxpose.xlu1.b32.cont [9/16] (narrow) %v10954_v51, 32  ;;  %8934 = vmatprep.subr.bf16.mxu0 %v10870_v43 }
 0x8d8   : > { %8020 = vmatmul.mubr.f32.vlgmr.msra.gmra.mrb[32].mxu0 %v2729_v58  ;;  %v3566_v58 = vld [vmem:[#allocation20 + $0xd8] sm:$0xff] }
 0x8d9   : > { %8936 = vmatpush3.bf16.msra.mxu0 %v10870_v43  ;;  %8022 = vmatprep.mubr.f32.mxu0 %v2730_v60  ;;  %v2735_v43 = vld [vmem:[#allocation14 + $0xb8] sm:$0xff]  ;;  %v3919_v60 = vld [vmem:[#allocation23 + $0xc8] sm:$0xff] }
 0x8da   : > { %2898 = vxpose.xlu1.b32.cont [10/16] (narrow) %v10949_v41, 32  ;;  %8938 = vmatprep.subr.bf16.mxu0 %v10896_v23 }
 0x8dc   : > { %8023 = vmatmul.mubr.f32.gmra.mrb[34].mxu0 %v2731_v6  ;;  %v3808_v6 = vld [vmem:[#allocation22 + $0xd8] sm:$0xff] }
 0x8dd   : > { %8940 = vmatpush3.bf16.msra.mxu0 %v10896_v23  ;;  %8025 = vmatprep.mubr.f32.mxu0 %v2732_v10  ;;  %v2737_v23 = vld [vmem:[#allocation14 + $0xc8] sm:$0xff] }
 0x8de   : > { %2899 = vxpose.xlu1.b32.cont [11/16] (narrow) %v10978_v50, 32  ;;  %8942 = vmatprep.subr.bf16.mxu0 %v10921_v18  ;;  %v3568_v10 = vld [vmem:[#allocation20 + $0xe8] sm:$0xff] }
 0x8e0   : > { %8026 = vmatmul.mubr.f32.gmra.mrb[36].mxu0 %v2733_v36  ;;  %v3921_v36 = vld [vmem:[#allocation23 + $0xd8] sm:$0xff] }
 0x8e1   : > { %8944 = vmatpush3.bf16.msra.mxu0 %v10921_v18  ;;  %8028 = vmatprep.mubr.f32.mxu0 %v2734_v35  ;;  %v2739_v18 = vld [vmem:[#allocation14 + $0xd8] sm:$0xff]  ;;  %v3810_v35 = vld [vmem:[#allocation22 + $0xe8] sm:$0xff] }
 0x8e2   : > { %2900 = vxpose.xlu1.b32.cont [12/16] (narrow) %v10974_v2, 32  ;;  %8946 = vmatprep.subr.bf16.mxu0 %v10946_v44 }
 0x8e4   : > { %8029 = vmatmul.mubr.f32.gmra.mrb[38].mxu0 %v2735_v43  ;;  %v3570_v43 = vld [vmem:[#allocation20 + $0xf8] sm:$0xff] }
 0x8e5   : > { %8948 = vmatpush3.bf16.msra.mxu0 %v10946_v44  ;;  %8031 = vmatprep.mubr.f32.mxu0 %v2736_v46  ;;  %v2741_v44 = vld [vmem:[#allocation14 + $0xe8] sm:$0xff] }
 0x8e6   : > { %2901 = vxpose.xlu1.b32.cont [13/16] (narrow) %v10998_v61, 32  ;;  %8950 = vmatprep.subr.bf16.mxu0 %v10971_v37  ;;  %v3923_v46 = vld [vmem:[#allocation23 + $0xe8] sm:$0xff] }
 0x8e8   : > { %8032 = vmatmul.mubr.f32.gmra.mrb[40].mxu0 %v2737_v23  ;;  %v3812_v23 = vld [vmem:[#allocation22 + $0xf8] sm:$0xff] }
 0x8e9   : > { %8952 = vmatpush3.bf16.msra.mxu0 %v10971_v37  ;;  %8034 = vmatprep.mubr.f32.mxu0 %v2738_v55  ;;  %v3078_v37 = vld [vmem:[#allocation16 + $0xc0] sm:$0xff]  ;;  %v3925_v55 = vld [vmem:[#allocation23 + $0xf8] sm:$0xff] }
 0x8ea   : > { %2902 = vxpose.xlu1.b32.cont [14/16] (narrow) %v10995_v9, 32  ;;  %8954 = vmatprep.subr.bf16.mxu0 %v10992_v14 }
 0x8ec   : > { %8035 = vmatmul.mubr.f32.gmra.mrb[42].mxu0 %v2739_v18 }
 0x8ed   : > { %8956 = vmatpush3.bf16.msra.mxu0 %v10992_v14  ;;  %8037 = vmatprep.mubr.f32.mxu0 %v2740_v63  ;;  %v3911_v14 = vld [vmem:[#allocation23 + $0x88] sm:$0xff] }
 0x8ee   : > { %2903 = vxpose.xlu1.b32.cont [15/16] (narrow) %v11015_v26, 32  ;;  %8958 = vmatprep.subr.bf16.mxu0 %v8893_v33 }
 0x8f0   : > { %8038 = vmatmul.mubr.f32.gmra.mrb[44].mxu0 %v2741_v44 }
 0x8f1   : > { %8960 = vmatpush3.bf16.msra.mxu0 %v8893_v33  ;;  %8040 = vmatprep.mubr.f32.mxu0 %v2742_v49  ;;  %v3804_v33 = vld [vmem:[#allocation22 + $0xb8] sm:$0xff] }
 0x8f2   : > { %2904 = vxpose.xlu1.b32.end [16/16] (narrow) %v11012_v5, 32  ;;  %8962 = vmatprep.subr.bf16.mxu0 %v8897_v38 }
 0x8f4   : > { %8041 = vmatmul.mubr.f32.gmra.mrb[46].mxu0 %v2743_v27 }
 0x8f5   : > { %8964 = vmatpush3.bf16.msra.mxu0 %v8897_v38  ;;  %8113 = vmatprep.mubr.f32.mxu0 %v3070_v52  ;;  %v3806_v38 = vld [vmem:[#allocation22 + $0xc8] sm:$0xff] }
 0x8f8   : > { %8114 = vmatmul.mubr.f32.vlgmr.msra.gmra.mrb[48].mxu0 %v3071_v39 }
 0x8f9   : > { %8116 = vmatprep.mubr.f32.mxu0 %v3072_v28 }
 0x8fc   : > { %8117 = vmatmul.mubr.f32.gmra.mrb[50].mxu0 %v3073_v17 }
 0x8fd   : > { %8119 = vmatprep.mubr.f32.mxu0 %v3074_v54 }
 0x900   : > { %8120 = vmatmul.mubr.f32.gmra.mrb[52].mxu0 %v3075_v20 }
 0x901   : > { %8122 = vmatprep.mubr.f32.mxu0 %v3076_v45 }
 0x904   : > { %8123 = vmatmul.mubr.f32.gmra.mrb[54].mxu0 %v3077_v30 }
 0x905   : > { %8125 = vmatprep.mubr.f32.mxu0 %v3078_v37 }
 0x908   : > { %8126 = vmatmul.mubr.f32.gmra.mrb[56].mxu0 %v3079_v59 }
 0x909   : > { %8128 = vmatprep.mubr.f32.mxu0 %v3080_v31 }
 0x90c   : > { %8129 = vmatmul.mubr.f32.gmra.mrb[58].mxu0 %v3081_v3 }
 0x90d   : > { %8131 = vmatprep.mubr.f32.mxu0 %v3082_v12 }
 0x910   : > { %3135 = vperm.xlu1 %9460, %v3093_v13   ;;  %8132 = vmatmul.mubr.f32.gmra.mrb[60].mxu0 %v3083_v19 }
 0x911   : > { %8134 = vmatprep.mubr.f32.mxu0 %v3084_v48 }
 0x914   : > { %3180 = vperm.xlu1 %9460, %v3102_v53   ;;  %8135 = vmatmul.mubr.f32.gmra.mrb[62].mxu0 %v3085_v22 }
 0x918   : > { %3578 = vperm.xlu1 %9460, %v3556_v21  }
 0x91c   : > { %3820 = vperm.xlu1 %9460, %v3798_v4  }
 0x920   : > { %3588 = vperm.xlu1 %9460, %v3558_v7  }
 0x924   : > { %3933 = vperm.xlu1 %9460, %v3911_v14  }
 0x928   : > { %3830 = vperm.xlu1 %9460, %v3800_v29  }
 0x92c   : > { %3598 = vperm.xlu1 %9460, %v3560_v57  }
 0x930   : > { %3943 = vperm.xlu1 %9460, %v3913_v24  }
 0x934   : > { %3840 = vperm.xlu1 %9460, %v3802_v56  }
 0x936   : > { %v2905_v0 = vpop.trf.xlu1 }
 0x937   : > { %8075 = vmatprep.mubr.f32.mxu1 %v2905_v0 }
 0x938   : > { %3608 = vperm.xlu1 %9460, %v3562_v16  }
 0x93a   : > { %v2906_v53 = vpop.trf.xlu1 }
 0x93c   : > { %3953 = vperm.xlu1 %9460, %v3915_v15  }
 0x93e   : > { %v2907_v14 = vpop.trf.xlu1 }
 0x940   : > { %3850 = vperm.xlu1 %9460, %v3804_v33  }
 0x942   : > { %v2908_v56 = vpop.trf.xlu1 }
 0x944   : > { %3618 = vperm.xlu1 %9460, %v3564_v34  }
 0x948   : > { %3963 = vperm.xlu1 %9460, %v3917_v1  }
 0x94c   : > { %3860 = vperm.xlu1 %9460, %v3806_v38  }
 0x950   : > { %3628 = vperm.xlu1 %9460, %v3566_v58  }
 0x954   : > { %3973 = vperm.xlu1 %9460, %v3919_v60  }
 0x958   : > { %3870 = vperm.xlu1 %9460, %v3808_v6  }
 0x95c   : > { %3638 = vperm.xlu1 %9460, %v3568_v10  }
 0x960   : > { %3983 = vperm.xlu1 %9460, %v3921_v36  }
 0x964   : > { %3880 = vperm.xlu1 %9460, %v3810_v35  }
 0x968   : > { %3648 = vperm.xlu1 %9460, %v3570_v43  }
 0x96c   : > { %3993 = vperm.xlu1 %9460, %v3923_v46  }
 0x970   : > { %3890 = vperm.xlu1 %9460, %v3812_v23  }
 0x974   : > { %4003 = vperm.xlu1 %9460, %v3925_v55  }
 0x9ab   : > { %v8021_v18 = vpop.f32.mrb[32].mxu0 }
 0x9ac   : > { %v2810_v63 = vpop.f32.mrb[33].mxu0 }
 0x9ad   : > { %v8901_v44 = vpack.c.bf16 %v8021_v18, %v2810_v63 }
 0x9af   : > { %v8024_v49 = vpop.f32.mrb[34].mxu0  ;;  %8902 = vmatprep.subr.bf16.mxu1 %v8901_v44 }
 0x9b0   : > { %v2820_v27 = vpop.f32.mrb[35].mxu0  ;;  %8904 = vmatpush3.bf16.msra.mxu1 %v8901_v44 }
 0x9b1   : > { %v8905_v52 = vpack.c.bf16 %v8024_v49, %v2820_v27 }
 0x9b3   : > { %v8027_v39 = vpop.f32.mrb[36].mxu0  ;;  %8906 = vmatprep.subr.bf16.mxu1 %v8905_v52 }
 0x9b4   : > { %v2830_v28 = vpop.f32.mrb[37].mxu0  ;;  %8908 = vmatpush3.bf16.msra.mxu1 %v8905_v52 }
 0x9b5   : > { %v8909_v17 = vpack.c.bf16 %v8027_v39, %v2830_v28 }
 0x9b7   : > { %v8030_v54 = vpop.f32.mrb[38].mxu0  ;;  %8910 = vmatprep.subr.bf16.mxu1 %v8909_v17 }
 0x9b8   : > { %v2840_v20 = vpop.f32.mrb[39].mxu0  ;;  %8912 = vmatpush3.bf16.msra.mxu1 %v8909_v17 }
 0x9b9   : > { %v8913_v45 = vpack.c.bf16 %v8030_v54, %v2840_v20 }
 0x9bb   : > { %v8033_v30 = vpop.f32.mrb[40].mxu0  ;;  %8914 = vmatprep.subr.bf16.mxu1 %v8913_v45 }
 0x9bc   : > { %v2850_v37 = vpop.f32.mrb[41].mxu0  ;;  %8916 = vmatpush3.bf16.msra.mxu1 %v8913_v45 }
 0x9bd   : > { %v8917_v59 = vpack.c.bf16 %v8033_v30, %v2850_v37 }
 0x9bf   : > { %v8036_v31 = vpop.f32.mrb[42].mxu0  ;;  %8918 = vmatprep.subr.bf16.mxu1 %v8917_v59 }
 0x9c0   : > { %v2860_v3 = vpop.f32.mrb[43].mxu0  ;;  %8920 = vmatpush3.bf16.msra.mxu1 %v8917_v59 }
 0x9c1   : > { %v8921_v12 = vpack.c.bf16 %v8036_v31, %v2860_v3 }
 0x9c3   : > { %v8039_v13 = vpop.f32.mrb[44].mxu0  ;;  %8922 = vmatprep.subr.bf16.mxu1 %v8921_v12 }
 0x9c4   : > { %v2870_v19 = vpop.f32.mrb[45].mxu0  ;;  %8924 = vmatpush3.bf16.msra.mxu1 %v8921_v12 }
 0x9c5   : > { %v8925_v48 = vpack.c.bf16 %v8039_v13, %v2870_v19 }
 0x9c7   : > { %v8042_v22 = vpop.f32.mrb[46].mxu0  ;;  %8926 = vmatprep.subr.bf16.mxu1 %v8925_v48 }
 0x9c8   : > { %v2880_v21 = vpop.f32.mrb[47].mxu0  ;;  %8928 = vmatpush3.bf16.msra.mxu1 %v8925_v48 }
 0x9c9   : > { %v8929_v4 = vpack.c.bf16 %v8042_v22, %v2880_v21  ;;  %v3087_v22 = vld [vmem:[#allocation17 + $0x80] sm:$0xff]  ;;  %v3088_v21 = vld [vmem:[#allocation17 + $0x88] sm:$0xff] }
 0x9cb   : > { %8930 = vmatprep.subr.bf16.mxu1 %v8929_v4  ;;  %v11046_v7 = vpop.f32.mrb[48].mxu0 }
 0x9cc   : > { %8932 = vmatpush3.bf16.msra.mxu1 %v8929_v4  ;;  %v11048_v29 = vpop.f32.mrb[49].mxu0  ;;  %v3089_v4 = vld [vmem:[#allocation17 + $0x90] sm:$0xff] }
 0x9cf   : > { %8076 = vmatmul.mubr.f32.vlgmr.msra.gmra.mrb[60].mxu1 %v2906_v53  ;;  %v11050_v57 = vpop.f32.mrb[50].mxu0 }
 0x9d0   : > { %8078 = vmatprep.mubr.f32.mxu1 %v2907_v14  ;;  %v11052_v24 = vpop.f32.mrb[51].mxu0  ;;  %v3090_v14 = vld [vmem:[#allocation17 + $0x98] sm:$0xff] }
 0x9d3   : > { %8079 = vmatmul.mubr.f32.gmra.mrb[62].mxu1 %v2908_v56  ;;  %v11054_v16 = vpop.f32.mrb[52].mxu0  ;;  %v3091_v56 = vld [vmem:[#allocation17 + $0xa0] sm:$0xff] }
 0x9d4   : > { %v11056_v0 = vpop.f32.mrb[53].mxu0 }
 0x9d7   : > { %v11058_v15 = vpop.f32.mrb[54].mxu0 }
 0x9d8   : > { %v11060_v33 = vpop.f32.mrb[55].mxu0 }
 0x9db   : > { %v11062_v34 = vpop.f32.mrb[56].mxu0 }
 0x9dc   : > { %v11064_v1 = vpop.f32.mrb[57].mxu0 }
 0x9df   : > { %v11066_v38 = vpop.f32.mrb[58].mxu0 }
 0x9e0   : > { %v11068_v58 = vpop.f32.mrb[59].mxu0 }
 0x9e3   : > { %v11070_v60 = vpop.f32.mrb[60].mxu0 }
 0x9e4   : > { %v11072_v6 = vpop.f32.mrb[61].mxu0 }
 0x9e7   : > { %v11074_v10 = vpop.f32.mrb[62].mxu0 }
 0xaa2   : > { %v8077_v36 = vpop.f32.mrb[60].mxu1 }
 0xaa3   : > { %v2987_v35 = vpop.f32.mrb[61].mxu1  ;;  %v3009_v43 = vsel %vm1668_vm1, %v8077_v36, -inf }
 0xaa4   : > { %3010 = vmax.xlane.f32.xlu0 %v3009_v43  ;;  %v3006_v23 = vsel %vm1668_vm1, %v2987_v35, -inf  ;;  %v3095_v43 = vld [vmem:[#allocation17 + $0xc0] sm:$0xff] }
 0xaa6   : > { %v8080_v46 = vpop.f32.mrb[62].mxu1 }
 0xaa7   : > { %v2997_v55 = vpop.f32.mrb[63].mxu1  ;;  %v3015_v63 = vsel %vm1668_vm1, %v8080_v46, -inf }
 0xaa8   : > { %3007 = vmax.xlane.f32.xlu0 %v3006_v23  ;;  %v3012_v18 = vsel %vm1668_vm1, %v2997_v55, -inf  ;;  %v3097_v23 = vld [vmem:[#allocation17 + $0xd0] sm:$0xff] }
 0xaac   : > { %3013 = vmax.xlane.f32.xlu0 %v3012_v18  ;;  %v3099_v18 = vld [vmem:[#allocation17 + $0xe0] sm:$0xff] }
 0xab0   : > { %3016 = vmax.xlane.f32.xlu0 %v3015_v63  ;;  %v3100_v63 = vld [vmem:[#allocation17 + $0xe8] sm:$0xff] }
 0xb31   : > { %v3011_v44 = vpop.xlane.xlu0 %3010 }
 0xb32   : > { %v3019_v49 = vsub.f32 %v8077_v36, %v3011_v44  ;;  %v3092_v36 = vld [vmem:[#allocation17 + $0xa8] sm:$0xff]  ;;  %v3101_v44 = vld [vmem:[#allocation17 + $0xf0] sm:$0xff] }
 0xb34   : > { %v3024_v27 = vmul.f32 1.442695, %v3019_v49  ;;  %v11096_v49 = vpop.f32.mrb[63].mxu0 }
 0xb35   : > { %v3008_v52 = vpop.xlane.xlu0 %3007 }
 0xb36   : > { %9479 = vpow2.f32 %v3024_v27  ;;  %v3018_v39 = vsub.f32 %v2987_v35, %v3008_v52  ;;  %v3094_v35 = vld [vmem:[#allocation17 + $0xb8] sm:$0xff]  ;;  %v3555_v27 = vld [vmem:[#allocation20 + $0x80] sm:$0xff] }
 0xb37   : > { %v3797_v52 = vld [vmem:[#allocation22 + $0x80] sm:$0xff] }
 0xb38   : > { %v3022_v28 = vmul.f32 1.442695, %v3018_v39  ;;  %v3557_v39 = vld [vmem:[#allocation20 + $0x90] sm:$0xff] }
 0xb39   : > { %v3014_v17 = vpop.xlane.xlu0 %3013 }
 0xb3a   : > { %9481 = vpow2.f32 %v3022_v28  ;;  %v3020_v54 = vsub.f32 %v2997_v55, %v3014_v17  ;;  %v3098_v55 = vld [vmem:[#allocation17 + $0xd8] sm:$0xff]  ;;  %v3910_v28 = vld [vmem:[#allocation23 + $0x80] sm:$0xff]  ;;  %v3799_v17 = vld [vmem:[#allocation22 + $0x90] sm:$0xff] }
 0xb3c   : > { %v3026_v20 = vmul.f32 1.442695, %v3020_v54  ;;  %v3559_v54 = vld [vmem:[#allocation20 + $0xa0] sm:$0xff] }
 0xb3d   : > { %v3017_v45 = vpop.xlane.xlu0 %3016 }
 0xb3e   : > { %9483 = vpow2.f32 %v3026_v20  ;;  %v3021_v30 = vsub.f32 %v8080_v46, %v3017_v45  ;;  %v3096_v46 = vld [vmem:[#allocation17 + $0xc8] sm:$0xff]  ;;  %v3912_v20 = vld [vmem:[#allocation23 + $0x90] sm:$0xff]  ;;  %v3801_v45 = vld [vmem:[#allocation22 + $0xa0] sm:$0xff] }
 0xb40   : > { %v11080_v37 = vpop.eup %9479  ;;  %v3028_v59 = vmul.f32 1.442695, %v3021_v30  ;;  %v3561_v30 = vld [vmem:[#allocation20 + $0xb0] sm:$0xff] }
 0xb41   : > { %v3033_v31 = vsel %vm1668_vm1, %v11080_v37, 0.0 }
 0xb42   : > { %9485 = vpow2.f32 %v3028_v59  ;;  %3034 = vadd.xlane.f32.xlu0 %v3033_v31  ;;  %v3914_v59 = vld [vmem:[#allocation23 + $0xa0] sm:$0xff]  ;;  %v3803_v31 = vld [vmem:[#allocation22 + $0xb0] sm:$0xff] }
 0xb44   : > { %v11084_v3 = vpop.eup %9481 }
 0xb45   : > { %v3030_v12 = vsel %vm1668_vm1, %v11084_v3, 0.0 }
 0xb46   : > { %3031 = vadd.xlane.f32.xlu0 %v3030_v12  ;;  %v3563_v12 = vld [vmem:[#allocation20 + $0xc0] sm:$0xff] }
 0xb48   : > { %v11088_v13 = vpop.eup %9483 }
 0xb49   : > { %v3036_v19 = vsel %vm1668_vm1, %v11088_v13, 0.0 }
 0xb4a   : > { %3037 = vadd.xlane.f32.xlu0 %v3036_v19  ;;  %v3916_v19 = vld [vmem:[#allocation23 + $0xb0] sm:$0xff] }
 0xb4c   : > { %v11092_v48 = vpop.eup %9485 }
 0xb4d   : > { %v3039_v53 = vsel %vm1668_vm1, %v11092_v48, 0.0 }
 0xb4e   : > { %3040 = vadd.xlane.f32.xlu0 %v3039_v53  ;;  %v3805_v53 = vld [vmem:[#allocation22 + $0xc0] sm:$0xff] }
 0xb64   : > { %3105 = vperm.xlu0 %9459, %v3087_v22  }
 0xb68   : > { %3110 = vperm.xlu0 %9459, %v3088_v21   ;;  %v3565_v21 = vld [vmem:[#allocation20 + $0xd0] sm:$0xff] }
 0xb6c   : > { %3115 = vperm.xlu0 %9459, %v3089_v4  }
 0xb70   : > { %3120 = vperm.xlu0 %9459, %v3090_v14   ;;  %v3918_v14 = vld [vmem:[#allocation23 + $0xc0] sm:$0xff] }
 0xb74   : > { %3125 = vperm.xlu0 %9459, %v3091_v56  }
 0xb78   : > { %3130 = vperm.xlu0 %9459, %v3092_v36   ;;  %v3807_v36 = vld [vmem:[#allocation22 + $0xd0] sm:$0xff] }
 0xb7c   : > { %3140 = vperm.xlu0 %9459, %v3094_v35  }
 0xb80   : > { %3145 = vperm.xlu0 %9459, %v3095_v43  }
 0xb84   : > { %3150 = vperm.xlu0 %9459, %v3096_v46   ;;  %v3567_v46 = vld [vmem:[#allocation20 + $0xe0] sm:$0xff] }
 0xb88   : > { %3155 = vperm.xlu0 %9459, %v3097_v23  }
 0xb8c   : > { %3160 = vperm.xlu0 %9459, %v3098_v55  }
 0xb90   : > { %3165 = vperm.xlu0 %9459, %v3099_v18   ;;  %v3920_v18 = vld [vmem:[#allocation23 + $0xd0] sm:$0xff] }
 0xb94   : > { %3170 = vperm.xlu0 %9459, %v3100_v63  }
 0xb98   : > { %3175 = vperm.xlu0 %9459, %v3101_v44  }
 0xb9c   : > { %3573 = vperm.xlu0 %9459, %v3555_v27  }
 0xba0   : > { %3815 = vperm.xlu0 %9459, %v3797_v52  }
 0xba4   : > { %3583 = vperm.xlu0 %9459, %v3557_v39  }
 0xba8   : > { %3928 = vperm.xlu0 %9459, %v3910_v28  }
 0xbac   : > { %3825 = vperm.xlu0 %9459, %v3799_v17   ;;  %v3809_v17 = vld [vmem:[#allocation22 + $0xe0] sm:$0xff] }
 0xbb0   : > { %3593 = vperm.xlu0 %9459, %v3559_v54  }
 0xbb4   : > { %3938 = vperm.xlu0 %9459, %v3912_v20  }
 0xbb8   : > { %3835 = vperm.xlu0 %9459, %v3801_v45  }
 0xbbc   : > { %3603 = vperm.xlu0 %9459, %v3561_v30  }
 0xbc0   : > { %3948 = vperm.xlu0 %9459, %v3914_v59  }
 0xbc4   : > { %3845 = vperm.xlu0 %9459, %v3803_v31   ;;  %v3569_v31 = vld [vmem:[#allocation20 + $0xf0] sm:$0xff] }
 0xbc8   : > { %3613 = vperm.xlu0 %9459, %v3563_v12  }
 0xbcc   : > { %3958 = vperm.xlu0 %9459, %v3916_v19  }
 0xbcf   : > { %v3035_v22 = vpop.xlane.xlu0 %3034 }
 0xbd0   : > { %3855 = vperm.xlu0 %9459, %v3805_v53   ;;  %9487 = vrcp.f32 %v3035_v22  ;;  %v3922_v53 = vld [vmem:[#allocation23 + $0xe0] sm:$0xff] }
 0xbd3   : > { %v3032_v4 = vpop.xlane.xlu0 %3031 }
 0xbd4   : > { %9489 = vrcp.f32 %v3032_v4  ;;  %3623 = vperm.xlu0 %9459, %v3565_v21  }
 0xbd7   : > { %v3038_v56 = vpop.xlane.xlu0 %3037 }
 0xbd8   : > { %9491 = vrcp.f32 %v3038_v56  ;;  %3968 = vperm.xlu0 %9459, %v3918_v14   ;;  %v3811_v14 = vld [vmem:[#allocation22 + $0xf0] sm:$0xff] }
 0xbda   : > { %v9488_v43 = vpop.eup %9487 }
 0xbdb   : > { %v3041_v35 = vpop.xlane.xlu0 %3040  ;;  %v3045_v63 = vmul.f32 %v9488_v43, %v11080_v37 }
 0xbdc   : > { %9493 = vrcp.f32 %v3041_v35  ;;  %3865 = vperm.xlu0 %9459, %v3807_v36   ;;  %v3924_v35 = vld [vmem:[#allocation23 + $0xf0] sm:$0xff] }
 0xbdd   : > { %v3051_v54 = vsel %vm1668_vm1, %v3045_v63, 0.0 }
 0xbde   : > { %v9490_v23 = vpop.eup %9489 }
 0xbdf   : > { %v3043_v55 = vmul.f32 %v9490_v23, %v11084_v3 }
 0xbe0   : > { %3633 = vperm.xlu0 %9459, %v3567_v46  }
 0xbe1   : > { %v3050_v39 = vsel %vm1668_vm1, %v3043_v55, 0.0 }
 0xbe2   : > { %v9492_v44 = vpop.eup %9491  ;;  %v3052_v3 = vadd.f32 %v3051_v54, %v3050_v39 }
 0xbe3   : > { %v3047_v27 = vmul.f32 %v9492_v44, %v11088_v13  ;;  %v3106_v52 = vpop.permute.xlu0 %3105 }
 0xbe4   : > { %v3250_v28 = vadd.f32 %v11048_v29, %v3106_v52  ;;  %3978 = vperm.xlu0 %9459, %v3920_v18  }
 0xbe5   : > { %v3053_v20 = vsel %vm1668_vm1, %v3047_v27, 0.0 }
 0xbe6   : > { %v9494_v45 = vpop.eup %9493  ;;  %8145 = vmatprep.mubr.msk.f32.mxu1 %vm1668_vm1, %v3250_v28  ;;  %v3054_v13 = vadd.f32 %v3053_v20, %v3052_v3 }
 0xbe7   : > { %v3049_v37 = vmul.f32 %v9494_v45, %v11092_v48  ;;  %v3111_v30 = vpop.permute.xlu0 %3110 }
 0xbe8   : > { %3875 = vperm.xlu0 %9459, %v3809_v17  }
 0xbe9   : > { %v3055_v59 = vsel %vm1668_vm1, %v3049_v37, 0.0 }
 0xbea   : > { %v3056_v12 = vadd.f32 %v3055_v59, %v3054_v13  ;;  %v3255_v59 = vadd.f32 %v11046_v7, %v3111_v30 }
 0xbeb   : > { %v3116_v29 = vpop.permute.xlu0 %3115 }
 0xbec   : > { %3643 = vperm.xlu0 %9459, %v3569_v31   ;;  %v3057_v19 = vrot.slane %v3056_v12, 4  ;;  %v3260_v31 = vadd.f32 %v11052_v24, %v3116_v29 }
 0xbee   : > { %v3058_v22 = vadd.f32 %v3057_v19, %v3056_v12 }
 0xbef   : > { %v3121_v21 = vpop.permute.xlu0 %3120 }
 0xbf0   : > { %3988 = vperm.xlu0 %9459, %v3922_v53   ;;  %v3059_v4 = vrot.slane %v3058_v22, 2 }
 0xbf2   : > { %v3060_v56 = vadd.f32 %v3059_v4, %v3058_v22 }
 0xbf3   : > { %v3126_v36 = vpop.permute.xlu0 %3125 }
 0xbf4   : > { %3885 = vperm.xlu0 %9459, %v3811_v14   ;;  %v3061_v48 = vrot.slane %v3060_v56, 1 }
 0xbf6   : > { %v3062_v43 = vadd.f32 %v3061_v48, %v3060_v56 }
 0xbf7   : > { %v3131_v46 = vpop.permute.xlu0 %3130 }
 0xbf8   : > { %3998 = vperm.xlu0 %9459, %v3924_v35   ;;  %v3063_v23 = vadd.f32 1e-09, %v3062_v43  ;;  %v3275_v12 = vadd.f32 %v11054_v16, %v3131_v46 }
 0xbfa   : > { %9495 = vrcp.f32 %v3063_v23 }
 0xbfb   : > { %v3141_v18 = vpop.permute.xlu0 %3140 }
 0xbfc   : > { %v3285_v24 = vadd.f32 %v11058_v15, %v3141_v18 }
 0xbff   : > { %v3146_v44 = vpop.permute.xlu0 %3145 }
 0xc03   : > { %v3151_v20 = vpop.permute.xlu0 %3150 }
 0xc04   : > { %v9496_v52 = vpop.eup %9495 }
 0xc05   : > { %v3065_v39 = vmul.f32 %v9496_v52, %v3043_v55  ;;  %v3066_v28 = vmul.f32 %v9496_v52, %v3045_v63  ;;  %v3067_v17 = vmul.f32 %v9496_v52, %v3047_v27  ;;  %v3068_v54 = vmul.f32 %v9496_v52, %v3049_v37  ;;  %v3136_v37 = vpop.permute.xlu1 %3135 }
 0xc06   : > { %v3265_v55 = vadd.f32 %v11050_v57, %v3121_v21  ;;  %v3270_v27 = vadd.f32 %v11056_v0, %v3126_v36  ;;  %v3280_v7 = vadd.f32 %v11060_v33, %v3136_v37  ;;  %v3290_v57 = vadd.f32 %v11064_v1, %v3146_v44 }
 0xc07   : > { %v8965_v45 = vpack.c.bf16 %v3066_v28, %v3065_v39  ;;  %v8969_v3 = vpack.c.bf16 %v3068_v54, %v3067_v17  ;;  %v3156_v13 = vpop.permute.xlu0 %3155  ;;  %v3295_v0 = vadd.f32 %v11062_v34, %v3151_v20 }
 0xc08   : > { %v3300_v16 = vadd.f32 %v11068_v58, %v3156_v13 }
 0xc09   : > { %8966 = vmatprep.subr.bf16.mxu1 %v8965_v45  ;;  %v3181_v58 = vpop.permute.xlu1 %3180 }
 0xc0a   : > { %8968 = vmatpush3.bf16.msra.mxu1 %v8965_v45  ;;  %v3325_v53 = vadd.f32 %v11074_v10, %v3181_v58  ;;  %v3528_v58 = vld [vmem:[#allocation19 + $0xb0] sm:$0xff] }
 0xc0b   : > { %8970 = vmatprep.subr.bf16.mxu1 %v8969_v3  ;;  %v3161_v63 = vpop.permute.xlu0 %3160 }
 0xc0c   : > { %v3305_v33 = vadd.f32 %v11066_v38, %v3161_v63  ;;  %v3522_v38 = vld [vmem:[#allocation19 + $0x80] sm:$0xff] }
 0xc0e   : > { %8972 = vmatpush3.bf16.msra.mxu1 %v8969_v3 }
 0xc0f   : > { %v3166_v30 = vpop.permute.xlu0 %3165 }
 0xc10   : > { %v3310_v19 = vadd.f32 %v11072_v6, %v3166_v30 }
 0xc11   : > { %8146 = vmatmul.mubr.msk.f32.vlgmr.msra.gmra.mrb[64].mxu1 %vm1668_vm1, %v3255_v59 }
 0xc12   : > { %8148 = vmatprep.mubr.msk.f32.mxu1 %vm1668_vm1, %v3260_v31 }
 0xc13   : > { %v3171_v29 = vpop.permute.xlu0 %3170 }
 0xc14   : > { %v3315_v1 = vadd.f32 %v11070_v60, %v3171_v29 }
 0xc15   : > { %8149 = vmatmul.mubr.msk.f32.gmra.mrb[66].mxu1 %vm1668_vm1, %v3265_v55 }
 0xc16   : > { %8151 = vmatprep.mubr.msk.f32.mxu1 %vm1668_vm1, %v3270_v27 }
 0xc17   : > { %v3176_v15 = vpop.permute.xlu0 %3175 }
 0xc18   : > { %v3320_v34 = vadd.f32 %v11096_v49, %v3176_v15  ;;  %v3525_v15 = vld [vmem:[#allocation19 + $0x98] sm:$0xff] }
 0xc19   : > { %8152 = vmatmul.mubr.msk.f32.gmra.mrb[68].mxu1 %vm1668_vm1, %v3275_v12 }
 0xc1a   : > { %8154 = vmatprep.mubr.msk.f32.mxu1 %vm1668_vm1, %v3280_v7 }
 0xc1d   : > { %8155 = vmatmul.mubr.msk.f32.gmra.mrb[70].mxu1 %vm1668_vm1, %v3285_v24 }
 0xc1e   : > { %8157 = vmatprep.mubr.msk.f32.mxu1 %vm1668_vm1, %v3290_v57 }
 0xc21   : > { %8158 = vmatmul.mubr.msk.f32.gmra.mrb[72].mxu1 %vm1668_vm1, %v3295_v0 }
 0xc22   : > { %8160 = vmatprep.mubr.msk.f32.mxu1 %vm1668_vm1, %v3300_v16 }
 0xc25   : > { %8161 = vmatmul.mubr.msk.f32.gmra.mrb[74].mxu1 %vm1668_vm1, %v3305_v33  ;;  %v3523_v33 = vld [vmem:[#allocation19 + $0x88] sm:$0xff] }
 0xc26   : > { %8163 = vmatprep.mubr.msk.f32.mxu1 %vm1668_vm1, %v3310_v19  ;;  %v3524_v19 = vld [vmem:[#allocation19 + $0x90] sm:$0xff] }
 0xc29   : > { %8164 = vmatmul.mubr.msk.f32.gmra.mrb[76].mxu1 %vm1668_vm1, %v3315_v1  ;;  %v3526_v1 = vld [vmem:[#allocation19 + $0xa0] sm:$0xff] }
 0xc2a   : > { %8166 = vmatprep.mubr.msk.f32.mxu1 %vm1668_vm1, %v3320_v34  ;;  %v3527_v34 = vld [vmem:[#allocation19 + $0xa8] sm:$0xff] }
 0xc2d   : > { %8167 = vmatmul.mubr.msk.f32.gmra.mrb[78].mxu1 %vm1668_vm1, %v3325_v53  ;;  %v3529_v53 = vld [vmem:[#allocation19 + $0xb8] sm:$0xff] }
 0xc2e   : > { %8201 = vmatprep.mubr.f32.mxu1 %v3522_v38  ;;  %v3530_v38 = vld [vmem:[#allocation19 + $0xc0] sm:$0xff] }
 0xce4   : > { %v8147_v6 = vpop.f32.mrb[64].mxu1 }
 0xce5   : > { %v3539_v22 = vsub.f32 %v10854_v40, %v8147_v6  ;;  %v3442_v21 = vpop.f32.mrb[65].mxu1  ;;  %v3531_v6 = vld [vmem:[#allocation19 + $0xc8] sm:$0xff] }
 0xce6   : > { %v3538_v4 = vsub.f32 %v10857_v62, %v3442_v21  ;;  %v3533_v21 = vld [vmem:[#allocation19 + $0xd8] sm:$0xff] }
 0xce8   : > { %v8973_v60 = vpack.c.bf16 %v3539_v22, %v3538_v4  ;;  %v8150_v14 = vpop.f32.mrb[66].mxu1  ;;  %v3532_v22 = vld [vmem:[#allocation19 + $0xd0] sm:$0xff]  ;;  %v3534_v4 = vld [vmem:[#allocation19 + $0xe0] sm:$0xff] }
 0xce9   : > { %v3541_v49 = vsub.f32 %v10873_v42, %v8150_v14  ;;  %v3452_v56 = vpop.f32.mrb[67].mxu1  ;;  %v3536_v14 = vld [vmem:[#allocation19 + $0xf0] sm:$0xff] }
 0xcea   : > { %v3540_v36 = vsub.f32 %v10878_v11, %v3452_v56  ;;  %8974 = vmatprep.subr.bf16.mxu1 %v8973_v60  ;;  %v3579_v56 = vpop.permute.xlu1 %3578 }
 0xceb   : > { %8976 = vmatpush3.bf16.msra.mxu1 %v8973_v60  ;;  %v3535_v60 = vld [vmem:[#allocation19 + $0xe8] sm:$0xff] }
 0xcec   : > { %v8977_v10 = vpack.c.bf16 %v3541_v49, %v3540_v36  ;;  %v8153_v48 = vpop.f32.mrb[68].mxu1  ;;  %v3537_v49 = vld [vmem:[#allocation19 + $0xf8] sm:$0xff]  ;;  %v3574_v36 = vpop.permute.xlu0 %3573 }
 0xced   : > { %v3543_v35 = vsub.f32 %v10899_v25, %v8153_v48  ;;  %v3462_v43 = vpop.f32.mrb[69].mxu1 }
 0xcee   : > { %v3542_v46 = vsub.f32 %v10904_v32, %v3462_v43  ;;  %8978 = vmatprep.subr.bf16.mxu1 %v8977_v10 }
 0xcef   : > { %8980 = vmatpush3.bf16.msra.mxu1 %v8977_v10  ;;  %v3821_v10 = vpop.permute.xlu1 %3820 }
 0xcf0   : > { %v8981_v23 = vpack.c.bf16 %v3543_v35, %v3542_v46  ;;  %v8156_v18 = vpop.f32.mrb[70].mxu1  ;;  %v3816_v48 = vpop.permute.xlu0 %3815 }
 0xcf1   : > { %v3545_v44 = vsub.f32 %v10924_v8, %v8156_v18  ;;  %v3472_v52 = vpop.f32.mrb[71].mxu1  ;;  %v4071_v18 = vld [vmem:[#allocation14 + $0x100] sm:$0xff] }
 0xcf2   : > { %v3544_v39 = vsub.f32 %v10929_v47, %v3472_v52  ;;  %8982 = vmatprep.subr.bf16.mxu1 %v8981_v23  ;;  %8257 = vmatprep.mubr.f32.mxu0 %v4071_v18 }
 0xcf3   : > { %8984 = vmatpush3.bf16.msra.mxu1 %v8981_v23  ;;  %v3589_v35 = vpop.permute.xlu1 %3588 }
 0xcf4   : > { %v8985_v28 = vpack.c.bf16 %v3545_v44, %v3544_v39  ;;  %v8159_v17 = vpop.f32.mrb[72].mxu1  ;;  %v3584_v43 = vpop.permute.xlu0 %3583 }
 0xcf5   : > { %v3547_v54 = vsub.f32 %v10949_v41, %v8159_v17  ;;  %v3482_v20 = vpop.f32.mrb[73].mxu1 }
 0xcf6   : > { %v3546_v45 = vsub.f32 %v10954_v51, %v3482_v20  ;;  %8986 = vmatprep.subr.bf16.mxu1 %v8985_v28 }
 0xcf7   : > { %8988 = vmatpush3.bf16.msra.mxu1 %v8985_v28  ;;  %v3934_v46 = vpop.permute.xlu1 %3933 }
 0xcf8   : > { %v8989_v3 = vpack.c.bf16 %v3547_v54, %v3546_v45  ;;  %v8162_v13 = vpop.f32.mrb[74].mxu1  ;;  %v3929_v23 = vpop.permute.xlu0 %3928 }
 0xcf9   : > { %v3549_v59 = vsub.f32 %v10974_v2, %v8162_v13  ;;  %v3492_v31 = vpop.f32.mrb[75].mxu1 }
 0xcfa   : > { %v3548_v55 = vsub.f32 %v10978_v50, %v3492_v31  ;;  %8990 = vmatprep.subr.bf16.mxu1 %v8989_v3 }
 0xcfb   : > { %8992 = vmatpush3.bf16.msra.mxu1 %v8989_v3  ;;  %v3831_v44 = vpop.permute.xlu1 %3830 }
 0xcfc   : > { %v8993_v63 = vpack.c.bf16 %v3549_v59, %v3548_v55  ;;  %v8165_v27 = vpop.f32.mrb[76].mxu1  ;;  %v3826_v52 = vpop.permute.xlu0 %3825 }
 0xcfd   : > { %v3551_v37 = vsub.f32 %v10995_v9, %v8165_v27  ;;  %v3502_v12 = vpop.f32.mrb[77].mxu1 }
 0xcfe   : > { %v3550_v7 = vsub.f32 %v10998_v61, %v3502_v12  ;;  %8994 = vmatprep.subr.bf16.mxu1 %v8993_v63 }
 0xcff   : > { %8996 = vmatpush3.bf16.msra.mxu1 %v8993_v63  ;;  %v3599_v39 = vpop.permute.xlu1 %3598 }
 0xd00   : > { %v8997_v30 = vpack.c.bf16 %v3551_v37, %v3550_v7  ;;  %v8168_v24 = vpop.f32.mrb[78].mxu1  ;;  %v3594_v28 = vpop.permute.xlu0 %3593 }
 0xd01   : > { %v3553_v57 = vsub.f32 %v11012_v5, %v8168_v24  ;;  %v3512_v0 = vpop.f32.mrb[79].mxu1 }
 0xd02   : > { %v3552_v29 = vsub.f32 %v11015_v26, %v3512_v0  ;;  %8998 = vmatprep.subr.bf16.mxu1 %v8997_v30 }
 0xd03   : > { %9000 = vmatpush3.bf16.msra.mxu1 %v8997_v30  ;;  %v3944_v17 = vpop.permute.xlu1 %3943 }
 0xd04   : > { %v9001_v16 = vpack.c.bf16 %v3553_v57, %v3552_v29  ;;  %v3939_v54 = vpop.permute.xlu0 %3938 }
 0xd06   : > { %9002 = vmatprep.subr.bf16.mxu1 %v9001_v16 }
 0xd07   : > { %9004 = vmatpush3.bf16.msra.mxu1 %v9001_v16  ;;  %v3841_v20 = vpop.permute.xlu1 %3840 }
 0xd08   : > { %v3836_v45 = vpop.permute.xlu0 %3835 }
 0xd0a   : > { %8202 = vmatmul.mubr.f32.vlgmr.msra.gmra.mrb[80].mxu1 %v3523_v33 }
 0xd0b   : > { %8204 = vmatprep.mubr.f32.mxu1 %v3524_v19  ;;  %v3609_v3 = vpop.permute.xlu1 %3608 }
 0xd0c   : > { %v11154_v13 = vpop.permute.xlu0 %3603 }
 0xd0e   : > { %8205 = vmatmul.mubr.f32.gmra.mrb[82].mxu1 %v3525_v15 }
 0xd0f   : > { %8207 = vmatprep.mubr.f32.mxu1 %v3526_v1  ;;  %v3954_v59 = vpop.permute.xlu1 %3953 }
 0xd10   : > { %v3949_v31 = vpop.permute.xlu0 %3948 }
 0xd12   : > { %8208 = vmatmul.mubr.f32.gmra.mrb[84].mxu1 %v3527_v34 }
 0xd13   : > { %8210 = vmatprep.mubr.f32.mxu1 %v3528_v58  ;;  %v11156_v55 = vpop.permute.xlu1 %3850 }
 0xd14   : > { %v11158_v63 = vpop.permute.xlu0 %3845 }
 0xd16   : > { %8211 = vmatmul.mubr.f32.gmra.mrb[86].mxu1 %v3529_v53 }
 0xd17   : > { %8213 = vmatprep.mubr.f32.mxu1 %v3530_v38  ;;  %v11160_v27 = vpop.permute.xlu1 %3618 }
 0xd18   : > { %v11162_v37 = vpop.permute.xlu0 %3613 }
 0xd1a   : > { %8214 = vmatmul.mubr.f32.gmra.mrb[88].mxu1 %v3531_v6 }
 0xd1b   : > { %8216 = vmatprep.mubr.f32.mxu1 %v3532_v22  ;;  %v11164_v12 = vpop.permute.xlu1 %3963 }
 0xd1c   : > { %v11166_v7 = vpop.permute.xlu0 %3958 }
 0xd1e   : > { %8217 = vmatmul.mubr.f32.gmra.mrb[90].mxu1 %v3533_v21 }
 0xd1f   : > { %8219 = vmatprep.mubr.f32.mxu1 %v3534_v4  ;;  %v11168_v30 = vpop.permute.xlu1 %3860 }
 0xd20   : > { %v11170_v24 = vpop.permute.xlu0 %3855 }
 0xd22   : > { %8220 = vmatmul.mubr.f32.gmra.mrb[92].mxu1 %v3535_v60 }
 0xd23   : > { %8222 = vmatprep.mubr.f32.mxu1 %v3536_v14  ;;  %v11172_v57 = vpop.permute.xlu1 %3628 }
 0xd24   : > { %v11174_v0 = vpop.permute.xlu0 %3623 }
 0xd26   : > { %8223 = vmatmul.mubr.f32.gmra.mrb[94].mxu1 %v3537_v49 }
 0xd27   : > { %v11176_v29 = vpop.permute.xlu1 %3973 }
 0xd28   : > { %v11178_v16 = vpop.permute.xlu0 %3968 }
 0xd2b   : > { %v11180_v33 = vpop.permute.xlu1 %3870 }
 0xd2c   : > { %v11182_v19 = vpop.permute.xlu0 %3865 }
 0xd2f   : > { %v11184_v15 = vpop.permute.xlu1 %3638 }
 0xd30   : > { %v11186_v1 = vpop.permute.xlu0 %3633 }
 0xd33   : > { %v11188_v38 = vpop.permute.xlu1 %3983 }
 0xd34   : > { %v11190_v22 = vpop.permute.xlu0 %3978 }
 0xd37   : > { %v11192_v50 = vpop.permute.xlu1 %3880 }
 0xddd   : > { %v8203_v34 = vpop.f32.mrb[80].mxu1 }
 0xdde   : > { %v3723_v58 = vadd.f32 %v8203_v34, %v3579_v56  ;;  %v3717_v53 = vpop.f32.mrb[81].mxu1 }
 0xddf   : > { %v3718_v6 = vadd.f32 %v3717_v53, %v3574_v36  ;;  %v11194_v36 = vpop.permute.xlu0 %3875 }
 0xde0   : > { %v3894_v21 = vmul.f32 %v3821_v10, %v3723_v58 }
 0xde1   : > { %v3893_v4 = vmul.f32 %v3816_v48, %v3718_v6  ;;  %v8206_v60 = vpop.f32.mrb[82].mxu1 }
 0xde2   : > { %v4007_v14 = vadd.f32 %v3934_v46, %v3894_v21  ;;  %v3733_v49 = vadd.f32 %v8206_v60, %v3589_v35  ;;  %v3727_v18 = vpop.f32.mrb[83].mxu1 }
 0xde3   : > { %v4006_v26 = vadd.f32 %v3929_v23, %v3893_v4  ;;  %v3728_v5 = vadd.f32 %v3727_v18, %v3584_v43 }
 0xde4   : > { %v4023_v61 = vmax.f32 %v4007_v14, 0.0  ;;  %v3896_v9 = vmul.f32 %v3831_v44, %v3733_v49 }
 0xde5   : > { %v4022_v56 = vmax.f32 %v4006_v26, 0.0  ;;  %v3895_v34 = vmul.f32 %v3826_v52, %v3728_v5  ;;  %v8209_v2 = vpop.f32.mrb[84].mxu1 }
 0xde6   : > { %v11197_v10 = vadd.f32 %v4023_v61, %v10854_v40  ;;  %v4009_v48 = vadd.f32 %v3944_v17, %v3896_v9  ;;  %v3743_v46 = vadd.f32 %v8209_v2, %v3599_v39  ;;  %v3737_v35 = vpop.f32.mrb[85].mxu1 }
 0xde7   : > { %v11200_v23 = vadd.f32 %v4022_v56, %v10857_v62  ;;  %v4008_v43 = vadd.f32 %v3939_v54, %v3895_v34  ;;  %v3738_v58 = vadd.f32 %v3737_v35, %v3594_v28  ;;  %v11216_v28 = vpop.permute.xlu1 %3648 }
 0xde8   : > { %4055 = vst.msk [vmem:[%s10859_s30 + $0x88] sm:$0xff] %vm1668_vm1, %v11197_v10  ;;  %v4025_v44 = vmax.f32 %v4009_v48, 0.0  ;;  %v3898_v26 = vmul.f32 %v3841_v20, %v3743_v46 }
 0xde9   : > { %4054 = vst.msk [vmem:[%s10859_s30 + $0x80] sm:$0xff] %vm1668_vm1, %v11200_v23  ;;  %v4024_v5 = vmax.f32 %v4008_v43, 0.0  ;;  %v3897_v40 = vmul.f32 %v3836_v45, %v3738_v58  ;;  %v8212_v61 = vpop.f32.mrb[86].mxu1  ;;  %4232 = vxpose.xlu0.b32.start [1/16] (narrow) %v11200_v23, 32  ;;  %v11211_v62 = vpack.c.bf16 %v11197_v10, %v11200_v23  ;;  %v11223_v45 = vpop.permute.xlu0 %3643 }
 0xdea   : > { %v11214_v2 = vadd.f32 %v4025_v44, %v10873_v42  ;;  %v4011_v9 = vadd.f32 %v3954_v59, %v3898_v26  ;;  %v3753_v52 = vadd.f32 %v8212_v61, %v3609_v3  ;;  %v3747_v39 = vpop.f32.mrb[87].mxu1  ;;  %v12100_v61 = vld [vmem:[#allocation45_spill] sm:$0xff] }
 0xdeb   : > { %v11219_v17 = vadd.f32 %v4024_v5, %v10878_v11  ;;  %v4010_v54 = vadd.f32 %v3949_v31, %v3897_v40  ;;  %v3748_v20 = vadd.f32 %v3747_v39, %v11154_v13  ;;  %9006 = vmatprep.subr.bf16.mxu0 %v11211_v62 }
 0xdec   : > { %4057 = vst.msk [vmem:[%s10859_s30 + $0x98] sm:$0xff] %vm1668_vm1, %v11214_v2  ;;  %v4027_v42 = vmax.f32 %v4011_v9, 0.0  ;;  %v3900_v59 = vmul.f32 %v11156_v55, %v3753_v52  ;;  %9008 = vmatpush3.bf16.msra.mxu0 %v11211_v62 }
 0xded   : > { %4056 = vst.msk [vmem:[%s10859_s30 + $0x90] sm:$0xff] %vm1668_vm1, %v11219_v17  ;;  %v4026_v11 = vmax.f32 %v4010_v54, 0.0  ;;  %v3899_v3 = vmul.f32 %v11158_v63, %v3748_v20  ;;  %v8215_v13 = vpop.f32.mrb[88].mxu1  ;;  %4233 = vxpose.xlu0.b32.cont [2/16] (narrow) %v11197_v10, 32  ;;  %v11237_v31 = vpack.c.bf16 %v11214_v2, %v11219_v17  ;;  %v3989_v49 = vpop.permute.xlu0 %3988  ;;  %v12102_v54 = vld [vmem:[#allocation39_spill] sm:$0xff] }
 0xdee   : > { %v11240_v53 = vadd.f32 %v4027_v42, %v10899_v25  ;;  %v4013_v55 = vadd.f32 %v11164_v12, %v3900_v59  ;;  %v3763_v6 = vadd.f32 %v8215_v13, %v11160_v27  ;;  %v3757_v21 = vpop.f32.mrb[89].mxu1  ;;  %v3994_v12 = vpop.permute.xlu1 %3993 }
 0xdef   : > { %v11245_v4 = vadd.f32 %v4026_v11, %v10904_v32  ;;  %v4012_v63 = vadd.f32 %v11166_v7, %v3899_v3  ;;  %v3758_v60 = vadd.f32 %v3757_v21, %v11162_v37  ;;  %9010 = vmatprep.subr.bf16.mxu0 %v11237_v31 }
 0xdf0   : > { %4059 = vst.msk [vmem:[%s10859_s30 + $0xa8] sm:$0xff] %vm1668_vm1, %v11240_v53  ;;  %v4029_v14 = vmax.f32 %v4013_v55, 0.0  ;;  %v3902_v25 = vmul.f32 %v11168_v30, %v3763_v6  ;;  %9012 = vmatpush3.bf16.msra.mxu0 %v11237_v31  ;;  %v12104_v6 = vld [vmem:[#allocation40_spill] sm:$0xff] }
 0xdf1   : > { %4058 = vst.msk [vmem:[%s10859_s30 + $0xa0] sm:$0xff] %vm1668_vm1, %v11245_v4  ;;  %v4028_v32 = vmax.f32 %v4012_v63, 0.0  ;;  %v3901_v27 = vmul.f32 %v11170_v24, %v3758_v60  ;;  %v8218_v7 = vpop.f32.mrb[90].mxu1  ;;  %4234 = vxpose.xlu0.b32.cont [3/16] (narrow) %v11219_v17, 32  ;;  %v11262_v37 = vpack.c.bf16 %v11240_v53, %v11245_v4  ;;  %v3886_v40 = vpop.permute.xlu0 %3885  ;;  %v12106_v60 = vld [vmem:[#allocation41_spill] sm:$0xff] }
 0xdf2   : > { %v11265_v30 = vadd.f32 %v4029_v14, %v10924_v8  ;;  %v4015_v18 = vadd.f32 %v11176_v29, %v3902_v25  ;;  %v3773_v56 = vadd.f32 %v8218_v7, %v11172_v57  ;;  %v3767_v34 = vpop.f32.mrb[91].mxu1  ;;  %v3891_v44 = vpop.permute.xlu1 %3890  ;;  %v12108_v7 = vld [vmem:[#allocation42_spill] sm:$0xff] }
 0xdf3   : > { %v11270_v48 = vadd.f32 %v4028_v32, %v10929_v47  ;;  %v4014_v24 = vadd.f32 %v11178_v16, %v3901_v27  ;;  %v3768_v46 = vadd.f32 %v3767_v34, %v11174_v0  ;;  %9014 = vmatprep.subr.bf16.mxu0 %v11262_v37 }
 0xdf4   : > { %4061 = vst.msk [vmem:[%s10859_s30 + $0xb8] sm:$0xff] %vm1668_vm1, %v11265_v30  ;;  %v4031_v35 = vmax.f32 %v4015_v18, 0.0  ;;  %v3904_v8 = vmul.f32 %v11180_v33, %v3773_v56  ;;  %9016 = vmatpush3.bf16.msra.mxu0 %v11262_v37  ;;  %v12110_v18 = vld [vmem:[#allocation43_spill] sm:$0xff] }
 0xdf5   : > { %4060 = vst.msk [vmem:[%s10859_s30 + $0xb0] sm:$0xff] %vm1668_vm1, %v11270_v48  ;;  %v4030_v47 = vmax.f32 %v4014_v24, 0.0  ;;  %v3903_v57 = vmul.f32 %v11182_v19, %v3768_v46  ;;  %v8221_v29 = vpop.f32.mrb[92].mxu1  ;;  %4235 = vxpose.xlu0.b32.cont [4/16] (narrow) %v11214_v2, 32  ;;  %v11287_v0 = vpack.c.bf16 %v11265_v30, %v11270_v48  ;;  %v3999_v55 = vpop.permute.xlu0 %3998  ;;  %v4072_v24 = vld [vmem:[#allocation14 + $0x108] sm:$0xff]  ;;  %v4073_v46 = vld [vmem:[#allocation14 + $0x110] sm:$0xff] }
 0xdf6   : > { %v11290_v16 = vadd.f32 %v4031_v35, %v10949_v41  ;;  %v4017_v33 = vadd.f32 %v11188_v38, %v3904_v8  ;;  %v3783_v43 = vadd.f32 %v8221_v29, %v11184_v15  ;;  %v3777_v58 = vpop.f32.mrb[93].mxu1  ;;  %v4004_v3 = vpop.permute.xlu1 %4003  ;;  %v4074_v35 = vld [vmem:[#allocation14 + $0x118] sm:$0xff]  ;;  %v4075_v8 = vld [vmem:[#allocation14 + $0x120] sm:$0xff] }
 0xdf7   : > { %v11295_v26 = vadd.f32 %v4030_v47, %v10954_v51  ;;  %v4016_v19 = vadd.f32 %v11190_v22, %v3903_v57  ;;  %v3778_v5 = vadd.f32 %v3777_v58, %v11186_v1  ;;  %9018 = vmatprep.subr.bf16.mxu0 %v11287_v0  ;;  %v4076_v47 = vld [vmem:[#allocation14 + $0x128] sm:$0xff]  ;;  %v4077_v57 = vld [vmem:[#allocation14 + $0x130] sm:$0xff]  ;;  %v4079_v29 = vld [vmem:[#allocation14 + $0x140] sm:$0xff] }
 0xdf8   : > { %4063 = vst.msk [vmem:[%s10859_s30 + $0xc8] sm:$0xff] %vm1668_vm1, %v11290_v16  ;;  %v4033_v41 = vmax.f32 %v4017_v33, 0.0  ;;  %v3906_v38 = vmul.f32 %v11192_v50, %v3783_v43  ;;  %9020 = vmatpush3.bf16.msra.mxu0 %v11287_v0  ;;  %v4081_v33 = vld [vmem:[#allocation14 + $0x150] sm:$0xff]  ;;  %v4083_v43 = vld [vmem:[#allocation14 + $0x160] sm:$0xff] }
 0xdf9   : > { %4062 = vst.msk [vmem:[%s10859_s30 + $0xc0] sm:$0xff] %vm1668_vm1, %v11295_v26  ;;  %v4032_v51 = vmax.f32 %v4016_v19, 0.0  ;;  %v3905_v15 = vmul.f32 %v11194_v36, %v3778_v5  ;;  %v8224_v22 = vpop.f32.mrb[94].mxu1  ;;  %4236 = vxpose.xlu0.b32.cont [5/16] (narrow) %v11245_v4, 32  ;;  %v11312_v1 = vpack.c.bf16 %v11290_v16, %v11295_v26  ;;  %v4085_v58 = vld [vmem:[#allocation14 + $0x170] sm:$0xff]  ;;  %v4413_v19 = vld [vmem:[#allocation16 + $0x100] sm:$0xff] }
 0xdfa   : > { %v11315_v9 = vadd.f32 %v4033_v41, %v12100_v61  ;;  %v4019_v50 = vadd.f32 %v3994_v12, %v3906_v38  ;;  %v3793_v52 = vadd.f32 %v8224_v22, %v11216_v28  ;;  %v3787_v39 = vpop.f32.mrb[95].mxu1  ;;  %v4414_v5 = vld [vmem:[#allocation16 + $0x108] sm:$0xff]  ;;  %v4416_v41 = vld [vmem:[#allocation16 + $0x118] sm:$0xff]  ;;  %v4417_v38 = vld [vmem:[#allocation16 + $0x120] sm:$0xff] }
 0xdfb   : > { %v11319_v20 = vadd.f32 %v4032_v51, %v12102_v54  ;;  %v4018_v42 = vadd.f32 %v3989_v49, %v3905_v15  ;;  %v3788_v36 = vadd.f32 %v3787_v39, %v11223_v45  ;;  %9022 = vmatprep.subr.bf16.mxu0 %v11312_v1  ;;  %v4418_v51 = vld [vmem:[#allocation16 + $0x128] sm:$0xff]  ;;  %v4419_v15 = vld [vmem:[#allocation16 + $0x130] sm:$0xff]  ;;  %v4420_v22 = vld [vmem:[#allocation16 + $0x138] sm:$0xff] }
 0xdfc   : > { %12101 = vst [vmem:[#allocation44_spill] sm:$0xff] %v11315_v9  ;;  %4065 = vst.msk [vmem:[%s10859_s30 + $0xd8] sm:$0xff] %vm1668_vm1, %v11315_v9  ;;  %v4035_v59 = vmax.f32 %v4019_v50, 0.0  ;;  %v3908_v11 = vmul.f32 %v3891_v44, %v3793_v52  ;;  %9024 = vmatpush3.bf16.msra.mxu0 %v11312_v1  ;;  %v4086_v44 = vld [vmem:[#allocation14 + $0x178] sm:$0xff]  ;;  %v4422_v61 = vld [vmem:[#allocation16 + $0x148] sm:$0xff] }
 0xdfd   : > { %12103 = vst [vmem:[#allocation45_spill] sm:$0xff] %v11319_v20  ;;  %4064 = vst.msk [vmem:[%s10859_s30 + $0xd0] sm:$0xff] %vm1668_vm1, %v11319_v20  ;;  %v4034_v28 = vmax.f32 %v4018_v42, 0.0  ;;  %v3907_v13 = vmul.f32 %v3886_v40, %v3788_v36  ;;  %4237 = vxpose.xlu0.b32.cont [6/16] (narrow) %v11240_v53, 32  ;;  %v11333_v45 = vpack.c.bf16 %v11315_v9, %v11319_v20  ;;  %v4415_v40 = vld [vmem:[#allocation16 + $0x110] sm:$0xff]  ;;  %v4424_v52 = vld [vmem:[#allocation16 + $0x158] sm:$0xff] }
 0xdfe   : > { %v11336_v21 = vadd.f32 %v4035_v59, %v12104_v6  ;;  %v4021_v63 = vadd.f32 %v4004_v3, %v3908_v11  ;;  %v4423_v50 = vld [vmem:[#allocation16 + $0x150] sm:$0xff]  ;;  %v4425_v39 = vld [vmem:[#allocation16 + $0x160] sm:$0xff]  ;;  %v4426_v54 = vld [vmem:[#allocation16 + $0x168] sm:$0xff] }
 0xdff   : > { %v11339_v14 = vadd.f32 %v4034_v28, %v12106_v60  ;;  %v4020_v25 = vadd.f32 %v3999_v55, %v3907_v13  ;;  %9026 = vmatprep.subr.bf16.mxu0 %v11333_v45  ;;  %v4427_v42 = vld [vmem:[#allocation16 + $0x170] sm:$0xff]  ;;  %v4428_v36 = vld [vmem:[#allocation16 + $0x178] sm:$0xff]  ;;  %v4434_v59 = vld [vmem:[#allocation17 + $0x120] sm:$0xff] }
 0xe00   : > { %12105 = vst [vmem:[#allocation39_spill] sm:$0xff] %v11336_v21  ;;  %4067 = vst.msk [vmem:[%s10859_s30 + $0xe8] sm:$0xff] %vm1668_vm1, %v11336_v21  ;;  %v4037_v12 = vmax.f32 %v4021_v63, 0.0  ;;  %9028 = vmatpush3.bf16.msra.mxu0 %v11333_v45  ;;  %v4445_v11 = vld [vmem:[#allocation17 + $0x178] sm:$0xff]  ;;  %v4899_v3 = vld [vmem:[#allocation20 + $0x108] sm:$0xff] }
 0xe01   : > { %12107 = vst [vmem:[#allocation40_spill] sm:$0xff] %v11339_v14  ;;  %4066 = vst.msk [vmem:[%s10859_s30 + $0xe0] sm:$0xff] %vm1668_vm1, %v11339_v14  ;;  %v4036_v32 = vmax.f32 %v4020_v25, 0.0  ;;  %4238 = vxpose.xlu0.b32.cont [7/16] (narrow) %v11270_v48, 32  ;;  %v9029_v27 = vpack.c.bf16 %v11336_v21, %v11339_v14  ;;  %v5141_v28 = vld [vmem:[#allocation22 + $0x108] sm:$0xff]  ;;  %v4901_v13 = vld [vmem:[#allocation20 + $0x118] sm:$0xff] }
 0xe02   : > { %v11353_v49 = vadd.f32 %v4037_v12, %v12108_v7  ;;  %v5143_v55 = vld [vmem:[#allocation22 + $0x118] sm:$0xff]  ;;  %v4903_v6 = vld [vmem:[#allocation20 + $0x128] sm:$0xff] }
 0xe03   : > { %v11356_v56 = vadd.f32 %v4036_v32, %v12110_v18  ;;  %9030 = vmatprep.subr.bf16.mxu0 %v9029_v27  ;;  %v5256_v60 = vld [vmem:[#allocation23 + $0x118] sm:$0xff]  ;;  %v5145_v25 = vld [vmem:[#allocation22 + $0x128] sm:$0xff] }
 0xe04   : > { %12109 = vst [vmem:[#allocation41_spill] sm:$0xff] %v11353_v49  ;;  %4069 = vst.msk [vmem:[%s10859_s30 + $0xf8] sm:$0xff] %vm1668_vm1, %v11353_v49  ;;  %9032 = vmatpush3.bf16.msra.mxu0 %v9029_v27  ;;  %v4905_v12 = vld [vmem:[#allocation20 + $0x138] sm:$0xff]  ;;  %v5258_v32 = vld [vmem:[#allocation23 + $0x128] sm:$0xff] }
 0xe05   : > { %12111 = vst [vmem:[#allocation42_spill] sm:$0xff] %v11356_v56  ;;  %4068 = vst.msk [vmem:[%s10859_s30 + $0xf0] sm:$0xff] %vm1668_vm1, %v11356_v56  ;;  %4239 = vxpose.xlu0.b32.cont [8/16] (narrow) %v11265_v30, 32  ;;  %v9033_v34 = vpack.c.bf16 %v11353_v49, %v11356_v56  ;;  %v4907_v7 = vld [vmem:[#allocation20 + $0x148] sm:$0xff]  ;;  %v5260_v18 = vld [vmem:[#allocation23 + $0x138] sm:$0xff] }
 0xe07   : > { %9034 = vmatprep.subr.bf16.mxu0 %v9033_v34 }
 0xe08   : > { %9036 = vmatpush3.bf16.msra.mxu0 %v9033_v34 }
 0xe09   : > { %4240 = vxpose.xlu0.b32.cont [9/16] (narrow) %v11295_v26, 32  ;;  %9070 = vmatprep.subr.bf16.mxu0 %v11211_v62 }
 0xe0b   : > { %8258 = vmatmul.mubr.f32.vlgmr.msra.gmra.mrb[64].mxu0 %v4072_v24  ;;  %v4909_v24 = vld [vmem:[#allocation20 + $0x158] sm:$0xff] }
 0xe0c   : > { %9072 = vmatpush3.bf16.msra.mxu0 %v11211_v62  ;;  %8260 = vmatprep.mubr.f32.mxu0 %v4073_v46  ;;  %v4078_v62 = vld [vmem:[#allocation14 + $0x138] sm:$0xff]  ;;  %v5262_v46 = vld [vmem:[#allocation23 + $0x148] sm:$0xff] }
 0xe0d   : > { %4241 = vxpose.xlu0.b32.cont [10/16] (narrow) %v11290_v16, 32  ;;  %9074 = vmatprep.subr.bf16.mxu0 %v11237_v31 }
 0xe0f   : > { %8261 = vmatmul.mubr.f32.gmra.mrb[66].mxu0 %v4074_v35  ;;  %v5151_v35 = vld [vmem:[#allocation22 + $0x158] sm:$0xff] }
 0xe10   : > { %9076 = vmatpush3.bf16.msra.mxu0 %v11237_v31  ;;  %8263 = vmatprep.mubr.f32.mxu0 %v4075_v8  ;;  %v4080_v31 = vld [vmem:[#allocation14 + $0x148] sm:$0xff] }
 0xe11   : > { %4242 = vxpose.xlu0.b32.cont [11/16] (narrow) %v11319_v20, 32  ;;  %9078 = vmatprep.subr.bf16.mxu0 %v11262_v37  ;;  %v4911_v8 = vld [vmem:[#allocation20 + $0x168] sm:$0xff] }
 0xe13   : > { %8264 = vmatmul.mubr.f32.gmra.mrb[68].mxu0 %v4076_v47  ;;  %v5264_v47 = vld [vmem:[#allocation23 + $0x158] sm:$0xff] }
 0xe14   : > { %9080 = vmatpush3.bf16.msra.mxu0 %v11262_v37  ;;  %8266 = vmatprep.mubr.f32.mxu0 %v4077_v57  ;;  %v4082_v37 = vld [vmem:[#allocation14 + $0x158] sm:$0xff]  ;;  %v5153_v57 = vld [vmem:[#allocation22 + $0x168] sm:$0xff] }
 0xe15   : > { %4243 = vxpose.xlu0.b32.cont [12/16] (narrow) %v11315_v9, 32  ;;  %9082 = vmatprep.subr.bf16.mxu0 %v11287_v0 }
 0xe17   : > { %8267 = vmatmul.mubr.f32.gmra.mrb[70].mxu0 %v4078_v62  ;;  %v4913_v62 = vld [vmem:[#allocation20 + $0x178] sm:$0xff] }
 0xe18   : > { %9084 = vmatpush3.bf16.msra.mxu0 %v11287_v0  ;;  %8269 = vmatprep.mubr.f32.mxu0 %v4079_v29  ;;  %v4084_v0 = vld [vmem:[#allocation14 + $0x168] sm:$0xff] }
 0xe19   : > { %4244 = vxpose.xlu0.b32.cont [13/16] (narrow) %v11339_v14, 32  ;;  %9086 = vmatprep.subr.bf16.mxu0 %v11312_v1  ;;  %v5266_v29 = vld [vmem:[#allocation23 + $0x168] sm:$0xff] }
 0xe1b   : > { %8270 = vmatmul.mubr.f32.gmra.mrb[72].mxu0 %v4080_v31  ;;  %v5155_v31 = vld [vmem:[#allocation22 + $0x178] sm:$0xff] }
 0xe1c   : > { %9088 = vmatpush3.bf16.msra.mxu0 %v11312_v1  ;;  %8272 = vmatprep.mubr.f32.mxu0 %v4081_v33  ;;  %v4421_v1 = vld [vmem:[#allocation16 + $0x140] sm:$0xff]  ;;  %v5268_v33 = vld [vmem:[#allocation23 + $0x178] sm:$0xff] }
 0xe1d   : > { %4245 = vxpose.xlu0.b32.cont [14/16] (narrow) %v11336_v21, 32  ;;  %9090 = vmatprep.subr.bf16.mxu0 %v11333_v45 }
 0xe1f   : > { %8273 = vmatmul.mubr.f32.gmra.mrb[74].mxu0 %v4082_v37 }
 0xe20   : > { %9092 = vmatpush3.bf16.msra.mxu0 %v11333_v45  ;;  %8275 = vmatprep.mubr.f32.mxu0 %v4083_v43  ;;  %v5254_v45 = vld [vmem:[#allocation23 + $0x108] sm:$0xff] }
 0xe21   : > { %4246 = vxpose.xlu0.b32.cont [15/16] (narrow) %v11356_v56, 32  ;;  %9094 = vmatprep.subr.bf16.mxu0 %v9029_v27 }
 0xe23   : > { %8276 = vmatmul.mubr.f32.gmra.mrb[76].mxu0 %v4084_v0 }
 0xe24   : > { %9096 = vmatpush3.bf16.msra.mxu0 %v9029_v27  ;;  %8278 = vmatprep.mubr.f32.mxu0 %v4085_v58  ;;  %v5147_v27 = vld [vmem:[#allocation22 + $0x138] sm:$0xff] }
 0xe25   : > { %4247 = vxpose.xlu0.b32.end [16/16] (narrow) %v11353_v49, 32  ;;  %9098 = vmatprep.subr.bf16.mxu0 %v9033_v34 }
 0xe27   : > { %8279 = vmatmul.mubr.f32.gmra.mrb[78].mxu0 %v4086_v44 }
 0xe28   : > { %9100 = vmatpush3.bf16.msra.mxu0 %v9033_v34  ;;  %8351 = vmatprep.mubr.f32.mxu0 %v4413_v19  ;;  %v5149_v34 = vld [vmem:[#allocation22 + $0x148] sm:$0xff] }
 0xe2b   : > { %8352 = vmatmul.mubr.f32.vlgmr.msra.gmra.mrb[80].mxu0 %v4414_v5 }
 0xe2c   : > { %8354 = vmatprep.mubr.f32.mxu0 %v4415_v40 }
 0xe2f   : > { %8355 = vmatmul.mubr.f32.gmra.mrb[82].mxu0 %v4416_v41 }
 0xe30   : > { %8357 = vmatprep.mubr.f32.mxu0 %v4417_v38 }
 0xe33   : > { %8358 = vmatmul.mubr.f32.gmra.mrb[84].mxu0 %v4418_v51 }
 0xe34   : > { %8360 = vmatprep.mubr.f32.mxu0 %v4419_v15 }
 0xe37   : > { %8361 = vmatmul.mubr.f32.gmra.mrb[86].mxu0 %v4420_v22 }
 0xe38   : > { %8363 = vmatprep.mubr.f32.mxu0 %v4421_v1 }
 0xe3b   : > { %8364 = vmatmul.mubr.f32.gmra.mrb[88].mxu0 %v4422_v61 }
 0xe3c   : > { %8366 = vmatprep.mubr.f32.mxu0 %v4423_v50 }
 0xe3f   : > { %8367 = vmatmul.mubr.f32.gmra.mrb[90].mxu0 %v4424_v52 }
 0xe40   : > { %8369 = vmatprep.mubr.f32.mxu0 %v4425_v39 }
 0xe43   : > { %8370 = vmatmul.mubr.f32.gmra.mrb[92].mxu0 %v4426_v54 }
 0xe44   : > { %8372 = vmatprep.mubr.f32.mxu0 %v4427_v42 }
 0xe47   : > { %8373 = vmatmul.mubr.f32.gmra.mrb[94].mxu0 %v4428_v36 }
 0xe4e   : > { %4468 = vperm.xlu0 %9459, %v4434_v59  }
 0xe52   : > { %4523 = vperm.xlu0 %9459, %v4445_v11  }
 0xe56   : > { %4921 = vperm.xlu0 %9459, %v4899_v3  }
 0xe5a   : > { %5163 = vperm.xlu0 %9459, %v5141_v28  }
 0xe5e   : > { %4931 = vperm.xlu0 %9459, %v4901_v13  }
 0xe62   : > { %5276 = vperm.xlu0 %9459, %v5254_v45  }
 0xe66   : > { %5173 = vperm.xlu0 %9459, %v5143_v55  }
 0xe69   : > { %v4248_v63 = vpop.trf.xlu0 }
 0xe6a   : > { %4941 = vperm.xlu0 %9459, %v4903_v6   ;;  %8313 = vmatprep.mubr.f32.mxu1 %v4248_v63 }
 0xe6d   : > { %v4249_v59 = vpop.trf.xlu0 }
 0xe6e   : > { %5286 = vperm.xlu0 %9459, %v5256_v60  }
 0xe71   : > { %v4250_v45 = vpop.trf.xlu0 }
 0xe72   : > { %5183 = vperm.xlu0 %9459, %v5145_v25  }
 0xe75   : > { %v4251_v60 = vpop.trf.xlu0 }
 0xe76   : > { %4951 = vperm.xlu0 %9459, %v4905_v12  }
 0xe7a   : > { %5296 = vperm.xlu0 %9459, %v5258_v32  }
 0xe7e   : > { %5193 = vperm.xlu0 %9459, %v5147_v27  }
 0xe82   : > { %4961 = vperm.xlu0 %9459, %v4907_v7  }
 0xe86   : > { %5306 = vperm.xlu0 %9459, %v5260_v18  }
 0xe8a   : > { %5203 = vperm.xlu0 %9459, %v5149_v34  }
 0xe8e   : > { %4971 = vperm.xlu0 %9459, %v4909_v24  }
 0xe92   : > { %5316 = vperm.xlu0 %9459, %v5262_v46  }
 0xe96   : > { %5213 = vperm.xlu0 %9459, %v5151_v35  }
 0xe9a   : > { %4981 = vperm.xlu0 %9459, %v4911_v8  }
 0xe9e   : > { %5326 = vperm.xlu0 %9459, %v5264_v47  }
 0xea2   : > { %5223 = vperm.xlu0 %9459, %v5153_v57  }
 0xea6   : > { %4991 = vperm.xlu0 %9459, %v4913_v62  }
 0xeaa   : > { %5336 = vperm.xlu0 %9459, %v5266_v29  }
 0xeae   : > { %5233 = vperm.xlu0 %9459, %v5155_v31  }
 0xeb2   : > { %5346 = vperm.xlu0 %9459, %v5268_v33  }
 0xede   : > { %v8259_v37 = vpop.f32.mrb[64].mxu0 }
 0xedf   : > { %v4153_v43 = vpop.f32.mrb[65].mxu0 }
 0xee0   : > { %v9037_v0 = vpack.c.bf16 %v8259_v37, %v4153_v43 }
 0xee2   : > { %v8262_v58 = vpop.f32.mrb[66].mxu0  ;;  %9038 = vmatprep.subr.bf16.mxu1 %v9037_v0 }
 0xee3   : > { %v4163_v44 = vpop.f32.mrb[67].mxu0  ;;  %9040 = vmatpush3.bf16.msra.mxu1 %v9037_v0 }
 0xee4   : > { %v9041_v19 = vpack.c.bf16 %v8262_v58, %v4163_v44 }
 0xee6   : > { %v8265_v5 = vpop.f32.mrb[68].mxu0  ;;  %9042 = vmatprep.subr.bf16.mxu1 %v9041_v19 }
 0xee7   : > { %v4173_v40 = vpop.f32.mrb[69].mxu0  ;;  %9044 = vmatpush3.bf16.msra.mxu1 %v9041_v19 }
 0xee8   : > { %v9045_v41 = vpack.c.bf16 %v8265_v5, %v4173_v40 }
 0xeea   : > { %v8268_v38 = vpop.f32.mrb[70].mxu0  ;;  %9046 = vmatprep.subr.bf16.mxu1 %v9045_v41 }
 0xeeb   : > { %v4183_v51 = vpop.f32.mrb[71].mxu0  ;;  %9048 = vmatpush3.bf16.msra.mxu1 %v9045_v41 }
 0xeec   : > { %v9049_v15 = vpack.c.bf16 %v8268_v38, %v4183_v51 }
 0xeee   : > { %v8271_v22 = vpop.f32.mrb[72].mxu0  ;;  %9050 = vmatprep.subr.bf16.mxu1 %v9049_v15 }
 0xeef   : > { %v4193_v1 = vpop.f32.mrb[73].mxu0  ;;  %9052 = vmatpush3.bf16.msra.mxu1 %v9049_v15 }
 0xef0   : > { %v9053_v61 = vpack.c.bf16 %v8271_v22, %v4193_v1 }
 0xef2   : > { %v8274_v50 = vpop.f32.mrb[74].mxu0  ;;  %9054 = vmatprep.subr.bf16.mxu1 %v9053_v61 }
 0xef3   : > { %v4203_v52 = vpop.f32.mrb[75].mxu0  ;;  %9056 = vmatpush3.bf16.msra.mxu1 %v9053_v61 }
 0xef4   : > { %v9057_v39 = vpack.c.bf16 %v8274_v50, %v4203_v52 }
 0xef6   : > { %v8277_v54 = vpop.f32.mrb[76].mxu0  ;;  %9058 = vmatprep.subr.bf16.mxu1 %v9057_v39 }
 0xef7   : > { %v4213_v42 = vpop.f32.mrb[77].mxu0  ;;  %9060 = vmatpush3.bf16.msra.mxu1 %v9057_v39 }
 0xef8   : > { %v9061_v36 = vpack.c.bf16 %v8277_v54, %v4213_v42 }
 0xefa   : > { %v8280_v11 = vpop.f32.mrb[78].mxu0  ;;  %9062 = vmatprep.subr.bf16.mxu1 %v9061_v36 }
 0xefb   : > { %v4223_v3 = vpop.f32.mrb[79].mxu0  ;;  %9064 = vmatpush3.bf16.msra.mxu1 %v9061_v36 }
 0xefc   : > { %v9065_v28 = vpack.c.bf16 %v8280_v11, %v4223_v3  ;;  %v4430_v11 = vld [vmem:[#allocation17 + $0x100] sm:$0xff]  ;;  %v4431_v3 = vld [vmem:[#allocation17 + $0x108] sm:$0xff] }
 0xefe   : > { %9066 = vmatprep.subr.bf16.mxu1 %v9065_v28  ;;  %v11387_v13 = vpop.f32.mrb[80].mxu0 }
 0xeff   : > { %9068 = vmatpush3.bf16.msra.mxu1 %v9065_v28  ;;  %v11389_v55 = vpop.f32.mrb[81].mxu0  ;;  %v4432_v28 = vld [vmem:[#allocation17 + $0x110] sm:$0xff] }
 0xf02   : > { %8314 = vmatmul.mubr.f32.vlgmr.msra.gmra.mrb[96].mxu1 %v4249_v59  ;;  %v11391_v6 = vpop.f32.mrb[82].mxu0 }
 0xf03   : > { %8316 = vmatprep.mubr.f32.mxu1 %v4250_v45  ;;  %v11393_v63 = vpop.f32.mrb[83].mxu0  ;;  %v4433_v45 = vld [vmem:[#allocation17 + $0x118] sm:$0xff] }
 0xf06   : > { %v11395_v25 = vpop.f32.mrb[84].mxu0  ;;  %8317 = vmatmul.mubr.f32.gmra.mrb[98].mxu1 %v4251_v60  ;;  %v4435_v60 = vld [vmem:[#allocation17 + $0x128] sm:$0xff] }
 0xf07   : > { %v11397_v12 = vpop.f32.mrb[85].mxu0 }
 0xf0a   : > { %v11399_v32 = vpop.f32.mrb[86].mxu0 }
 0xf0b   : > { %v11401_v27 = vpop.f32.mrb[87].mxu0 }
 0xf0e   : > { %v11403_v7 = vpop.f32.mrb[88].mxu0 }
 0xf0f   : > { %v11405_v18 = vpop.f32.mrb[89].mxu0 }
 0xf12   : > { %v11407_v34 = vpop.f32.mrb[90].mxu0 }
 0xf13   : > { %v11409_v24 = vpop.f32.mrb[91].mxu0 }
 0xf16   : > { %v11411_v46 = vpop.f32.mrb[92].mxu0 }
 0xf17   : > { %v11413_v35 = vpop.f32.mrb[93].mxu0 }
 0xf1a   : > { %v11415_v8 = vpop.f32.mrb[94].mxu0 }
 0xfd5   : > { %v8315_v47 = vpop.f32.mrb[96].mxu1 }
 0xfd6   : > { %v4330_v57 = vpop.f32.mrb[97].mxu1  ;;  %v4352_v62 = vsel %vm1668_vm1, %v8315_v47, -inf }
 0xfd7   : > { %4353 = vmax.xlane.f32.xlu1 %v4352_v62  ;;  %v4349_v31 = vsel %vm1668_vm1, %v4330_v57, -inf  ;;  %v4438_v62 = vld [vmem:[#allocation17 + $0x140] sm:$0xff] }
 0xfd9   : > { %v8318_v29 = vpop.f32.mrb[98].mxu1 }
 0xfda   : > { %v4340_v33 = vpop.f32.mrb[99].mxu1  ;;  %v4358_v43 = vsel %vm1668_vm1, %v8318_v29, -inf }
 0xfdb   : > { %4350 = vmax.xlane.f32.xlu1 %v4349_v31  ;;  %v4355_v37 = vsel %vm1668_vm1, %v4340_v33, -inf  ;;  %v4440_v31 = vld [vmem:[#allocation17 + $0x150] sm:$0xff] }
 0xfdf   : > { %4356 = vmax.xlane.f32.xlu1 %v4355_v37  ;;  %v4442_v37 = vld [vmem:[#allocation17 + $0x160] sm:$0xff] }
 0xfe3   : > { %4359 = vmax.xlane.f32.xlu1 %v4358_v43  ;;  %v4443_v43 = vld [vmem:[#allocation17 + $0x168] sm:$0xff] }
0x1064   : > { %v4354_v0 = vpop.xlane.xlu1 %4353 }
0x1065   : > { %v4362_v58 = vsub.f32 %v8315_v47, %v4354_v0  ;;  %v4436_v47 = vld [vmem:[#allocation17 + $0x130] sm:$0xff] }
0x1066   : > { %v4444_v0 = vld [vmem:[#allocation17 + $0x170] sm:$0xff] }
0x1067   : > { %v4367_v44 = vmul.f32 1.442695, %v4362_v58  ;;  %v11437_v58 = vpop.f32.mrb[95].mxu0 }
0x1068   : > { %v4351_v19 = vpop.xlane.xlu1 %4350 }
0x1069   : > { %9497 = vpow2.f32 %v4367_v44  ;;  %v4361_v5 = vsub.f32 %v4330_v57, %v4351_v19  ;;  %v4437_v57 = vld [vmem:[#allocation17 + $0x138] sm:$0xff]  ;;  %v4898_v44 = vld [vmem:[#allocation20 + $0x100] sm:$0xff] }
0x106a   : > { %v5140_v19 = vld [vmem:[#allocation22 + $0x100] sm:$0xff] }
0x106b   : > { %v4365_v40 = vmul.f32 1.442695, %v4361_v5  ;;  %v4900_v5 = vld [vmem:[#allocation20 + $0x110] sm:$0xff] }
0x106c   : > { %v4357_v41 = vpop.xlane.xlu1 %4356 }
0x106d   : > { %9499 = vpow2.f32 %v4365_v40  ;;  %v4363_v38 = vsub.f32 %v4340_v33, %v4357_v41  ;;  %v4441_v33 = vld [vmem:[#allocation17 + $0x158] sm:$0xff]  ;;  %v5253_v40 = vld [vmem:[#allocation23 + $0x100] sm:$0xff]  ;;  %v5142_v41 = vld [vmem:[#allocation22 + $0x110] sm:$0xff] }
0x106f   : > { %v4369_v1 = vmul.f32 1.442695, %v4363_v38  ;;  %v4902_v38 = vld [vmem:[#allocation20 + $0x120] sm:$0xff] }
0x1070   : > { %v4360_v51 = vpop.xlane.xlu1 %4359 }
0x1071   : > { %v4364_v15 = vsub.f32 %v8318_v29, %v4360_v51  ;;  %v4439_v29 = vld [vmem:[#allocation17 + $0x148] sm:$0xff]  ;;  %v5255_v51 = vld [vmem:[#allocation23 + $0x110] sm:$0xff] }
0x1073   : > { %v11421_v22 = vpop.eup %9497  ;;  %v4371_v61 = vmul.f32 1.442695, %v4364_v15  ;;  %v5144_v15 = vld [vmem:[#allocation22 + $0x120] sm:$0xff] }
0x1074   : > { %v4376_v50 = vsel %vm1668_vm1, %v11421_v22, 0.0 }
0x1075   : > { %9501 = vpow2.f32 %v4371_v61  ;;  %4377 = vadd.xlane.f32.xlu1 %v4376_v50  ;;  %v5257_v61 = vld [vmem:[#allocation23 + $0x120] sm:$0xff]  ;;  %v5146_v50 = vld [vmem:[#allocation22 + $0x130] sm:$0xff] }
0x1076   : > { %9503 = vpow2.f32 %v4369_v1  ;;  %v4904_v1 = vld [vmem:[#allocation20 + $0x130] sm:$0xff] }
0x1077   : > { %v11425_v52 = vpop.eup %9499 }
0x1078   : > { %v4373_v39 = vsel %vm1668_vm1, %v11425_v52, 0.0 }
0x1079   : > { %4374 = vadd.xlane.f32.xlu1 %v4373_v39  ;;  %v4906_v39 = vld [vmem:[#allocation20 + $0x140] sm:$0xff] }
0x107f   : > { %v11429_v54 = vpop.eup %9501 }
0x1080   : > { %v4382_v42 = vsel %vm1668_vm1, %v11429_v54, 0.0  ;;  %v11433_v36 = vpop.eup %9503 }
0x1081   : > { %4383 = vadd.xlane.f32.xlu1 %v4382_v42  ;;  %v4379_v59 = vsel %vm1668_vm1, %v11433_v36, 0.0  ;;  %v5259_v42 = vld [vmem:[#allocation23 + $0x130] sm:$0xff] }
0x1085   : > { %4380 = vadd.xlane.f32.xlu1 %v4379_v59  ;;  %v5148_v59 = vld [vmem:[#allocation22 + $0x140] sm:$0xff] }
0x1096   : > { %4448 = vperm.xlu1 %9460, %v4430_v11  }
0x109a   : > { %4453 = vperm.xlu1 %9460, %v4431_v3   ;;  %v4908_v3 = vld [vmem:[#allocation20 + $0x150] sm:$0xff] }
0x109e   : > { %4458 = vperm.xlu1 %9460, %v4432_v28   ;;  %v5261_v28 = vld [vmem:[#allocation23 + $0x140] sm:$0xff] }
0x10a2   : > { %4463 = vperm.xlu1 %9460, %v4433_v45  }
0x10a6   : > { %4473 = vperm.xlu1 %9460, %v4435_v60   ;;  %v5150_v60 = vld [vmem:[#allocation22 + $0x150] sm:$0xff] }
0x10aa   : > { %4478 = vperm.xlu1 %9460, %v4436_v47  }
0x10ae   : > { %4483 = vperm.xlu1 %9460, %v4437_v57   ;;  %v4910_v57 = vld [vmem:[#allocation20 + $0x160] sm:$0xff] }
0x10b2   : > { %4488 = vperm.xlu1 %9460, %v4438_v62  }
0x10b6   : > { %4493 = vperm.xlu1 %9460, %v4439_v29   ;;  %v5263_v29 = vld [vmem:[#allocation23 + $0x150] sm:$0xff] }
0x10ba   : > { %4498 = vperm.xlu1 %9460, %v4440_v31  }
0x10be   : > { %4503 = vperm.xlu1 %9460, %v4441_v33  }
0x10c2   : > { %4508 = vperm.xlu1 %9460, %v4442_v37  }
0x10c6   : > { %4513 = vperm.xlu1 %9460, %v4443_v43  }
0x10ca   : > { %4518 = vperm.xlu1 %9460, %v4444_v0   ;;  %v5152_v0 = vld [vmem:[#allocation22 + $0x160] sm:$0xff] }
0x10ce   : > { %4916 = vperm.xlu1 %9460, %v4898_v44  }
0x10d2   : > { %5158 = vperm.xlu1 %9460, %v5140_v19  }
0x10d6   : > { %4926 = vperm.xlu1 %9460, %v4900_v5  }
0x10da   : > { %5271 = vperm.xlu1 %9460, %v5253_v40  }
0x10de   : > { %5168 = vperm.xlu1 %9460, %v5142_v41   ;;  %v4912_v41 = vld [vmem:[#allocation20 + $0x170] sm:$0xff] }
0x10e2   : > { %4936 = vperm.xlu1 %9460, %v4902_v38  }
0x10e6   : > { %5281 = vperm.xlu1 %9460, %v5255_v51  }
0x10ea   : > { %5178 = vperm.xlu1 %9460, %v5144_v15  }
0x10ee   : > { %4946 = vperm.xlu1 %9460, %v4904_v1  }
0x10f2   : > { %5291 = vperm.xlu1 %9460, %v5257_v61  }
0x10f6   : > { %5188 = vperm.xlu1 %9460, %v5146_v50  }
0x10fa   : > { %4956 = vperm.xlu1 %9460, %v4906_v39  }
0x10fe   : > { %5301 = vperm.xlu1 %9460, %v5259_v42  }
0x1102   : > { %5198 = vperm.xlu1 %9460, %v5148_v59   ;;  %v4378_v11 = vpop.xlane.xlu1 %4377 }
0x1106   : > { %4966 = vperm.xlu1 %9460, %v4908_v3   ;;  %v4375_v45 = vpop.xlane.xlu1 %4374 }
0x1107   : > { %9505 = vrcp.f32 %v4375_v45 }
0x1108   : > { %9507 = vrcp.f32 %v4378_v11  ;;  %v5154_v11 = vld [vmem:[#allocation22 + $0x170] sm:$0xff] }
0x110a   : > { %5311 = vperm.xlu1 %9460, %v5261_v28  }
0x110e   : > { %5208 = vperm.xlu1 %9460, %v5150_v60   ;;  %v4384_v47 = vpop.xlane.xlu1 %4383 }
0x110f   : > { %9509 = vrcp.f32 %v4384_v47 }
0x1111   : > { %v9506_v31 = vpop.eup %9505 }
0x1112   : > { %4976 = vperm.xlu1 %9460, %v4910_v57   ;;  %v4381_v62 = vpop.xlane.xlu1 %4380  ;;  %v9508_v37 = vpop.eup %9507  ;;  %v4386_v44 = vmul.f32 %v9506_v31, %v11425_v52  ;;  %v5265_v52 = vld [vmem:[#allocation23 + $0x160] sm:$0xff] }
0x1113   : > { %9511 = vrcp.f32 %v4381_v62  ;;  %v4388_v5 = vmul.f32 %v9508_v37, %v11421_v22 }
0x1114   : > { %v4393_v38 = vsel %vm1668_vm1, %v4386_v44, 0.0 }
0x1115   : > { %v4394_v61 = vsel %vm1668_vm1, %v4388_v5, 0.0 }
0x1116   : > { %5321 = vperm.xlu1 %9460, %v5263_v29   ;;  %v4449_v33 = vpop.permute.xlu1 %4448  ;;  %v4395_v50 = vadd.f32 %v4394_v61, %v4393_v38 }
0x1117   : > { %v4593_v43 = vadd.f32 %v11389_v55, %v4449_v33 }
0x1119   : > { %8383 = vmatprep.mubr.msk.f32.mxu1 %vm1668_vm1, %v4593_v43  ;;  %v9510_v40 = vpop.eup %9509 }
0x111a   : > { %5218 = vperm.xlu1 %9460, %v5152_v0   ;;  %v4454_v19 = vpop.permute.xlu1 %4453  ;;  %v4392_v15 = vmul.f32 %v9510_v40, %v11429_v54  ;;  %v5267_v54 = vld [vmem:[#allocation23 + $0x170] sm:$0xff] }
0x111c   : > { %v4398_v22 = vsel %vm1668_vm1, %v4392_v15, 0.0 }
0x111d   : > { %v9512_v51 = vpop.eup %9511 }
0x111e   : > { %v4390_v1 = vmul.f32 %v9512_v51, %v11433_v36  ;;  %4986 = vperm.xlu1 %9460, %v4912_v41   ;;  %v4459_v55 = vpop.permute.xlu1 %4458 }
0x1120   : > { %v4396_v39 = vsel %vm1668_vm1, %v4390_v1, 0.0 }
0x1121   : > { %v4397_v42 = vadd.f32 %v4396_v39, %v4395_v50  ;;  %v4598_v39 = vadd.f32 %v11387_v13, %v4454_v19 }
0x1122   : > { %5331 = vperm.xlu1 %9460, %v5265_v52   ;;  %v4464_v59 = vpop.permute.xlu1 %4463 }
0x1123   : > { %v4399_v3 = vadd.f32 %v4398_v22, %v4397_v42  ;;  %v4603_v42 = vadd.f32 %v11393_v63, %v4459_v55 }
0x1125   : > { %v4400_v28 = vrot.slane %v4399_v3, 4 }
0x1126   : > { %5228 = vperm.xlu1 %9460, %v5154_v11   ;;  %v4474_v36 = vpop.permute.xlu1 %4473 }
0x1127   : > { %v4401_v45 = vadd.f32 %v4400_v28, %v4399_v3  ;;  %v4618_v22 = vadd.f32 %v11395_v25, %v4474_v36 }
0x1129   : > { %v4402_v60 = vrot.slane %v4401_v45, 2 }
0x112a   : > { %5341 = vperm.xlu1 %9460, %v5267_v54   ;;  %v4479_v62 = vpop.permute.xlu1 %4478 }
0x112b   : > { %v4403_v47 = vadd.f32 %v4402_v60, %v4401_v45  ;;  %v4623_v13 = vadd.f32 %v11401_v27, %v4479_v62 }
0x112d   : > { %v4404_v57 = vrot.slane %v4403_v47, 1 }
0x112e   : > { %v4484_v33 = vpop.permute.xlu1 %4483 }
0x112f   : > { %v4405_v29 = vadd.f32 %v4404_v57, %v4403_v47  ;;  %v4628_v63 = vadd.f32 %v11399_v32, %v4484_v33 }
0x1131   : > { %v4406_v31 = vadd.f32 1e-09, %v4405_v29 }
0x1132   : > { %v4489_v37 = vpop.permute.xlu1 %4488 }
0x1133   : > { %9513 = vrcp.f32 %v4406_v31 }
0x1136   : > { %v4494_v51 = vpop.permute.xlu1 %4493 }
0x113a   : > { %v4499_v50 = vpop.permute.xlu1 %4498 }
0x113b   : > { %v4643_v25 = vadd.f32 %v11409_v24, %v4499_v50 }
0x113d   : > { %v9514_v43 = vpop.eup %9513 }
0x113e   : > { %v4408_v0 = vmul.f32 %v9514_v43, %v4386_v44  ;;  %v4409_v40 = vmul.f32 %v9514_v43, %v4388_v5  ;;  %v4410_v41 = vmul.f32 %v9514_v43, %v4390_v1  ;;  %v4411_v38 = vmul.f32 %v9514_v43, %v4392_v15  ;;  %v4469_v44 = vpop.permute.xlu0 %4468  ;;  %v4504_v15 = vpop.permute.xlu1 %4503 }
0x113f   : > { %v4608_v5 = vadd.f32 %v11391_v6, %v4464_v59  ;;  %v4613_v1 = vadd.f32 %v11397_v12, %v4469_v44  ;;  %v4633_v6 = vadd.f32 %v11405_v18, %v4489_v37  ;;  %v4638_v12 = vadd.f32 %v11403_v7, %v4494_v51 }
0x1140   : > { %v9101_v61 = vpack.c.bf16 %v4409_v40, %v4408_v0  ;;  %v9105_v52 = vpack.c.bf16 %v4411_v38, %v4410_v41  ;;  %v4648_v27 = vadd.f32 %v11407_v34, %v4504_v15  ;;  %v4865_v34 = vld [vmem:[#allocation19 + $0x100] sm:$0xff] }
0x1142   : > { %9102 = vmatprep.subr.bf16.mxu1 %v9101_v61  ;;  %v4509_v19 = vpop.permute.xlu1 %4508  ;;  %v4524_v24 = vpop.permute.xlu0 %4523 }
0x1143   : > { %9104 = vmatpush3.bf16.msra.mxu1 %v9101_v61  ;;  %v4653_v59 = vadd.f32 %v11413_v35, %v4509_v19  ;;  %v4668_v11 = vadd.f32 %v11415_v8, %v4524_v24  ;;  %v4871_v24 = vld [vmem:[#allocation19 + $0x130] sm:$0xff] }
0x1144   : > { %9106 = vmatprep.subr.bf16.mxu1 %v9105_v52 }
0x1146   : > { %v4514_v55 = vpop.permute.xlu1 %4513 }
0x1147   : > { %9108 = vmatpush3.bf16.msra.mxu1 %v9105_v52  ;;  %v4658_v18 = vadd.f32 %v11411_v46, %v4514_v55 }
0x114a   : > { %8384 = vmatmul.mubr.msk.f32.vlgmr.msra.gmra.mrb[100].mxu1 %vm1668_vm1, %v4598_v39  ;;  %v4519_v32 = vpop.permute.xlu1 %4518 }
0x114b   : > { %8386 = vmatprep.mubr.msk.f32.mxu1 %vm1668_vm1, %v4603_v42  ;;  %v4663_v7 = vadd.f32 %v11437_v58, %v4519_v32  ;;  %v4868_v32 = vld [vmem:[#allocation19 + $0x118] sm:$0xff] }
0x114e   : > { %8387 = vmatmul.mubr.msk.f32.gmra.mrb[102].mxu1 %vm1668_vm1, %v4608_v5 }
0x114f   : > { %8389 = vmatprep.mubr.msk.f32.mxu1 %vm1668_vm1, %v4613_v1 }
0x1152   : > { %8390 = vmatmul.mubr.msk.f32.gmra.mrb[104].mxu1 %vm1668_vm1, %v4618_v22 }
0x1153   : > { %8392 = vmatprep.mubr.msk.f32.mxu1 %vm1668_vm1, %v4623_v13 }
0x1156   : > { %8393 = vmatmul.mubr.msk.f32.gmra.mrb[106].mxu1 %vm1668_vm1, %v4628_v63 }
0x1157   : > { %8395 = vmatprep.mubr.msk.f32.mxu1 %vm1668_vm1, %v4633_v6 }
0x115a   : > { %8396 = vmatmul.mubr.msk.f32.gmra.mrb[108].mxu1 %vm1668_vm1, %v4638_v12 }
0x115b   : > { %8398 = vmatprep.mubr.msk.f32.mxu1 %vm1668_vm1, %v4643_v25 }
0x115e   : > { %8399 = vmatmul.mubr.msk.f32.gmra.mrb[110].mxu1 %vm1668_vm1, %v4648_v27  ;;  %v4866_v27 = vld [vmem:[#allocation19 + $0x108] sm:$0xff] }
0x115f   : > { %8401 = vmatprep.mubr.msk.f32.mxu1 %vm1668_vm1, %v4653_v59  ;;  %v4867_v59 = vld [vmem:[#allocation19 + $0x110] sm:$0xff] }
0x1162   : > { %8402 = vmatmul.mubr.msk.f32.gmra.mrb[112].mxu1 %vm1668_vm1, %v4658_v18  ;;  %v4869_v18 = vld [vmem:[#allocation19 + $0x120] sm:$0xff] }
0x1163   : > { %8404 = vmatprep.mubr.msk.f32.mxu1 %vm1668_vm1, %v4663_v7  ;;  %v4870_v7 = vld [vmem:[#allocation19 + $0x128] sm:$0xff] }
0x1166   : > { %8405 = vmatmul.mubr.msk.f32.gmra.mrb[114].mxu1 %vm1668_vm1, %v4668_v11  ;;  %v4872_v11 = vld [vmem:[#allocation19 + $0x138] sm:$0xff] }
0x1167   : > { %8439 = vmatprep.mubr.f32.mxu1 %v4865_v34  ;;  %v4873_v34 = vld [vmem:[#allocation19 + $0x140] sm:$0xff] }
0x121d   : > { %v8385_v35 = vpop.f32.mrb[100].mxu1 }
0x121e   : > { %v4882_v3 = vsub.f32 %v11197_v10, %v8385_v35  ;;  %v4785_v28 = vpop.f32.mrb[101].mxu1  ;;  %v4874_v35 = vld [vmem:[#allocation19 + $0x148] sm:$0xff] }
0x121f   : > { %v4881_v54 = vsub.f32 %v11200_v23, %v4785_v28  ;;  %v4876_v28 = vld [vmem:[#allocation19 + $0x158] sm:$0xff] }
0x1221   : > { %v9109_v46 = vpack.c.bf16 %v4882_v3, %v4881_v54  ;;  %v8388_v45 = vpop.f32.mrb[102].mxu1  ;;  %v4875_v3 = vld [vmem:[#allocation19 + $0x150] sm:$0xff]  ;;  %v4877_v54 = vld [vmem:[#allocation19 + $0x160] sm:$0xff] }
0x1222   : > { %v4884_v58 = vsub.f32 %v11214_v2, %v8388_v45  ;;  %v4795_v36 = vpop.f32.mrb[103].mxu1  ;;  %v4879_v45 = vld [vmem:[#allocation19 + $0x170] sm:$0xff] }
0x1223   : > { %v4883_v60 = vsub.f32 %v11219_v17, %v4795_v36  ;;  %9110 = vmatprep.subr.bf16.mxu1 %v9109_v46  ;;  %v4922_v36 = vpop.permute.xlu0 %4921 }
0x1224   : > { %9112 = vmatpush3.bf16.msra.mxu1 %v9109_v46  ;;  %v4878_v46 = vld [vmem:[#allocation19 + $0x168] sm:$0xff] }
0x1225   : > { %v9113_v8 = vpack.c.bf16 %v4884_v58, %v4883_v60  ;;  %v8391_v47 = vpop.f32.mrb[104].mxu1  ;;  %v4880_v58 = vld [vmem:[#allocation19 + $0x178] sm:$0xff]  ;;  %v4917_v60 = vpop.permute.xlu1 %4916 }
0x1226   : > { %v4886_v57 = vsub.f32 %v11240_v53, %v8391_v47  ;;  %v4805_v62 = vpop.f32.mrb[105].mxu1 }
0x1227   : > { %v4885_v29 = vsub.f32 %v11245_v4, %v4805_v62  ;;  %9114 = vmatprep.subr.bf16.mxu1 %v9113_v8 }
0x1228   : > { %9116 = vmatpush3.bf16.msra.mxu1 %v9113_v8  ;;  %v5164_v8 = vpop.permute.xlu0 %5163 }
0x1229   : > { %v9117_v31 = vpack.c.bf16 %v4886_v57, %v4885_v29  ;;  %v8394_v33 = vpop.f32.mrb[106].mxu1  ;;  %v5159_v47 = vpop.permute.xlu1 %5158 }
0x122a   : > { %v4888_v37 = vsub.f32 %v11265_v30, %v8394_v33  ;;  %v4815_v43 = vpop.f32.mrb[107].mxu1  ;;  %v5414_v33 = vld [vmem:[#allocation14 + $0x180] sm:$0xff] }
0x122b   : > { %v4887_v0 = vsub.f32 %v11270_v48, %v4815_v43  ;;  %9118 = vmatprep.subr.bf16.mxu1 %v9117_v31  ;;  %8495 = vmatprep.mubr.f32.mxu0 %v5414_v33 }
0x122c   : > { %9120 = vmatpush3.bf16.msra.mxu1 %v9117_v31  ;;  %v4932_v57 = vpop.permute.xlu0 %4931 }
0x122d   : > { %v9121_v40 = vpack.c.bf16 %v4888_v37, %v4887_v0  ;;  %v8397_v41 = vpop.f32.mrb[108].mxu1  ;;  %v4927_v62 = vpop.permute.xlu1 %4926 }
0x122e   : > { %v4890_v38 = vsub.f32 %v11290_v16, %v8397_v41  ;;  %v4825_v51 = vpop.f32.mrb[109].mxu1 }
0x122f   : > { %v4889_v61 = vsub.f32 %v11295_v26, %v4825_v51  ;;  %9122 = vmatprep.subr.bf16.mxu1 %v9121_v40 }
0x1230   : > { %9124 = vmatpush3.bf16.msra.mxu1 %v9121_v40  ;;  %v5277_v29 = vpop.permute.xlu0 %5276 }
0x1231   : > { %v9125_v52 = vpack.c.bf16 %v4890_v38, %v4889_v61  ;;  %v8400_v50 = vpop.f32.mrb[110].mxu1  ;;  %v5272_v31 = vpop.permute.xlu1 %5271 }
0x1232   : > { %v4892_v39 = vsub.f32 %v11315_v9, %v8400_v50  ;;  %v4835_v42 = vpop.f32.mrb[111].mxu1 }
0x1233   : > { %v4891_v44 = vsub.f32 %v11319_v20, %v4835_v42  ;;  %9126 = vmatprep.subr.bf16.mxu1 %v9125_v52 }
0x1234   : > { %9128 = vmatpush3.bf16.msra.mxu1 %v9125_v52  ;;  %v5174_v37 = vpop.permute.xlu0 %5173 }
0x1235   : > { %v9129_v5 = vpack.c.bf16 %v4892_v39, %v4891_v44  ;;  %v8403_v15 = vpop.f32.mrb[112].mxu1  ;;  %v5169_v43 = vpop.permute.xlu1 %5168 }
0x1236   : > { %v4894_v1 = vsub.f32 %v11336_v21, %v8403_v15  ;;  %v4845_v22 = vpop.f32.mrb[113].mxu1 }
0x1237   : > { %v4893_v13 = vsub.f32 %v11339_v14, %v4845_v22  ;;  %9130 = vmatprep.subr.bf16.mxu1 %v9129_v5 }
0x1238   : > { %9132 = vmatpush3.bf16.msra.mxu1 %v9129_v5  ;;  %v4942_v0 = vpop.permute.xlu0 %4941 }
0x1239   : > { %v9133_v19 = vpack.c.bf16 %v4894_v1, %v4893_v13  ;;  %v8406_v63 = vpop.f32.mrb[114].mxu1  ;;  %v4937_v40 = vpop.permute.xlu1 %4936 }
0x123a   : > { %v4896_v6 = vsub.f32 %v11353_v49, %v8406_v63  ;;  %v4855_v12 = vpop.f32.mrb[115].mxu1 }
0x123b   : > { %v4895_v55 = vsub.f32 %v11356_v56, %v4855_v12  ;;  %9134 = vmatprep.subr.bf16.mxu1 %v9133_v19 }
0x123c   : > { %9136 = vmatpush3.bf16.msra.mxu1 %v9133_v19  ;;  %v5287_v41 = vpop.permute.xlu0 %5286 }
0x123d   : > { %v9137_v25 = vpack.c.bf16 %v4896_v6, %v4895_v55  ;;  %v5282_v38 = vpop.permute.xlu1 %5281 }
0x123f   : > { %9138 = vmatprep.subr.bf16.mxu1 %v9137_v25 }
0x1240   : > { %9140 = vmatpush3.bf16.msra.mxu1 %v9137_v25  ;;  %v5184_v51 = vpop.permute.xlu0 %5183 }
0x1241   : > { %v5179_v61 = vpop.permute.xlu1 %5178 }
0x1243   : > { %8440 = vmatmul.mubr.f32.vlgmr.msra.gmra.mrb[116].mxu1 %v4866_v27 }
0x1244   : > { %8442 = vmatprep.mubr.f32.mxu1 %v4867_v59  ;;  %v4952_v52 = vpop.permute.xlu0 %4951 }
0x1245   : > { %v11495_v50 = vpop.permute.xlu1 %4946 }
0x1247   : > { %8443 = vmatmul.mubr.f32.gmra.mrb[118].mxu1 %v4868_v32 }
0x1248   : > { %8445 = vmatprep.mubr.f32.mxu1 %v4869_v18  ;;  %v5297_v39 = vpop.permute.xlu0 %5296 }
0x1249   : > { %v5292_v42 = vpop.permute.xlu1 %5291 }
0x124b   : > { %8446 = vmatmul.mubr.f32.gmra.mrb[120].mxu1 %v4870_v7 }
0x124c   : > { %8448 = vmatprep.mubr.f32.mxu1 %v4871_v24  ;;  %v11497_v44 = vpop.permute.xlu0 %5193 }
0x124d   : > { %v11499_v5 = vpop.permute.xlu1 %5188 }
0x124f   : > { %8449 = vmatmul.mubr.f32.gmra.mrb[122].mxu1 %v4872_v11 }
0x1250   : > { %8451 = vmatprep.mubr.f32.mxu1 %v4873_v34  ;;  %v11501_v15 = vpop.permute.xlu0 %4961 }
0x1251   : > { %v11503_v1 = vpop.permute.xlu1 %4956 }
0x1253   : > { %8452 = vmatmul.mubr.f32.gmra.mrb[124].mxu1 %v4874_v35 }
0x1254   : > { %8454 = vmatprep.mubr.f32.mxu1 %v4875_v3  ;;  %v11505_v22 = vpop.permute.xlu0 %5306 }
0x1255   : > { %v11507_v13 = vpop.permute.xlu1 %5301 }
0x1257   : > { %8455 = vmatmul.mubr.f32.gmra.mrb[126].mxu1 %v4876_v28 }
0x1258   : > { %8457 = vmatprep.mubr.f32.mxu1 %v4877_v54  ;;  %v11509_v19 = vpop.permute.xlu0 %5203 }
0x1259   : > { %v11511_v63 = vpop.permute.xlu1 %5198 }
0x125b   : > { %8458 = vmatmul.mubr.f32.gmra.mrb[128].mxu1 %v4878_v46 }
0x125c   : > { %8460 = vmatprep.mubr.f32.mxu1 %v4879_v45  ;;  %v11513_v6 = vpop.permute.xlu0 %4971 }
0x125d   : > { %v11515_v12 = vpop.permute.xlu1 %4966 }
0x125f   : > { %8461 = vmatmul.mubr.f32.gmra.mrb[130].mxu1 %v4880_v58 }
0x1260   : > { %v11517_v55 = vpop.permute.xlu0 %5316 }
0x1261   : > { %v11519_v25 = vpop.permute.xlu1 %5311 }
0x1264   : > { %v11521_v27 = vpop.permute.xlu0 %5213 }
0x1265   : > { %v11523_v59 = vpop.permute.xlu1 %5208 }
0x1268   : > { %v11525_v32 = vpop.permute.xlu0 %4981 }
0x1269   : > { %v11527_v18 = vpop.permute.xlu1 %4976 }
0x126c   : > { %v11529_v34 = vpop.permute.xlu0 %5326 }
0x126d   : > { %v11531_v3 = vpop.permute.xlu1 %5321 }
0x1270   : > { %v11533_v20 = vpop.permute.xlu0 %5223 }
0x1316   : > { %v8441_v7 = vpop.f32.mrb[116].mxu1 }
0x1317   : > { %v5066_v24 = vadd.f32 %v8441_v7, %v4922_v36  ;;  %v5060_v11 = vpop.f32.mrb[117].mxu1 }
0x1318   : > { %v5061_v35 = vadd.f32 %v5060_v11, %v4917_v60  ;;  %v11535_v60 = vpop.permute.xlu1 %5218 }
0x1319   : > { %v5237_v28 = vmul.f32 %v5164_v8, %v5066_v24 }
0x131a   : > { %v5236_v54 = vmul.f32 %v5159_v47, %v5061_v35  ;;  %v8444_v46 = vpop.f32.mrb[118].mxu1 }
0x131b   : > { %v5350_v45 = vadd.f32 %v5277_v29, %v5237_v28  ;;  %v5076_v58 = vadd.f32 %v8444_v46, %v4932_v57  ;;  %v5070_v33 = vpop.f32.mrb[119].mxu1 }
0x131c   : > { %v5349_v56 = vadd.f32 %v5272_v31, %v5236_v54  ;;  %v5071_v49 = vadd.f32 %v5070_v33, %v4927_v62 }
0x131d   : > { %v5366_v14 = vmax.f32 %v5350_v45, 0.0  ;;  %v5239_v21 = vmul.f32 %v5174_v37, %v5076_v58 }
0x131e   : > { %v5365_v36 = vmax.f32 %v5349_v56, 0.0  ;;  %v5238_v7 = vmul.f32 %v5169_v43, %v5071_v49  ;;  %v8447_v9 = vpop.f32.mrb[120].mxu1 }
0x131f   : > { %v11538_v8 = vadd.f32 %v5366_v14, %v11197_v10  ;;  %v5352_v47 = vadd.f32 %v5287_v41, %v5239_v21  ;;  %v5086_v29 = vadd.f32 %v8447_v9, %v4942_v0  ;;  %v5080_v57 = vpop.f32.mrb[121].mxu1 }
0x1320   : > { %v11541_v31 = vadd.f32 %v5365_v36, %v11200_v23  ;;  %v5351_v62 = vadd.f32 %v5282_v38, %v5238_v7  ;;  %v5081_v24 = vadd.f32 %v5080_v57, %v4937_v40  ;;  %v11557_v40 = vpop.permute.xlu0 %4991 }
0x1321   : > { %5398 = vst.msk [vmem:[%s10859_s30 + $0x108] sm:$0xff] %vm1668_vm1, %v11538_v8  ;;  %v5368_v37 = vmax.f32 %v5352_v47, 0.0  ;;  %v5241_v56 = vmul.f32 %v5184_v51, %v5086_v29 }
0x1322   : > { %5397 = vst.msk [vmem:[%s10859_s30 + $0x100] sm:$0xff] %vm1668_vm1, %v11541_v31  ;;  %v5367_v49 = vmax.f32 %v5351_v62, 0.0  ;;  %v5240_v10 = vmul.f32 %v5179_v61, %v5081_v24  ;;  %v8450_v14 = vpop.f32.mrb[122].mxu1  ;;  %5575 = vxpose.xlu1.b32.start [1/16] (narrow) %v11541_v31, 32  ;;  %v11552_v23 = vpack.c.bf16 %v11538_v8, %v11541_v31  ;;  %v11564_v61 = vpop.permute.xlu1 %4986 }
0x1323   : > { %v11555_v9 = vadd.f32 %v5368_v37, %v11214_v2  ;;  %v5354_v21 = vadd.f32 %v5297_v39, %v5241_v56  ;;  %v5096_v43 = vadd.f32 %v8450_v14, %v4952_v52  ;;  %v5090_v0 = vpop.f32.mrb[123].mxu1  ;;  %v12112_v14 = vld [vmem:[#allocation44_spill] sm:$0xff] }
0x1324   : > { %v11560_v41 = vadd.f32 %v5367_v49, %v11219_v17  ;;  %v5353_v38 = vadd.f32 %v5292_v42, %v5240_v10  ;;  %v5091_v51 = vadd.f32 %v5090_v0, %v11495_v50  ;;  %9142 = vmatprep.subr.bf16.mxu0 %v11552_v23 }
0x1325   : > { %5400 = vst.msk [vmem:[%s10859_s30 + $0x118] sm:$0xff] %vm1668_vm1, %v11555_v9  ;;  %v5370_v2 = vmax.f32 %v5354_v21, 0.0  ;;  %v5243_v39 = vmul.f32 %v11497_v44, %v5096_v43  ;;  %9144 = vmatpush3.bf16.msra.mxu0 %v11552_v23 }
0x1326   : > { %5399 = vst.msk [vmem:[%s10859_s30 + $0x110] sm:$0xff] %vm1668_vm1, %v11560_v41  ;;  %v5369_v17 = vmax.f32 %v5353_v38, 0.0  ;;  %v5242_v52 = vmul.f32 %v11499_v5, %v5091_v51  ;;  %v8453_v50 = vpop.f32.mrb[124].mxu1  ;;  %5576 = vxpose.xlu1.b32.cont [2/16] (narrow) %v11538_v8, 32  ;;  %v11578_v42 = vpack.c.bf16 %v11555_v9, %v11560_v41  ;;  %v5332_v58 = vpop.permute.xlu1 %5331  ;;  %v12113_v38 = vld [vmem:[#allocation45_spill] sm:$0xff] }
0x1327   : > { %v11581_v11 = vadd.f32 %v5370_v2, %v11240_v53  ;;  %v5356_v44 = vadd.f32 %v11505_v22, %v5243_v39  ;;  %v5106_v35 = vadd.f32 %v8453_v50, %v11501_v15  ;;  %v5100_v28 = vpop.f32.mrb[125].mxu1  ;;  %v5337_v22 = vpop.permute.xlu0 %5336 }
0x1328   : > { %v11586_v54 = vadd.f32 %v5369_v17, %v11245_v4  ;;  %v5355_v5 = vadd.f32 %v11507_v13, %v5242_v52  ;;  %v5101_v46 = vadd.f32 %v5100_v28, %v11503_v1  ;;  %9146 = vmatprep.subr.bf16.mxu0 %v11578_v42 }
0x1329   : > { %5402 = vst.msk [vmem:[%s10859_s30 + $0x128] sm:$0xff] %vm1668_vm1, %v11581_v11  ;;  %v5372_v45 = vmax.f32 %v5356_v44, 0.0  ;;  %v5245_v53 = vmul.f32 %v11509_v19, %v5106_v35  ;;  %9148 = vmatpush3.bf16.msra.mxu0 %v11578_v42  ;;  %v12114_v35 = vld [vmem:[#allocation39_spill] sm:$0xff] }
0x132a   : > { %5401 = vst.msk [vmem:[%s10859_s30 + $0x120] sm:$0xff] %vm1668_vm1, %v11586_v54  ;;  %v5371_v4 = vmax.f32 %v5355_v5, 0.0  ;;  %v5244_v15 = vmul.f32 %v11511_v63, %v5101_v46  ;;  %v8456_v13 = vpop.f32.mrb[126].mxu1  ;;  %5577 = vxpose.xlu1.b32.cont [3/16] (narrow) %v11560_v41, 32  ;;  %v11603_v1 = vpack.c.bf16 %v11581_v11, %v11586_v54  ;;  %v5229_v10 = vpop.permute.xlu1 %5228  ;;  %v12116_v46 = vld [vmem:[#allocation40_spill] sm:$0xff] }
0x132b   : > { %v11606_v19 = vadd.f32 %v5372_v45, %v11265_v30  ;;  %v5358_v33 = vadd.f32 %v11517_v55, %v5245_v53  ;;  %v5116_v36 = vadd.f32 %v8456_v13, %v11513_v6  ;;  %v5110_v7 = vpop.f32.mrb[127].mxu1  ;;  %v5234_v37 = vpop.permute.xlu0 %5233  ;;  %v12118_v13 = vld [vmem:[#allocation41_spill] sm:$0xff] }
0x132c   : > { %v11611_v47 = vadd.f32 %v5371_v4, %v11270_v48  ;;  %v5357_v63 = vadd.f32 %v11519_v25, %v5244_v15  ;;  %v5111_v29 = vadd.f32 %v5110_v7, %v11515_v12  ;;  %9150 = vmatprep.subr.bf16.mxu0 %v11603_v1 }
0x132d   : > { %5404 = vst.msk [vmem:[%s10859_s30 + $0x138] sm:$0xff] %vm1668_vm1, %v11606_v19  ;;  %v5374_v57 = vmax.f32 %v5358_v33, 0.0  ;;  %v5247_v30 = vmul.f32 %v11521_v27, %v5116_v36  ;;  %9152 = vmatpush3.bf16.msra.mxu0 %v11603_v1  ;;  %v12120_v33 = vld [vmem:[#allocation42_spill] sm:$0xff] }
0x132e   : > { %5403 = vst.msk [vmem:[%s10859_s30 + $0x130] sm:$0xff] %vm1668_vm1, %v11611_v47  ;;  %v5373_v48 = vmax.f32 %v5357_v63, 0.0  ;;  %v5246_v6 = vmul.f32 %v11523_v59, %v5111_v29  ;;  %v8459_v55 = vpop.f32.mrb[128].mxu1  ;;  %5578 = vxpose.xlu1.b32.cont [4/16] (narrow) %v11555_v9, 32  ;;  %v11628_v12 = vpack.c.bf16 %v11606_v19, %v11611_v47  ;;  %v5342_v44 = vpop.permute.xlu1 %5341  ;;  %v5415_v63 = vld [vmem:[#allocation14 + $0x188] sm:$0xff]  ;;  %v5416_v29 = vld [vmem:[#allocation14 + $0x190] sm:$0xff] }
0x132f   : > { %v11631_v25 = vadd.f32 %v5374_v57, %v11290_v16  ;;  %v5360_v27 = vadd.f32 %v11529_v34, %v5247_v30  ;;  %v5126_v62 = vadd.f32 %v8459_v55, %v11525_v32  ;;  %v5120_v24 = vpop.f32.mrb[129].mxu1  ;;  %v5347_v52 = vpop.permute.xlu0 %5346  ;;  %v5417_v57 = vld [vmem:[#allocation14 + $0x198] sm:$0xff]  ;;  %v5418_v30 = vld [vmem:[#allocation14 + $0x1a0] sm:$0xff] }
0x1330   : > { %v11636_v56 = vadd.f32 %v5373_v48, %v11295_v26  ;;  %v5359_v59 = vadd.f32 %v11531_v3, %v5246_v6  ;;  %v5121_v49 = vadd.f32 %v5120_v24, %v11527_v18  ;;  %9154 = vmatprep.subr.bf16.mxu0 %v11628_v12  ;;  %v5419_v48 = vld [vmem:[#allocation14 + $0x1a8] sm:$0xff]  ;;  %v5420_v6 = vld [vmem:[#allocation14 + $0x1b0] sm:$0xff]  ;;  %v5422_v55 = vld [vmem:[#allocation14 + $0x1c0] sm:$0xff] }
0x1331   : > { %5406 = vst.msk [vmem:[%s10859_s30 + $0x148] sm:$0xff] %vm1668_vm1, %v11631_v25  ;;  %v5376_v16 = vmax.f32 %v5360_v27, 0.0  ;;  %v5249_v34 = vmul.f32 %v11533_v20, %v5126_v62  ;;  %9156 = vmatpush3.bf16.msra.mxu0 %v11628_v12  ;;  %v5424_v27 = vld [vmem:[#allocation14 + $0x1d0] sm:$0xff]  ;;  %v5426_v62 = vld [vmem:[#allocation14 + $0x1e0] sm:$0xff] }
0x1332   : > { %5405 = vst.msk [vmem:[%s10859_s30 + $0x140] sm:$0xff] %vm1668_vm1, %v11636_v56  ;;  %v5375_v26 = vmax.f32 %v5359_v59, 0.0  ;;  %v5248_v32 = vmul.f32 %v11535_v60, %v5121_v49  ;;  %v8462_v3 = vpop.f32.mrb[130].mxu1  ;;  %5579 = vxpose.xlu1.b32.cont [5/16] (narrow) %v11586_v54, 32  ;;  %v11653_v18 = vpack.c.bf16 %v11631_v25, %v11636_v56  ;;  %v5428_v24 = vld [vmem:[#allocation14 + $0x1f0] sm:$0xff]  ;;  %v5756_v59 = vld [vmem:[#allocation16 + $0x180] sm:$0xff] }
0x1333   : > { %v11656_v21 = vadd.f32 %v5376_v16, %v12112_v14  ;;  %v5362_v20 = vadd.f32 %v5337_v22, %v5249_v34  ;;  %v5136_v43 = vadd.f32 %v8462_v3, %v11557_v40  ;;  %v5130_v0 = vpop.f32.mrb[131].mxu1  ;;  %v5757_v49 = vld [vmem:[#allocation16 + $0x188] sm:$0xff]  ;;  %v5759_v16 = vld [vmem:[#allocation16 + $0x198] sm:$0xff]  ;;  %v5760_v34 = vld [vmem:[#allocation16 + $0x1a0] sm:$0xff] }
0x1334   : > { %v11660_v51 = vadd.f32 %v5375_v26, %v12113_v38  ;;  %v5361_v2 = vadd.f32 %v5332_v58, %v5248_v32  ;;  %v5131_v60 = vadd.f32 %v5130_v0, %v11564_v61  ;;  %9158 = vmatprep.subr.bf16.mxu0 %v11653_v18  ;;  %v5761_v26 = vld [vmem:[#allocation16 + $0x1a8] sm:$0xff]  ;;  %v5762_v32 = vld [vmem:[#allocation16 + $0x1b0] sm:$0xff]  ;;  %v5763_v3 = vld [vmem:[#allocation16 + $0x1b8] sm:$0xff] }
0x1335   : > { %5408 = vst.msk [vmem:[%s10859_s30 + $0x158] sm:$0xff] %vm1668_vm1, %v11656_v21  ;;  %v5378_v39 = vmax.f32 %v5362_v20, 0.0  ;;  %v5251_v17 = vmul.f32 %v5234_v37, %v5136_v43  ;;  %9160 = vmatpush3.bf16.msra.mxu0 %v11653_v18  ;;  %v5429_v37 = vld [vmem:[#allocation14 + $0x1f8] sm:$0xff]  ;;  %v5765_v14 = vld [vmem:[#allocation16 + $0x1c8] sm:$0xff]  ;;  %v5766_v20 = vld [vmem:[#allocation16 + $0x1d0] sm:$0xff] }
0x1336   : > { %5407 = vst.msk [vmem:[%s10859_s30 + $0x150] sm:$0xff] %vm1668_vm1, %v11660_v51  ;;  %v5377_v40 = vmax.f32 %v5361_v2, 0.0  ;;  %v5250_v50 = vmul.f32 %v5229_v10, %v5131_v60  ;;  %5580 = vxpose.xlu1.b32.cont [6/16] (narrow) %v11581_v11, 32  ;;  %v11674_v61 = vpack.c.bf16 %v11656_v21, %v11660_v51  ;;  %v5758_v10 = vld [vmem:[#allocation16 + $0x190] sm:$0xff]  ;;  %v5767_v43 = vld [vmem:[#allocation16 + $0x1d8] sm:$0xff]  ;;  %v5768_v0 = vld [vmem:[#allocation16 + $0x1e0] sm:$0xff] }
0x1337   : > { %v11677_v28 = vadd.f32 %v5378_v39, %v12114_v35  ;;  %v5364_v5 = vadd.f32 %v5347_v52, %v5251_v17  ;;  %v5779_v38 = vld [vmem:[#allocation17 + $0x1b0] sm:$0xff]  ;;  %v5769_v2 = vld [vmem:[#allocation16 + $0x1e8] sm:$0xff]  ;;  %v5788_v39 = vld [vmem:[#allocation17 + $0x1f8] sm:$0xff] }
0x1338   : > { %v11680_v45 = vadd.f32 %v5377_v40, %v12116_v46  ;;  %v5363_v53 = vadd.f32 %v5342_v44, %v5250_v50  ;;  %9162 = vmatprep.subr.bf16.mxu0 %v11674_v61  ;;  %v5770_v60 = vld [vmem:[#allocation16 + $0x1f0] sm:$0xff]  ;;  %v5771_v17 = vld [vmem:[#allocation16 + $0x1f8] sm:$0xff]  ;;  %v6242_v52 = vld [vmem:[#allocation20 + $0x188] sm:$0xff] }
0x1339   : > { %12115 = vst [vmem:[#allocation43_spill] sm:$0xff] %v11677_v28  ;;  %5410 = vst.msk [vmem:[%s10859_s30 + $0x168] sm:$0xff] %vm1668_vm1, %v11677_v28  ;;  %v5380_v22 = vmax.f32 %v5364_v5, 0.0  ;;  %9164 = vmatpush3.bf16.msra.mxu0 %v11674_v61  ;;  %v6244_v40 = vld [vmem:[#allocation20 + $0x198] sm:$0xff]  ;;  %v6246_v50 = vld [vmem:[#allocation20 + $0x1a8] sm:$0xff] }
0x133a   : > { %12117 = vst [vmem:[#allocation44_spill] sm:$0xff] %v11680_v45  ;;  %5409 = vst.msk [vmem:[%s10859_s30 + $0x160] sm:$0xff] %vm1668_vm1, %v11680_v45  ;;  %v5379_v4 = vmax.f32 %v5363_v53, 0.0  ;;  %5581 = vxpose.xlu1.b32.cont [7/16] (narrow) %v11611_v47, 32  ;;  %v9165_v15 = vpack.c.bf16 %v11677_v28, %v11680_v45  ;;  %v6250_v44 = vld [vmem:[#allocation20 + $0x1c8] sm:$0xff]  ;;  %v6252_v35 = vld [vmem:[#allocation20 + $0x1d8] sm:$0xff] }
0x133b   : > { %v11694_v58 = vadd.f32 %v5380_v22, %v12118_v13  ;;  %v6254_v5 = vld [vmem:[#allocation20 + $0x1e8] sm:$0xff]  ;;  %v6256_v46 = vld [vmem:[#allocation20 + $0x1f8] sm:$0xff] }
0x133c   : > { %v11697_v36 = vadd.f32 %v5379_v4, %v12120_v33  ;;  %9166 = vmatprep.subr.bf16.mxu0 %v9165_v15  ;;  %v6484_v53 = vld [vmem:[#allocation22 + $0x188] sm:$0xff]  ;;  %v6486_v4 = vld [vmem:[#allocation22 + $0x198] sm:$0xff] }
0x133d   : > { %12119 = vst [vmem:[#allocation45_spill] sm:$0xff] %v11694_v58  ;;  %5412 = vst.msk [vmem:[%s10859_s30 + $0x178] sm:$0xff] %vm1668_vm1, %v11694_v58  ;;  %9168 = vmatpush3.bf16.msra.mxu0 %v9165_v15  ;;  %v6490_v13 = vld [vmem:[#allocation22 + $0x1b8] sm:$0xff]  ;;  %v6492_v33 = vld [vmem:[#allocation22 + $0x1c8] sm:$0xff] }
0x133e   : > { %12121 = vst [vmem:[#allocation39_spill] sm:$0xff] %v11697_v36  ;;  %5411 = vst.msk [vmem:[%s10859_s30 + $0x170] sm:$0xff] %vm1668_vm1, %v11697_v36  ;;  %5582 = vxpose.xlu1.b32.cont [8/16] (narrow) %v11606_v19, 32  ;;  %v9169_v7 = vpack.c.bf16 %v11694_v58, %v11697_v36 }
0x1340   : > { %9170 = vmatprep.subr.bf16.mxu0 %v9169_v7 }
0x1341   : > { %9172 = vmatpush3.bf16.msra.mxu0 %v9169_v7 }
0x1342   : > { %5583 = vxpose.xlu1.b32.cont [9/16] (narrow) %v11636_v56, 32  ;;  %9206 = vmatprep.subr.bf16.mxu0 %v11552_v23 }
0x1344   : > { %8496 = vmatmul.mubr.f32.vlgmr.msra.gmra.mrb[96].mxu0 %v5415_v63  ;;  %v6496_v63 = vld [vmem:[#allocation22 + $0x1e8] sm:$0xff] }
0x1345   : > { %9208 = vmatpush3.bf16.msra.mxu0 %v11552_v23  ;;  %8498 = vmatprep.mubr.f32.mxu0 %v5416_v29  ;;  %v5421_v23 = vld [vmem:[#allocation14 + $0x1b8] sm:$0xff] }
0x1346   : > { %5584 = vxpose.xlu1.b32.cont [10/16] (narrow) %v11631_v25, 32  ;;  %9210 = vmatprep.subr.bf16.mxu0 %v11578_v42  ;;  %v6498_v29 = vld [vmem:[#allocation22 + $0x1f8] sm:$0xff] }
0x1348   : > { %8499 = vmatmul.mubr.f32.gmra.mrb[98].mxu0 %v5417_v57  ;;  %v6597_v57 = vld [vmem:[#allocation23 + $0x188] sm:$0xff] }
0x1349   : > { %9212 = vmatpush3.bf16.msra.mxu0 %v11578_v42  ;;  %8501 = vmatprep.mubr.f32.mxu0 %v5418_v30  ;;  %v5423_v42 = vld [vmem:[#allocation14 + $0x1c8] sm:$0xff]  ;;  %v6599_v30 = vld [vmem:[#allocation23 + $0x198] sm:$0xff] }
0x134a   : > { %5585 = vxpose.xlu1.b32.cont [11/16] (narrow) %v11660_v51, 32  ;;  %9214 = vmatprep.subr.bf16.mxu0 %v11603_v1 }
0x134c   : > { %8502 = vmatmul.mubr.f32.gmra.mrb[100].mxu0 %v5419_v48  ;;  %v6601_v48 = vld [vmem:[#allocation23 + $0x1a8] sm:$0xff] }
0x134d   : > { %9216 = vmatpush3.bf16.msra.mxu0 %v11603_v1  ;;  %8504 = vmatprep.mubr.f32.mxu0 %v5420_v6  ;;  %v5425_v1 = vld [vmem:[#allocation14 + $0x1d8] sm:$0xff] }
0x134e   : > { %5586 = vxpose.xlu1.b32.cont [12/16] (narrow) %v11656_v21, 32  ;;  %9218 = vmatprep.subr.bf16.mxu0 %v11628_v12  ;;  %v6603_v6 = vld [vmem:[#allocation23 + $0x1b8] sm:$0xff] }
0x1350   : > { %8505 = vmatmul.mubr.f32.gmra.mrb[102].mxu0 %v5421_v23  ;;  %v6605_v23 = vld [vmem:[#allocation23 + $0x1c8] sm:$0xff] }
0x1351   : > { %9220 = vmatpush3.bf16.msra.mxu0 %v11628_v12  ;;  %8507 = vmatprep.mubr.f32.mxu0 %v5422_v55  ;;  %v5427_v12 = vld [vmem:[#allocation14 + $0x1e8] sm:$0xff]  ;;  %v6607_v55 = vld [vmem:[#allocation23 + $0x1d8] sm:$0xff] }
0x1352   : > { %5587 = vxpose.xlu1.b32.cont [13/16] (narrow) %v11680_v45, 32  ;;  %9222 = vmatprep.subr.bf16.mxu0 %v11653_v18 }
0x1354   : > { %8508 = vmatmul.mubr.f32.gmra.mrb[104].mxu0 %v5423_v42  ;;  %v6609_v42 = vld [vmem:[#allocation23 + $0x1e8] sm:$0xff] }
0x1355   : > { %9224 = vmatpush3.bf16.msra.mxu0 %v11653_v18  ;;  %8510 = vmatprep.mubr.f32.mxu0 %v5424_v27  ;;  %v5764_v18 = vld [vmem:[#allocation16 + $0x1c0] sm:$0xff]  ;;  %v6611_v27 = vld [vmem:[#allocation23 + $0x1f8] sm:$0xff] }
0x1356   : > { %5588 = vxpose.xlu1.b32.cont [14/16] (narrow) %v11677_v28, 32  ;;  %9226 = vmatprep.subr.bf16.mxu0 %v11674_v61 }
0x1358   : > { %8511 = vmatmul.mubr.f32.gmra.mrb[106].mxu0 %v5425_v1 }
0x1359   : > { %9228 = vmatpush3.bf16.msra.mxu0 %v11674_v61  ;;  %8513 = vmatprep.mubr.f32.mxu0 %v5426_v62  ;;  %v6248_v61 = vld [vmem:[#allocation20 + $0x1b8] sm:$0xff] }
0x135a   : > { %5589 = vxpose.xlu1.b32.cont [15/16] (narrow) %v11697_v36, 32  ;;  %9230 = vmatprep.subr.bf16.mxu0 %v9165_v15 }
0x135c   : > { %8514 = vmatmul.mubr.f32.gmra.mrb[108].mxu0 %v5427_v12 }
0x135d   : > { %9232 = vmatpush3.bf16.msra.mxu0 %v9165_v15  ;;  %8516 = vmatprep.mubr.f32.mxu0 %v5428_v24  ;;  %v6488_v15 = vld [vmem:[#allocation22 + $0x1a8] sm:$0xff] }
0x135e   : > { %5590 = vxpose.xlu1.b32.end [16/16] (narrow) %v11694_v58, 32  ;;  %9234 = vmatprep.subr.bf16.mxu0 %v9169_v7 }
0x1360   : > { %8517 = vmatmul.mubr.f32.gmra.mrb[110].mxu0 %v5429_v37 }
0x1361   : > { %9236 = vmatpush3.bf16.msra.mxu0 %v9169_v7  ;;  %8589 = vmatprep.mubr.f32.mxu0 %v5756_v59  ;;  %v6494_v7 = vld [vmem:[#allocation22 + $0x1d8] sm:$0xff] }
0x1364   : > { %8590 = vmatmul.mubr.f32.vlgmr.msra.gmra.mrb[112].mxu0 %v5757_v49 }
0x1365   : > { %8592 = vmatprep.mubr.f32.mxu0 %v5758_v10 }
0x1368   : > { %8593 = vmatmul.mubr.f32.gmra.mrb[114].mxu0 %v5759_v16 }
0x1369   : > { %8595 = vmatprep.mubr.f32.mxu0 %v5760_v34 }
0x136c   : > { %8596 = vmatmul.mubr.f32.gmra.mrb[116].mxu0 %v5761_v26 }
0x136d   : > { %8598 = vmatprep.mubr.f32.mxu0 %v5762_v32 }
0x1370   : > { %8599 = vmatmul.mubr.f32.gmra.mrb[118].mxu0 %v5763_v3 }
0x1371   : > { %8601 = vmatprep.mubr.f32.mxu0 %v5764_v18 }
0x1374   : > { %8602 = vmatmul.mubr.f32.gmra.mrb[120].mxu0 %v5765_v14 }
0x1375   : > { %8604 = vmatprep.mubr.f32.mxu0 %v5766_v20 }
0x1378   : > { %8605 = vmatmul.mubr.f32.gmra.mrb[122].mxu0 %v5767_v43 }
0x1379   : > { %8607 = vmatprep.mubr.f32.mxu0 %v5768_v0 }
0x137c   : > { %5821 = vperm.xlu1 %9460, %v5779_v38   ;;  %8608 = vmatmul.mubr.f32.gmra.mrb[124].mxu0 %v5769_v2 }
0x137d   : > { %8610 = vmatprep.mubr.f32.mxu0 %v5770_v60 }
0x1380   : > { %5866 = vperm.xlu1 %9460, %v5788_v39   ;;  %8611 = vmatmul.mubr.f32.gmra.mrb[126].mxu0 %v5771_v17 }
0x1384   : > { %6264 = vperm.xlu1 %9460, %v6242_v52  }
0x1388   : > { %6274 = vperm.xlu1 %9460, %v6244_v40  }
0x138c   : > { %6284 = vperm.xlu1 %9460, %v6246_v50  }
0x1390   : > { %6294 = vperm.xlu1 %9460, %v6248_v61  }
0x1394   : > { %6304 = vperm.xlu1 %9460, %v6250_v44  }
0x1398   : > { %6314 = vperm.xlu1 %9460, %v6252_v35  }
0x139c   : > { %6324 = vperm.xlu1 %9460, %v6254_v5  }
0x13a0   : > { %6334 = vperm.xlu1 %9460, %v6256_v46  }
0x13a2   : > { %v5591_v22 = vpop.trf.xlu1 }
0x13a3   : > { %8551 = vmatprep.mubr.f32.mxu1 %v5591_v22 }
0x13a4   : > { %6506 = vperm.xlu1 %9460, %v6484_v53  }
0x13a6   : > { %v5592_v39 = vpop.trf.xlu1 }
0x13a8   : > { %6516 = vperm.xlu1 %9460, %v6486_v4  }
0x13aa   : > { %v5593_v61 = vpop.trf.xlu1 }
0x13ac   : > { %6526 = vperm.xlu1 %9460, %v6488_v15  }
0x13ae   : > { %v5594_v46 = vpop.trf.xlu1 }
0x13b0   : > { %6536 = vperm.xlu1 %9460, %v6490_v13  }
0x13b4   : > { %6546 = vperm.xlu1 %9460, %v6492_v33  }
0x13b8   : > { %6556 = vperm.xlu1 %9460, %v6494_v7  }
0x13bc   : > { %6566 = vperm.xlu1 %9460, %v6496_v63  }
0x13c0   : > { %6576 = vperm.xlu1 %9460, %v6498_v29  }
0x13c4   : > { %6619 = vperm.xlu1 %9460, %v6597_v57  }
0x13c8   : > { %6629 = vperm.xlu1 %9460, %v6599_v30  }
0x13cc   : > { %6639 = vperm.xlu1 %9460, %v6601_v48  }
0x13d0   : > { %6649 = vperm.xlu1 %9460, %v6603_v6  }
0x13d4   : > { %6659 = vperm.xlu1 %9460, %v6605_v23  }
0x13d8   : > { %6669 = vperm.xlu1 %9460, %v6607_v55  }
0x13dc   : > { %6679 = vperm.xlu1 %9460, %v6609_v42  }
0x13e0   : > { %6689 = vperm.xlu1 %9460, %v6611_v27  }
0x1417   : > { %v8497_v1 = vpop.f32.mrb[96].mxu0 }
0x1418   : > { %v5496_v62 = vpop.f32.mrb[97].mxu0 }
0x1419   : > { %v9173_v12 = vpack.c.bf16 %v8497_v1, %v5496_v62 }
0x141b   : > { %v8500_v24 = vpop.f32.mrb[98].mxu0  ;;  %9174 = vmatprep.subr.bf16.mxu1 %v9173_v12 }
0x141c   : > { %v5506_v37 = vpop.f32.mrb[99].mxu0  ;;  %9176 = vmatpush3.bf16.msra.mxu1 %v9173_v12 }
0x141d   : > { %v9177_v59 = vpack.c.bf16 %v8500_v24, %v5506_v37 }
0x141f   : > { %v8503_v49 = vpop.f32.mrb[100].mxu0  ;;  %9178 = vmatprep.subr.bf16.mxu1 %v9177_v59 }
0x1420   : > { %v5516_v10 = vpop.f32.mrb[101].mxu0  ;;  %9180 = vmatpush3.bf16.msra.mxu1 %v9177_v59 }
0x1421   : > { %v9181_v16 = vpack.c.bf16 %v8503_v49, %v5516_v10 }
0x1423   : > { %v8506_v34 = vpop.f32.mrb[102].mxu0  ;;  %9182 = vmatprep.subr.bf16.mxu1 %v9181_v16 }
0x1424   : > { %v5526_v26 = vpop.f32.mrb[103].mxu0  ;;  %9184 = vmatpush3.bf16.msra.mxu1 %v9181_v16 }
0x1425   : > { %v9185_v32 = vpack.c.bf16 %v8506_v34, %v5526_v26 }
0x1427   : > { %v8509_v3 = vpop.f32.mrb[104].mxu0  ;;  %9186 = vmatprep.subr.bf16.mxu1 %v9185_v32 }
0x1428   : > { %v5536_v18 = vpop.f32.mrb[105].mxu0  ;;  %9188 = vmatpush3.bf16.msra.mxu1 %v9185_v32 }
0x1429   : > { %v9189_v14 = vpack.c.bf16 %v8509_v3, %v5536_v18 }
0x142b   : > { %v8512_v20 = vpop.f32.mrb[106].mxu0  ;;  %9190 = vmatprep.subr.bf16.mxu1 %v9189_v14 }
0x142c   : > { %v5546_v43 = vpop.f32.mrb[107].mxu0  ;;  %9192 = vmatpush3.bf16.msra.mxu1 %v9189_v14 }
0x142d   : > { %v9193_v0 = vpack.c.bf16 %v8512_v20, %v5546_v43 }
0x142f   : > { %v8515_v38 = vpop.f32.mrb[108].mxu0  ;;  %9194 = vmatprep.subr.bf16.mxu1 %v9193_v0 }
0x1430   : > { %v5556_v2 = vpop.f32.mrb[109].mxu0  ;;  %9196 = vmatpush3.bf16.msra.mxu1 %v9193_v0 }
0x1431   : > { %v9197_v60 = vpack.c.bf16 %v8515_v38, %v5556_v2 }
0x1433   : > { %v8518_v17 = vpop.f32.mrb[110].mxu0  ;;  %9198 = vmatprep.subr.bf16.mxu1 %v9197_v60 }
0x1434   : > { %v5566_v52 = vpop.f32.mrb[111].mxu0  ;;  %9200 = vmatpush3.bf16.msra.mxu1 %v9197_v60 }
0x1435   : > { %v9201_v40 = vpack.c.bf16 %v8518_v17, %v5566_v52  ;;  %v5773_v17 = vld [vmem:[#allocation17 + $0x180] sm:$0xff]  ;;  %v5774_v52 = vld [vmem:[#allocation17 + $0x188] sm:$0xff] }
0x1437   : > { %9202 = vmatprep.subr.bf16.mxu1 %v9201_v40  ;;  %v11728_v50 = vpop.f32.mrb[112].mxu0 }
0x1438   : > { %9204 = vmatpush3.bf16.msra.mxu1 %v9201_v40  ;;  %v11730_v44 = vpop.f32.mrb[113].mxu0  ;;  %v5775_v40 = vld [vmem:[#allocation17 + $0x190] sm:$0xff] }
0x143b   : > { %8552 = vmatmul.mubr.f32.vlgmr.msra.gmra.mrb[132].mxu1 %v5592_v39  ;;  %v11732_v35 = vpop.f32.mrb[114].mxu0 }
0x143c   : > { %8554 = vmatprep.mubr.f32.mxu1 %v5593_v61  ;;  %v11734_v5 = vpop.f32.mrb[115].mxu0  ;;  %v5776_v61 = vld [vmem:[#allocation17 + $0x198] sm:$0xff] }
0x143f   : > { %8555 = vmatmul.mubr.f32.gmra.mrb[134].mxu1 %v5594_v46  ;;  %v11736_v53 = vpop.f32.mrb[116].mxu0  ;;  %v5777_v46 = vld [vmem:[#allocation17 + $0x1a0] sm:$0xff] }
0x1440   : > { %v11738_v22 = vpop.f32.mrb[117].mxu0 }
0x1443   : > { %v11740_v4 = vpop.f32.mrb[118].mxu0 }
0x1444   : > { %v11742_v15 = vpop.f32.mrb[119].mxu0 }
0x1447   : > { %v11744_v13 = vpop.f32.mrb[120].mxu0 }
0x1448   : > { %v11746_v33 = vpop.f32.mrb[121].mxu0 }
0x144b   : > { %v11748_v7 = vpop.f32.mrb[122].mxu0 }
0x144c   : > { %v11750_v63 = vpop.f32.mrb[123].mxu0 }
0x144f   : > { %v11752_v29 = vpop.f32.mrb[124].mxu0 }
0x1450   : > { %v11754_v57 = vpop.f32.mrb[125].mxu0 }
0x1453   : > { %v11756_v30 = vpop.f32.mrb[126].mxu0 }
0x150e   : > { %v8553_v48 = vpop.f32.mrb[132].mxu1 }
0x150f   : > { %v5673_v6 = vpop.f32.mrb[133].mxu1  ;;  %v5695_v23 = vsel %vm1668_vm1, %v8553_v48, -inf }
0x1510   : > { %5696 = vmax.xlane.f32.xlu0 %v5695_v23  ;;  %v5692_v42 = vsel %vm1668_vm1, %v5673_v6, -inf  ;;  %v5781_v23 = vld [vmem:[#allocation17 + $0x1c0] sm:$0xff] }
0x1512   : > { %v8556_v55 = vpop.f32.mrb[134].mxu1 }
0x1513   : > { %v5683_v27 = vpop.f32.mrb[135].mxu1  ;;  %v5701_v62 = vsel %vm1668_vm1, %v8556_v55, -inf }
0x1514   : > { %5693 = vmax.xlane.f32.xlu0 %v5692_v42  ;;  %v5698_v1 = vsel %vm1668_vm1, %v5683_v27, -inf  ;;  %v5783_v42 = vld [vmem:[#allocation17 + $0x1d0] sm:$0xff] }
0x1518   : > { %5699 = vmax.xlane.f32.xlu0 %v5698_v1  ;;  %v5785_v1 = vld [vmem:[#allocation17 + $0x1e0] sm:$0xff] }
0x151c   : > { %5702 = vmax.xlane.f32.xlu0 %v5701_v62  ;;  %v5786_v62 = vld [vmem:[#allocation17 + $0x1e8] sm:$0xff] }
0x159d   : > { %v5697_v12 = vpop.xlane.xlu0 %5696 }
0x159e   : > { %v5705_v24 = vsub.f32 %v8553_v48, %v5697_v12  ;;  %v5778_v48 = vld [vmem:[#allocation17 + $0x1a8] sm:$0xff]  ;;  %v5787_v12 = vld [vmem:[#allocation17 + $0x1f0] sm:$0xff] }
0x15a0   : > { %v5710_v37 = vmul.f32 1.442695, %v5705_v24  ;;  %v11778_v24 = vpop.f32.mrb[127].mxu0 }
0x15a1   : > { %v5694_v59 = vpop.xlane.xlu0 %5693 }
0x15a2   : > { %9515 = vpow2.f32 %v5710_v37  ;;  %v5704_v49 = vsub.f32 %v5673_v6, %v5694_v59  ;;  %v5780_v6 = vld [vmem:[#allocation17 + $0x1b8] sm:$0xff]  ;;  %v6241_v37 = vld [vmem:[#allocation20 + $0x180] sm:$0xff]  ;;  %v6243_v59 = vld [vmem:[#allocation20 + $0x190] sm:$0xff] }
0x15a4   : > { %v5708_v10 = vmul.f32 1.442695, %v5704_v49  ;;  %v6245_v49 = vld [vmem:[#allocation20 + $0x1a0] sm:$0xff] }
0x15a5   : > { %v5700_v16 = vpop.xlane.xlu0 %5699 }
0x15a6   : > { %9517 = vpow2.f32 %v5708_v10  ;;  %v5706_v34 = vsub.f32 %v5683_v27, %v5700_v16  ;;  %v5784_v27 = vld [vmem:[#allocation17 + $0x1d8] sm:$0xff]  ;;  %v6247_v10 = vld [vmem:[#allocation20 + $0x1b0] sm:$0xff]  ;;  %v6249_v16 = vld [vmem:[#allocation20 + $0x1c0] sm:$0xff] }
0x15a8   : > { %v5712_v26 = vmul.f32 1.442695, %v5706_v34  ;;  %v6251_v34 = vld [vmem:[#allocation20 + $0x1d0] sm:$0xff] }
0x15a9   : > { %v5703_v32 = vpop.xlane.xlu0 %5702 }
0x15aa   : > { %9519 = vpow2.f32 %v5712_v26  ;;  %v5707_v3 = vsub.f32 %v8556_v55, %v5703_v32  ;;  %v5782_v55 = vld [vmem:[#allocation17 + $0x1c8] sm:$0xff]  ;;  %v6253_v26 = vld [vmem:[#allocation20 + $0x1e0] sm:$0xff]  ;;  %v6255_v32 = vld [vmem:[#allocation20 + $0x1f0] sm:$0xff] }
0x15ac   : > { %v11762_v18 = vpop.eup %9515  ;;  %v5714_v14 = vmul.f32 1.442695, %v5707_v3  ;;  %v6483_v3 = vld [vmem:[#allocation22 + $0x180] sm:$0xff] }
0x15ad   : > { %v5719_v20 = vsel %vm1668_vm1, %v11762_v18, 0.0 }
0x15ae   : > { %9521 = vpow2.f32 %v5714_v14  ;;  %5720 = vadd.xlane.f32.xlu0 %v5719_v20  ;;  %v6485_v14 = vld [vmem:[#allocation22 + $0x190] sm:$0xff]  ;;  %v6487_v20 = vld [vmem:[#allocation22 + $0x1a0] sm:$0xff] }
0x15b0   : > { %v11766_v43 = vpop.eup %9517 }
0x15b1   : > { %v5716_v0 = vsel %vm1668_vm1, %v11766_v43, 0.0 }
0x15b2   : > { %5717 = vadd.xlane.f32.xlu0 %v5716_v0  ;;  %v6489_v0 = vld [vmem:[#allocation22 + $0x1b0] sm:$0xff] }
0x15b4   : > { %v11770_v38 = vpop.eup %9519 }
0x15b5   : > { %v5722_v2 = vsel %vm1668_vm1, %v11770_v38, 0.0 }
0x15b6   : > { %5723 = vadd.xlane.f32.xlu0 %v5722_v2  ;;  %v6491_v2 = vld [vmem:[#allocation22 + $0x1c0] sm:$0xff] }
0x15b8   : > { %v11774_v60 = vpop.eup %9521 }
0x15b9   : > { %v5725_v39 = vsel %vm1668_vm1, %v11774_v60, 0.0 }
0x15ba   : > { %5726 = vadd.xlane.f32.xlu0 %v5725_v39  ;;  %v6493_v39 = vld [vmem:[#allocation22 + $0x1d0] sm:$0xff] }
0x15d0   : > { %5791 = vperm.xlu0 %9459, %v5773_v17  }
0x15d4   : > { %5796 = vperm.xlu0 %9459, %v5774_v52   ;;  %v6495_v52 = vld [vmem:[#allocation22 + $0x1e0] sm:$0xff] }
0x15d8   : > { %5801 = vperm.xlu0 %9459, %v5775_v40  }
0x15dc   : > { %5806 = vperm.xlu0 %9459, %v5776_v61   ;;  %v6497_v61 = vld [vmem:[#allocation22 + $0x1f0] sm:$0xff] }
0x15e0   : > { %5811 = vperm.xlu0 %9459, %v5777_v46  }
0x15e4   : > { %5816 = vperm.xlu0 %9459, %v5778_v48   ;;  %v6596_v48 = vld [vmem:[#allocation23 + $0x180] sm:$0xff] }
0x15e8   : > { %5826 = vperm.xlu0 %9459, %v5780_v6  }
0x15ec   : > { %5831 = vperm.xlu0 %9459, %v5781_v23  }
0x15f0   : > { %5836 = vperm.xlu0 %9459, %v5782_v55   ;;  %v6598_v55 = vld [vmem:[#allocation23 + $0x190] sm:$0xff] }
0x15f4   : > { %5841 = vperm.xlu0 %9459, %v5783_v42  }
0x15f8   : > { %5846 = vperm.xlu0 %9459, %v5784_v27  }
0x15fc   : > { %5851 = vperm.xlu0 %9459, %v5785_v1   ;;  %v6600_v1 = vld [vmem:[#allocation23 + $0x1a0] sm:$0xff] }
0x1600   : > { %5856 = vperm.xlu0 %9459, %v5786_v62  }
0x1604   : > { %5861 = vperm.xlu0 %9459, %v5787_v12  }
0x1608   : > { %6259 = vperm.xlu0 %9459, %v6241_v37  }
0x160c   : > { %6269 = vperm.xlu0 %9459, %v6243_v59  }
0x1610   : > { %6279 = vperm.xlu0 %9459, %v6245_v49  }
0x1614   : > { %6289 = vperm.xlu0 %9459, %v6247_v10  }
0x1618   : > { %6299 = vperm.xlu0 %9459, %v6249_v16  }
0x161c   : > { %6309 = vperm.xlu0 %9459, %v6251_v34   ;;  %v6602_v34 = vld [vmem:[#allocation23 + $0x1b0] sm:$0xff] }
0x1620   : > { %6319 = vperm.xlu0 %9459, %v6253_v26  }
0x1624   : > { %6329 = vperm.xlu0 %9459, %v6255_v32  }
0x1628   : > { %6501 = vperm.xlu0 %9459, %v6483_v3  }
0x162c   : > { %6511 = vperm.xlu0 %9459, %v6485_v14  }
0x1630   : > { %6521 = vperm.xlu0 %9459, %v6487_v20   ;;  %v6604_v20 = vld [vmem:[#allocation23 + $0x1c0] sm:$0xff] }
0x1634   : > { %6531 = vperm.xlu0 %9459, %v6489_v0  }
0x1638   : > { %6541 = vperm.xlu0 %9459, %v6491_v2  }
0x163b   : > { %v5721_v17 = vpop.xlane.xlu0 %5720 }
0x163c   : > { %6551 = vperm.xlu0 %9459, %v6493_v39   ;;  %9523 = vrcp.f32 %v5721_v17  ;;  %v6606_v39 = vld [vmem:[#allocation23 + $0x1d0] sm:$0xff] }
0x163f   : > { %v5718_v40 = vpop.xlane.xlu0 %5717 }
0x1640   : > { %9525 = vrcp.f32 %v5718_v40  ;;  %6561 = vperm.xlu0 %9459, %v6495_v52  }
0x1643   : > { %v5724_v46 = vpop.xlane.xlu0 %5723 }
0x1644   : > { %9527 = vrcp.f32 %v5724_v46  ;;  %6571 = vperm.xlu0 %9459, %v6497_v61   ;;  %v6608_v61 = vld [vmem:[#allocation23 + $0x1e0] sm:$0xff] }
0x1646   : > { %v9524_v23 = vpop.eup %9523 }
0x1647   : > { %v5727_v6 = vpop.xlane.xlu0 %5726  ;;  %v5731_v62 = vmul.f32 %v9524_v23, %v11762_v18 }
0x1648   : > { %9529 = vrcp.f32 %v5727_v6  ;;  %6614 = vperm.xlu0 %9459, %v6596_v48   ;;  %v6610_v6 = vld [vmem:[#allocation23 + $0x1f0] sm:$0xff] }
0x1649   : > { %v5737_v26 = vsel %vm1668_vm1, %v5731_v62, 0.0 }
0x164a   : > { %v9526_v42 = vpop.eup %9525 }
0x164b   : > { %v5729_v27 = vmul.f32 %v9526_v42, %v11766_v43 }
0x164c   : > { %6624 = vperm.xlu0 %9459, %v6598_v55  }
0x164d   : > { %v5736_v49 = vsel %vm1668_vm1, %v5729_v27, 0.0 }
0x164e   : > { %v9528_v12 = vpop.eup %9527  ;;  %v5738_v43 = vadd.f32 %v5737_v26, %v5736_v49 }
0x164f   : > { %v5733_v37 = vmul.f32 %v9528_v12, %v11770_v38  ;;  %v5792_v59 = vpop.permute.xlu0 %5791 }
0x1650   : > { %v5936_v10 = vadd.f32 %v11730_v44, %v5792_v59  ;;  %6634 = vperm.xlu0 %9459, %v6600_v1  }
0x1651   : > { %v5739_v16 = vsel %vm1668_vm1, %v5733_v37, 0.0 }
0x1652   : > { %v9530_v32 = vpop.eup %9529  ;;  %8621 = vmatprep.mubr.msk.f32.mxu1 %vm1668_vm1, %v5936_v10  ;;  %v5740_v38 = vadd.f32 %v5739_v16, %v5738_v43 }
0x1653   : > { %v5735_v18 = vmul.f32 %v9530_v32, %v11774_v60  ;;  %v5797_v3 = vpop.permute.xlu0 %5796 }
0x1654   : > { %6644 = vperm.xlu0 %9459, %v6602_v34  }
0x1655   : > { %v5741_v14 = vsel %vm1668_vm1, %v5735_v18, 0.0 }
0x1656   : > { %v5742_v0 = vadd.f32 %v5741_v14, %v5740_v38  ;;  %v5941_v14 = vadd.f32 %v11728_v50, %v5797_v3 }
0x1657   : > { %v5802_v44 = vpop.permute.xlu0 %5801 }
0x1658   : > { %6654 = vperm.xlu0 %9459, %v6604_v20   ;;  %v5743_v2 = vrot.slane %v5742_v0, 4  ;;  %v5946_v20 = vadd.f32 %v11734_v5, %v5802_v44 }
0x165a   : > { %v5744_v17 = vadd.f32 %v5743_v2, %v5742_v0 }
0x165b   : > { %v5807_v52 = vpop.permute.xlu0 %5806 }
0x165c   : > { %6664 = vperm.xlu0 %9459, %v6606_v39   ;;  %v5745_v40 = vrot.slane %v5744_v17, 2 }
0x165e   : > { %v5746_v46 = vadd.f32 %v5745_v40, %v5744_v17 }
0x165f   : > { %v5812_v48 = vpop.permute.xlu0 %5811 }
0x1660   : > { %6674 = vperm.xlu0 %9459, %v6608_v61   ;;  %v5747_v60 = vrot.slane %v5746_v46, 1 }
0x1662   : > { %v5748_v23 = vadd.f32 %v5747_v60, %v5746_v46 }
0x1663   : > { %v5817_v55 = vpop.permute.xlu0 %5816 }
0x1664   : > { %6684 = vperm.xlu0 %9459, %v6610_v6   ;;  %v5749_v42 = vadd.f32 1e-09, %v5748_v23  ;;  %v5961_v0 = vadd.f32 %v11736_v53, %v5817_v55 }
0x1666   : > { %9531 = vrcp.f32 %v5749_v42 }
0x1667   : > { %v5827_v1 = vpop.permute.xlu0 %5826 }
0x1668   : > { %v5971_v5 = vadd.f32 %v11740_v4, %v5827_v1 }
0x166b   : > { %v5832_v12 = vpop.permute.xlu0 %5831 }
0x166f   : > { %v5837_v26 = vpop.permute.xlu0 %5836 }
0x1670   : > { %v9532_v59 = vpop.eup %9531 }
0x1671   : > { %v5751_v49 = vmul.f32 %v9532_v59, %v5729_v27  ;;  %v5752_v10 = vmul.f32 %v9532_v59, %v5731_v62  ;;  %v5753_v16 = vmul.f32 %v9532_v59, %v5733_v37  ;;  %v5754_v34 = vmul.f32 %v9532_v59, %v5735_v18  ;;  %v5822_v18 = vpop.permute.xlu1 %5821 }
0x1672   : > { %v5951_v27 = vadd.f32 %v11732_v35, %v5807_v52  ;;  %v5956_v37 = vadd.f32 %v11738_v22, %v5812_v48  ;;  %v5966_v50 = vadd.f32 %v11742_v15, %v5822_v18  ;;  %v5976_v35 = vadd.f32 %v11746_v33, %v5832_v12 }
0x1673   : > { %v9237_v32 = vpack.c.bf16 %v5752_v10, %v5751_v49  ;;  %v9241_v43 = vpack.c.bf16 %v5754_v34, %v5753_v16  ;;  %v5842_v38 = vpop.permute.xlu0 %5841  ;;  %v5981_v22 = vadd.f32 %v11744_v13, %v5837_v26 }
0x1674   : > { %v5986_v53 = vadd.f32 %v11750_v63, %v5842_v38 }
0x1675   : > { %9238 = vmatprep.subr.bf16.mxu1 %v9237_v32  ;;  %v5867_v63 = vpop.permute.xlu1 %5866 }
0x1676   : > { %9240 = vmatpush3.bf16.msra.mxu1 %v9237_v32  ;;  %v6011_v39 = vadd.f32 %v11756_v30, %v5867_v63  ;;  %v6214_v63 = vld [vmem:[#allocation19 + $0x1b0] sm:$0xff] }
0x1677   : > { %9242 = vmatprep.subr.bf16.mxu1 %v9241_v43  ;;  %v5847_v62 = vpop.permute.xlu0 %5846 }
0x1678   : > { %v5991_v15 = vadd.f32 %v11748_v7, %v5847_v62  ;;  %v6208_v7 = vld [vmem:[#allocation19 + $0x180] sm:$0xff] }
0x1679   : > { %8677 = vmatprep.mubr.f32.mxu0 %v6208_v7  ;;  %v6216_v7 = vld [vmem:[#allocation19 + $0x1c0] sm:$0xff] }
0x167a   : > { %9244 = vmatpush3.bf16.msra.mxu1 %v9241_v43 }
0x167b   : > { %v5852_v3 = vpop.permute.xlu0 %5851 }
0x167c   : > { %v5996_v2 = vadd.f32 %v11754_v57, %v5852_v3 }
0x167d   : > { %8622 = vmatmul.mubr.msk.f32.vlgmr.msra.gmra.mrb[136].mxu1 %vm1668_vm1, %v5941_v14 }
0x167e   : > { %8624 = vmatprep.mubr.msk.f32.mxu1 %vm1668_vm1, %v5946_v20 }
0x167f   : > { %v5857_v44 = vpop.permute.xlu0 %5856 }
0x1680   : > { %v6001_v33 = vadd.f32 %v11752_v29, %v5857_v44 }
0x1681   : > { %8625 = vmatmul.mubr.msk.f32.gmra.mrb[138].mxu1 %vm1668_vm1, %v5951_v27 }
0x1682   : > { %8627 = vmatprep.mubr.msk.f32.mxu1 %vm1668_vm1, %v5956_v37 }
0x1683   : > { %v5862_v4 = vpop.permute.xlu0 %5861 }
0x1684   : > { %v6006_v13 = vadd.f32 %v11778_v24, %v5862_v4  ;;  %v6211_v4 = vld [vmem:[#allocation19 + $0x198] sm:$0xff] }
0x1685   : > { %8628 = vmatmul.mubr.msk.f32.gmra.mrb[140].mxu1 %vm1668_vm1, %v5961_v0 }
0x1686   : > { %8630 = vmatprep.mubr.msk.f32.mxu1 %vm1668_vm1, %v5966_v50 }
0x1689   : > { %8631 = vmatmul.mubr.msk.f32.gmra.mrb[142].mxu1 %vm1668_vm1, %v5971_v5 }
0x168a   : > { %8633 = vmatprep.mubr.msk.f32.mxu1 %vm1668_vm1, %v5976_v35 }
0x168d   : > { %8634 = vmatmul.mubr.msk.f32.gmra.mrb[144].mxu1 %vm1668_vm1, %v5981_v22 }
0x168e   : > { %8636 = vmatprep.mubr.msk.f32.mxu1 %vm1668_vm1, %v5986_v53 }
0x1691   : > { %8637 = vmatmul.mubr.msk.f32.gmra.mrb[146].mxu1 %vm1668_vm1, %v5991_v15  ;;  %v6209_v15 = vld [vmem:[#allocation19 + $0x188] sm:$0xff] }
0x1692   : > { %8639 = vmatprep.mubr.msk.f32.mxu1 %vm1668_vm1, %v5996_v2  ;;  %v6210_v2 = vld [vmem:[#allocation19 + $0x190] sm:$0xff] }
0x1695   : > { %8640 = vmatmul.mubr.msk.f32.gmra.mrb[148].mxu1 %vm1668_vm1, %v6001_v33  ;;  %v6212_v33 = vld [vmem:[#allocation19 + $0x1a0] sm:$0xff] }
0x1696   : > { %8642 = vmatprep.mubr.msk.f32.mxu1 %vm1668_vm1, %v6006_v13  ;;  %v6213_v13 = vld [vmem:[#allocation19 + $0x1a8] sm:$0xff] }
0x1699   : > { %8643 = vmatmul.mubr.msk.f32.gmra.mrb[150].mxu1 %vm1668_vm1, %v6011_v39  ;;  %v6215_v39 = vld [vmem:[#allocation19 + $0x1b8] sm:$0xff] }
0x1750   : > { %v8623_v57 = vpop.f32.mrb[136].mxu1 }
0x1751   : > { %v6225_v17 = vsub.f32 %v11538_v8, %v8623_v57  ;;  %v6128_v52 = vpop.f32.mrb[137].mxu1  ;;  %v6217_v57 = vld [vmem:[#allocation19 + $0x1c8] sm:$0xff] }
0x1752   : > { %v6224_v40 = vsub.f32 %v11541_v31, %v6128_v52  ;;  %v6219_v52 = vld [vmem:[#allocation19 + $0x1d8] sm:$0xff] }
0x1754   : > { %v9245_v29 = vpack.c.bf16 %v6225_v17, %v6224_v40  ;;  %v8626_v61 = vpop.f32.mrb[138].mxu1  ;;  %v6218_v17 = vld [vmem:[#allocation19 + $0x1d0] sm:$0xff]  ;;  %v6220_v40 = vld [vmem:[#allocation19 + $0x1e0] sm:$0xff] }
0x1755   : > { %v6227_v24 = vsub.f32 %v11555_v9, %v8626_v61  ;;  %v6138_v46 = vpop.f32.mrb[139].mxu1  ;;  %v6222_v61 = vld [vmem:[#allocation19 + $0x1f0] sm:$0xff] }
0x1756   : > { %v6226_v48 = vsub.f32 %v11560_v41, %v6138_v46  ;;  %9246 = vmatprep.subr.bf16.mxu0 %v9245_v29  ;;  %v6265_v46 = vpop.permute.xlu1 %6264 }
0x1757   : > { %9248 = vmatpush3.bf16.msra.mxu0 %v9245_v29  ;;  %v6221_v29 = vld [vmem:[#allocation19 + $0x1e8] sm:$0xff] }
0x1758   : > { %v9249_v30 = vpack.c.bf16 %v6227_v24, %v6226_v48  ;;  %v8629_v60 = vpop.f32.mrb[140].mxu1  ;;  %v6223_v24 = vld [vmem:[#allocation19 + $0x1f8] sm:$0xff]  ;;  %v6260_v48 = vpop.permute.xlu0 %6259 }
0x1759   : > { %v6229_v6 = vsub.f32 %v11581_v11, %v8629_v60  ;;  %v6148_v23 = vpop.f32.mrb[141].mxu1 }
0x175a   : > { %v6228_v55 = vsub.f32 %v11586_v54, %v6148_v23  ;;  %9250 = vmatprep.subr.bf16.mxu0 %v9249_v30 }
0x175b   : > { %9252 = vmatpush3.bf16.msra.mxu0 %v9249_v30  ;;  %v6275_v30 = vpop.permute.xlu1 %6274 }
0x175c   : > { %v9253_v42 = vpack.c.bf16 %v6229_v6, %v6228_v55  ;;  %v8632_v1 = vpop.f32.mrb[142].mxu1  ;;  %v6270_v60 = vpop.permute.xlu0 %6269 }
0x175d   : > { %v6231_v12 = vsub.f32 %v11606_v19, %v8632_v1  ;;  %v6158_v59 = vpop.f32.mrb[143].mxu1 }
0x175e   : > { %v6230_v49 = vsub.f32 %v11611_v47, %v6158_v59  ;;  %9254 = vmatprep.subr.bf16.mxu0 %v9253_v42 }
0x175f   : > { %9256 = vmatpush3.bf16.msra.mxu0 %v9253_v42  ;;  %v6285_v6 = vpop.permute.xlu1 %6284 }
0x1760   : > { %v9257_v10 = vpack.c.bf16 %v6231_v12, %v6230_v49  ;;  %v8635_v16 = vpop.f32.mrb[144].mxu1  ;;  %v6280_v23 = vpop.permute.xlu0 %6279 }
0x1761   : > { %v6233_v34 = vsub.f32 %v11631_v25, %v8635_v16  ;;  %v6168_v26 = vpop.f32.mrb[145].mxu1 }
0x1762   : > { %v6232_v32 = vsub.f32 %v11636_v56, %v6168_v26  ;;  %9258 = vmatprep.subr.bf16.mxu0 %v9257_v10 }
0x1763   : > { %9260 = vmatpush3.bf16.msra.mxu0 %v9257_v10  ;;  %v11836_v55 = vpop.permute.xlu1 %6294 }
0x1764   : > { %v9261_v43 = vpack.c.bf16 %v6233_v34, %v6232_v32  ;;  %v8638_v38 = vpop.f32.mrb[146].mxu1  ;;  %v11838_v42 = vpop.permute.xlu0 %6289 }
0x1765   : > { %v6235_v14 = vsub.f32 %v11656_v21, %v8638_v38  ;;  %v6178_v20 = vpop.f32.mrb[147].mxu1 }
0x1766   : > { %v6234_v27 = vsub.f32 %v11660_v51, %v6178_v20  ;;  %9262 = vmatprep.subr.bf16.mxu0 %v9261_v43 }
0x1767   : > { %9264 = vmatpush3.bf16.msra.mxu0 %v9261_v43  ;;  %v11840_v1 = vpop.permute.xlu1 %6304 }
0x1768   : > { %v9265_v62 = vpack.c.bf16 %v6235_v14, %v6234_v27  ;;  %v8641_v37 = vpop.f32.mrb[148].mxu1  ;;  %v11842_v12 = vpop.permute.xlu0 %6299 }
0x1769   : > { %v6237_v18 = vsub.f32 %v11677_v28, %v8641_v37  ;;  %v6188_v0 = vpop.f32.mrb[149].mxu1 }
0x176a   : > { %v6236_v50 = vsub.f32 %v11680_v45, %v6188_v0  ;;  %9266 = vmatprep.subr.bf16.mxu0 %v9265_v62 }
0x176b   : > { %9268 = vmatpush3.bf16.msra.mxu0 %v9265_v62  ;;  %v11844_v59 = vpop.permute.xlu1 %6314 }
0x176c   : > { %v9269_v3 = vpack.c.bf16 %v6237_v18, %v6236_v50  ;;  %v8644_v5 = vpop.f32.mrb[150].mxu1  ;;  %v11846_v49 = vpop.permute.xlu0 %6309 }
0x176d   : > { %v6239_v35 = vsub.f32 %v11694_v58, %v8644_v5  ;;  %v6198_v22 = vpop.f32.mrb[151].mxu1 }
0x176e   : > { %v6238_v44 = vsub.f32 %v11697_v36, %v6198_v22  ;;  %9270 = vmatprep.subr.bf16.mxu0 %v9269_v3 }
0x176f   : > { %9272 = vmatpush3.bf16.msra.mxu0 %v9269_v3  ;;  %v11848_v10 = vpop.permute.xlu1 %6324 }
0x1770   : > { %v9273_v53 = vpack.c.bf16 %v6239_v35, %v6238_v44  ;;  %v11850_v16 = vpop.permute.xlu0 %6319 }
0x1772   : > { %9274 = vmatprep.subr.bf16.mxu0 %v9273_v53 }
0x1773   : > { %9276 = vmatpush3.bf16.msra.mxu0 %v9273_v53  ;;  %v11852_v34 = vpop.permute.xlu1 %6334 }
0x1774   : > { %v11854_v26 = vpop.permute.xlu0 %6329 }
0x1775   : > { %12122 = vst [vmem:[#allocation40_spill] sm:$0xff] %v11854_v26 }
0x1776   : > { %8678 = vmatmul.mubr.f32.vlgmr.msra.gmra.mrb[128].mxu0 %v6209_v15 }
0x1777   : > { %8680 = vmatprep.mubr.f32.mxu0 %v6210_v2  ;;  %v6507_v32 = vpop.permute.xlu1 %6506 }
0x1778   : > { %v6502_v43 = vpop.permute.xlu0 %6501 }
0x177a   : > { %8681 = vmatmul.mubr.f32.gmra.mrb[130].mxu0 %v6211_v4 }
0x177b   : > { %8683 = vmatprep.mubr.f32.mxu0 %v6212_v33  ;;  %v6517_v38 = vpop.permute.xlu1 %6516 }
0x177c   : > { %v6512_v14 = vpop.permute.xlu0 %6511 }
0x177e   : > { %8684 = vmatmul.mubr.f32.gmra.mrb[132].mxu0 %v6213_v13 }
0x177f   : > { %8686 = vmatprep.mubr.f32.mxu0 %v6214_v63  ;;  %v6527_v20 = vpop.permute.xlu1 %6526 }
0x1780   : > { %v6522_v27 = vpop.permute.xlu0 %6521 }
0x1782   : > { %8687 = vmatmul.mubr.f32.gmra.mrb[134].mxu0 %v6215_v39 }
0x1783   : > { %8689 = vmatprep.mubr.f32.mxu0 %v6216_v7  ;;  %v6537_v62 = vpop.permute.xlu1 %6536 }
0x1784   : > { %v6532_v37 = vpop.permute.xlu0 %6531 }
0x1786   : > { %8690 = vmatmul.mubr.f32.gmra.mrb[136].mxu0 %v6217_v57 }
0x1787   : > { %8692 = vmatprep.mubr.f32.mxu0 %v6218_v17  ;;  %v11856_v18 = vpop.permute.xlu1 %6546 }
0x1788   : > { %v11858_v0 = vpop.permute.xlu0 %6541 }
0x178a   : > { %8693 = vmatmul.mubr.f32.gmra.mrb[138].mxu0 %v6219_v52 }
0x178b   : > { %8695 = vmatprep.mubr.f32.mxu0 %v6220_v40  ;;  %v11860_v50 = vpop.permute.xlu1 %6556 }
0x178c   : > { %v11862_v3 = vpop.permute.xlu0 %6551 }
0x178e   : > { %8696 = vmatmul.mubr.f32.gmra.mrb[140].mxu0 %v6221_v29 }
0x178f   : > { %8698 = vmatprep.mubr.f32.mxu0 %v6222_v61  ;;  %v11864_v5 = vpop.permute.xlu1 %6566 }
0x1790   : > { %v11866_v35 = vpop.permute.xlu0 %6561 }
0x1792   : > { %8699 = vmatmul.mubr.f32.gmra.mrb[142].mxu0 %v6223_v24 }
0x1793   : > { %v11868_v22 = vpop.permute.xlu1 %6576 }
0x1794   : > { %12123 = vst [vmem:[#allocation41_spill] sm:$0xff] %v11868_v22  ;;  %v11870_v44 = vpop.permute.xlu0 %6571 }
0x1795   : > { %12124 = vst [vmem:[#allocation42_spill] sm:$0xff] %v11870_v44 }
0x1797   : > { %v6620_v53 = vpop.permute.xlu1 %6619 }
0x1798   : > { %v6615_v15 = vpop.permute.xlu0 %6614 }
0x179b   : > { %v6630_v2 = vpop.permute.xlu1 %6629 }
0x179c   : > { %v6625_v4 = vpop.permute.xlu0 %6624 }
0x179f   : > { %v6640_v39 = vpop.permute.xlu1 %6639 }
0x17a0   : > { %v6635_v57 = vpop.permute.xlu0 %6634 }
0x17a3   : > { %v6650_v44 = vpop.permute.xlu1 %6649 }
0x1849   : > { %v8679_v33 = vpop.f32.mrb[128].mxu0 }
0x184a   : > { %v6409_v13 = vadd.f32 %v8679_v33, %v6265_v46  ;;  %v6403_v63 = vpop.f32.mrb[129].mxu0  ;;  %v6645_v33 = vpop.permute.xlu0 %6644 }
0x184b   : > { %v6404_v7 = vadd.f32 %v6403_v63, %v6260_v48 }
0x184c   : > { %v6580_v17 = vmul.f32 %v6507_v32, %v6409_v13 }
0x184d   : > { %v6579_v52 = vmul.f32 %v6502_v43, %v6404_v7  ;;  %v8682_v40 = vpop.f32.mrb[130].mxu0 }
0x184e   : > { %v6693_v29 = vadd.f32 %v6620_v53, %v6580_v17  ;;  %v6419_v61 = vadd.f32 %v8682_v40, %v6275_v30  ;;  %v6413_v24 = vpop.f32.mrb[131].mxu0 }
0x184f   : > { %v6692_v36 = vadd.f32 %v6615_v15, %v6579_v52  ;;  %v6414_v58 = vadd.f32 %v6413_v24, %v6270_v60 }
0x1850   : > { %v6709_v45 = vmax.f32 %v6693_v29, 0.0  ;;  %v6582_v28 = vmul.f32 %v6517_v38, %v6419_v61 }
0x1851   : > { %v6708_v22 = vmax.f32 %v6692_v36, 0.0  ;;  %v6581_v26 = vmul.f32 %v6512_v14, %v6414_v58  ;;  %v8685_v46 = vpop.f32.mrb[132].mxu0 }
0x1852   : > { %v6725_v48 = vadd.f32 %v6709_v45, %v11538_v8  ;;  %v6695_v63 = vadd.f32 %v6630_v2, %v6582_v28  ;;  %v6429_v32 = vadd.f32 %v8685_v46, %v6285_v6  ;;  %v6423_v43 = vpop.f32.mrb[133].mxu0 }
0x1853   : > { %v6724_v53 = vadd.f32 %v6708_v22, %v11541_v31  ;;  %v6694_v30 = vadd.f32 %v6625_v4, %v6581_v26  ;;  %v6424_v13 = vadd.f32 %v6423_v43, %v6280_v23  ;;  %v6660_v31 = vpop.permute.xlu1 %6659 }
0x1854   : > { %6741 = vst.msk [vmem:[%s10859_s30 + $0x188] sm:$0xff] %vm1668_vm1, %v6725_v48  ;;  %v6711_v60 = vmax.f32 %v6695_v63, 0.0  ;;  %v6584_v38 = vmul.f32 %v6527_v20, %v6429_v32  ;;  %v6655_v20 = vpop.permute.xlu0 %6654 }
0x1855   : > { %6740 = vst.msk [vmem:[%s10859_s30 + $0x180] sm:$0xff] %vm1668_vm1, %v6724_v53  ;;  %v6710_v58 = vmax.f32 %v6694_v30, 0.0  ;;  %v6583_v36 = vmul.f32 %v6522_v27, %v6424_v13  ;;  %v8688_v14 = vpop.f32.mrb[134].mxu0 }
0x1856   : > { %v6727_v8 = vadd.f32 %v6711_v60, %v11555_v9  ;;  %v6697_v28 = vadd.f32 %v6640_v39, %v6584_v38  ;;  %v6439_v45 = vadd.f32 %v8688_v14, %v11836_v55  ;;  %v6433_v6 = vpop.f32.mrb[135].mxu0 }
0x1857   : > { %v6726_v23 = vadd.f32 %v6710_v58, %v11560_v41  ;;  %v6696_v26 = vadd.f32 %v6635_v57, %v6583_v36  ;;  %v6434_v22 = vadd.f32 %v6433_v6, %v11838_v42  ;;  %v6670_v40 = vpop.permute.xlu1 %6669 }
0x1858   : > { %6743 = vst.msk [vmem:[%s10859_s30 + $0x198] sm:$0xff] %vm1668_vm1, %v6727_v8  ;;  %v6713_v15 = vmax.f32 %v6697_v28, 0.0  ;;  %v6586_v2 = vmul.f32 %v6537_v62, %v6439_v45  ;;  %v12125_v28 = vld [vmem:[#allocation40_spill] sm:$0xff] }
0x1859   : > { %6742 = vst.msk [vmem:[%s10859_s30 + $0x190] sm:$0xff] %vm1668_vm1, %v6726_v23  ;;  %v6712_v9 = vmax.f32 %v6696_v26, 0.0  ;;  %v6585_v27 = vmul.f32 %v6532_v37, %v6434_v22  ;;  %v8691_v4 = vpop.f32.mrb[136].mxu0 }
0x185a   : > { %v6729_v55 = vadd.f32 %v6713_v15, %v11581_v11  ;;  %v6699_v39 = vadd.f32 %v6650_v44, %v6586_v2  ;;  %v6449_v41 = vadd.f32 %v8691_v4, %v11840_v1  ;;  %v6443_v7 = vpop.f32.mrb[137].mxu0  ;;  %v6665_v44 = vpop.permute.xlu0 %6664  ;;  %v12129_v15 = vld [vmem:[#allocation44_spill] sm:$0xff] }
0x185b   : > { %v6728_v42 = vadd.f32 %v6712_v9, %v11586_v54  ;;  %v6698_v57 = vadd.f32 %v6645_v33, %v6585_v27  ;;  %v6444_v17 = vadd.f32 %v6443_v7, %v11842_v12 }
0x185c   : > { %6745 = vst.msk [vmem:[%s10859_s30 + $0x1a8] sm:$0xff] %vm1668_vm1, %v6729_v55  ;;  %v6715_v62 = vmax.f32 %v6699_v39, 0.0  ;;  %v6588_v52 = vmul.f32 %v11856_v18, %v6449_v41  ;;  %v12130_v55 = vld [vmem:[#allocation45_spill] sm:$0xff]  ;;  %v12132_v41 = vld [vmem:[#allocation39_spill] sm:$0xff] }
0x185d   : > { %6744 = vst.msk [vmem:[%s10859_s30 + $0x1a0] sm:$0xff] %vm1668_vm1, %v6728_v42  ;;  %v6714_v11 = vmax.f32 %v6698_v57, 0.0  ;;  %v6587_v37 = vmul.f32 %v11858_v0, %v6444_v17  ;;  %v8694_v1 = vpop.f32.mrb[138].mxu0 }
0x185e   : > { %v6731_v54 = vadd.f32 %v6715_v62, %v11606_v19  ;;  %v6701_v29 = vadd.f32 %v6660_v31, %v6588_v52  ;;  %v6459_v12 = vadd.f32 %v8694_v1, %v11844_v59  ;;  %v6453_v61 = vpop.f32.mrb[139].mxu0 }
0x185f   : > { %v6730_v24 = vadd.f32 %v6714_v11, %v11611_v47  ;;  %v6700_v46 = vadd.f32 %v6655_v20, %v6587_v37  ;;  %v6454_v18 = vadd.f32 %v6453_v61, %v11846_v49  ;;  %v6680_v49 = vpop.permute.xlu1 %6679 }
0x1860   : > { %6747 = vst.msk [vmem:[%s10859_s30 + $0x1b8] sm:$0xff] %vm1668_vm1, %v6731_v54  ;;  %v6717_v33 = vmax.f32 %v6701_v29, 0.0  ;;  %v6590_v48 = vmul.f32 %v11860_v50, %v6459_v12  ;;  %v6675_v50 = vpop.permute.xlu0 %6674 }
0x1861   : > { %6746 = vst.msk [vmem:[%s10859_s30 + $0x1b0] sm:$0xff] %vm1668_vm1, %v6730_v24  ;;  %v6716_v0 = vmax.f32 %v6700_v46, 0.0  ;;  %v6589_v19 = vmul.f32 %v11862_v3, %v6454_v18  ;;  %v8697_v63 = vpop.f32.mrb[140].mxu0 }
0x1862   : > { %v6733_v59 = vadd.f32 %v6717_v33, %v11631_v25  ;;  %v6703_v32 = vadd.f32 %v6670_v40, %v6590_v48  ;;  %v6469_v47 = vadd.f32 %v8697_v63, %v11848_v10  ;;  %v6463_v43 = vpop.f32.mrb[141].mxu0 }
0x1863   : > { %v6732_v53 = vadd.f32 %v6716_v0, %v11636_v56  ;;  %v6702_v30 = vadd.f32 %v6665_v44, %v6589_v19  ;;  %v6464_v13 = vadd.f32 %v6463_v43, %v11850_v16  ;;  %v6690_v31 = vpop.permute.xlu1 %6689 }
0x1864   : > { %6749 = vst.msk [vmem:[%s10859_s30 + $0x1c8] sm:$0xff] %vm1668_vm1, %v6733_v59  ;;  %v6719_v60 = vmax.f32 %v6703_v32, 0.0  ;;  %v6592_v3 = vmul.f32 %v11864_v5, %v6469_v47  ;;  %v6685_v26 = vpop.permute.xlu0 %6684 }
0x1865   : > { %6748 = vst.msk [vmem:[%s10859_s30 + $0x1c0] sm:$0xff] %vm1668_vm1, %v6732_v53  ;;  %v6718_v25 = vmax.f32 %v6702_v30, 0.0  ;;  %v6591_v10 = vmul.f32 %v11866_v35, %v6464_v13  ;;  %v8700_v38 = vpop.f32.mrb[142].mxu0  ;;  %v12126_v35 = vld [vmem:[#allocation41_spill] sm:$0xff] }
0x1866   : > { %v6735_v58 = vadd.f32 %v6719_v60, %v11656_v21  ;;  %v6705_v56 = vadd.f32 %v6680_v49, %v6592_v3  ;;  %v6479_v36 = vadd.f32 %v8700_v38, %v11852_v34  ;;  %v6473_v16 = vpop.f32.mrb[143].mxu0  ;;  %v12127_v34 = vld [vmem:[#allocation42_spill] sm:$0xff] }
0x1867   : > { %v6734_v14 = vadd.f32 %v6718_v25, %v11660_v51  ;;  %v6704_v8 = vadd.f32 %v6675_v50, %v6591_v10  ;;  %v6474_v5 = vadd.f32 %v6473_v16, %v12125_v28  ;;  %v12128_v51 = vld [vmem:[#allocation43_spill] sm:$0xff] }
0x1868   : > { %6751 = vst.msk [vmem:[%s10859_s30 + $0x1d8] sm:$0xff] %vm1668_vm1, %v6735_v58  ;;  %v6721_v45 = vmax.f32 %v6705_v56, 0.0  ;;  %v6594_v6 = vmul.f32 %v12126_v35, %v6479_v36 }
0x1869   : > { %6750 = vst.msk [vmem:[%s10859_s30 + $0x1d0] sm:$0xff] %vm1668_vm1, %v6734_v14  ;;  %v6720_v21 = vmax.f32 %v6704_v8, 0.0  ;;  %v6593_v23 = vmul.f32 %v12127_v34, %v6474_v5 }
0x186a   : > { %v6737_v22 = vadd.f32 %v6721_v45, %v12128_v51  ;;  %v6707_v20 = vadd.f32 %v6690_v31, %v6594_v6 }
0x186b   : > { %v6736_v2 = vadd.f32 %v6720_v21, %v12129_v15  ;;  %v6706_v9 = vadd.f32 %v6685_v26, %v6593_v23 }
0x186c   : > { %6753 = vst.msk [vmem:[%s10859_s30 + $0x1e8] sm:$0xff] %vm1668_vm1, %v6737_v22  ;;  %v6723_v27 = vmax.f32 %v6707_v20, 0.0 }
0x186d   : > { %6752 = vst.msk [vmem:[%s10859_s30 + $0x1e0] sm:$0xff] %vm1668_vm1, %v6736_v2  ;;  %v6722_v4 = vmax.f32 %v6706_v9, 0.0 }
0x186e   : > { %v6739_v39 = vadd.f32 %v6723_v27, %v12130_v55 }
0x186f   : > { %v6738_v7 = vadd.f32 %v6722_v4, %v12132_v41 }
0x1870   : > { %6755 = vst.msk [vmem:[%s10859_s30 + $0x1f8] sm:$0xff] %vm1668_vm1, %v6739_v39 }
0x1871   : > { %6754 = vst.msk [vmem:[%s10859_s30 + $0x1f0] sm:$0xff] %vm1668_vm1, %v6738_v7 }
0x1872   : > { %9940 = shalt.err (!%p9937_p4)
}
0x1873   : > { %s9941_s30 = scalar_lea.hbm %s11938_s25, 8192  ;;  %s9945_s17 = scalar_lea.hbm %s12131_s14, 16384 }
0x1874   : > { %p9942_p12 = scmp.ne.s32.totalorder %s11938_s25, %s9941_s30  ;;  %p9946_p0 = scmp.lt.u32.totalorder %s11938_s25, %s12131_s14 }
0x1875   : > { %p9947_p2 = scmp.lt.u32.totalorder %s9945_s17, %s9941_s30  ;;  %p9949_p6 = scmp.lt.u32.totalorder %s9941_s30, %s11938_s25 }
0x1876   : > { %p9943_p1 = pnand %p9942_p12, %p12133_p10 }
0x1877   : > { %p9948_p8 = por %p9947_p2, %p9946_p0 }
0x1878   : > { %p9944_p13 = pneg %p9943_p1 }
0x1879   : > { %p9950_p11 = por %p9949_p6, %p9948_p8 }
0x187b   : > { %p9951_p3 = pnand %p9950_p11, %p9944_p13 }
0x187d   : > { %9954 = shalt.err (!%p9951_p3)
}
0x187e   : > { %s10041_s27 = smov 128   ;;  %s10042_s26 = smov 8  }
0x187f   : > { %9331 = dma.vmem_to_hbm [thread:$0]  (%p12133_p10), %s11940_s22, 8192, %s11938_s25, %s6757_s0, %s10041_s27, %s10041_s27, %s10042_s26  }
0x1880 PF: > { %s12134_s19 = sld [smem:[#allocation35_spill]]  ;;  %p12135_p5 = scmp.ne.s32.totalorder %s12057_s1, 0 }
0x1881   : > { %p12136_p9 = scmp.ge.s32.totalorder %s10021_s16, 2 }
0x1883   : > { %p9378_p7 = pnand %p12136_p9, %p12135_p5 }
0x1886   : > { %s6785_s20 = sand.u32 1, %s12134_s19  }
0x1887   : > { %s6786_s30 = scalar_lea.sflag [#allocation4], %s6785_s20 }
0x1888   : > { %10004 = dma.done.wait (!%p9378_p7), %s6786_s30, 8192  }
0x1889   : > { %10006 = vsyncadd (!%p9378_p7), %s6786_s30, 4294959104  ;;  %s12137_s17 = sld [smem:[#allocation36_spill]]  ;;  %s12138_s21 = smov %s10459_s29 }
0x188a   : > { %p34_p4 = scmp.ge.s32.totalorder %s10459_s29, 4   ;;  %s12140_s30 = smov %s10017_s15 }
0x188b   : > { %s12141_s15 = smov %s10471_s18  ;;  %s12142_s16 = smov %s12138_s21 }
0x188c   :  { %36 = sbr.rel (!%p34_p4) target bundleno = 17 (0x11), region = 194 }
0x188f   : > { %s12139_s29 = smov %s12137_s17 }
0x1893   :  { %6791 = vsyncpa [#allocation3], 1 }
0x1894   :  { %6793 = vsyncpa [#allocation3 + $0x1], 1 }
0x1895   :  { %6794 = vsyncpa [#allocation6], 1 }
0x1896   :  { %6795 = vsyncpa [#allocation9], 1 }
0x1897   :  { %6796 = vsyncpa [#allocation12], 1 }
0x1898   :  { %6797 = vsyncpa [#allocation15], 1 }
0x1899   :  { %6798 = vsyncpa [#allocation18], 1 }
0x189a   :  { %6799 = vsyncpa [#allocation21], 1 }
0x189b   :  { %6800 = vsyncpa [#allocation24], 1 }
0x189c   :  { %6801 = vsyncpa [#allocation4], 1 }
0x189d   :  { %6803 = vsyncpa [#allocation4 + $0x1], 1 }

</bundles_post_ra>
